<compile_context>
chip_gen: v5e
topology: v5e:2x2
jax: 0.10.0
libtpu: 0.0.40
codegen_flags: <defaults>
</compile_context>

<pallas_src>
import jax
import jax.numpy as jnp
from jax.experimental import pallas as pl
from jax.experimental.pallas import tpu as pltpu


# ----------------------------------------------------------------------------- fused kernel
def _fused_gru_fc_kernel(
    x_ref,                                    # (T, B, F) time-major
    w1i_ref, w1h_ref, b1i_ref, b1hn_ref,      # layer 1: (3,F,H) (3,H,H) (3,1,H) (1,H)
    w2i_ref, w2h_ref, b2i_ref, b2hn_ref,      # layer 2: (3,H,H) (3,H,H) (3,1,H) (1,H)
    wfc_ref, bfc_ref,                         # (H, O), (1, O)
    o_ref,                                    # (B, O)
    h1_buf,                                   # VMEM scratch (T, B, H): layer-1 outputs
):
    T, B, F = x_ref.shape
    H = w1h_ref.shape[1]
    f32 = jnp.float32

    # ---------------- layer 1 ----------------
    # Hoisted input projection: one (T*B, F) @ (F, H) matmul per gate, off the critical path.
    xs = x_ref[...].reshape(T * B, F)
    gi1 = [
        (jnp.dot(xs, w1i_ref[g], preferred_element_type=f32) + b1i_ref[g]).reshape(T, B, H)
        for g in range(3)
    ]
    w1h = [w1h_ref[g] for g in range(3)]
    b1hn = b1hn_ref[...]

    h1 = jnp.zeros((B, H), f32)
    for t in range(T):                                      # fully unrolled recurrence
        gh_r = jnp.dot(h1, w1h[0], preferred_element_type=f32)
        gh_z = jnp.dot(h1, w1h[1], preferred_element_type=f32)
        gh_n = jnp.dot(h1, w1h[2], preferred_element_type=f32) + b1hn
        r = jax.nn.sigmoid(gi1[0][t] + gh_r)
        z = jax.nn.sigmoid(gi1[1][t] + gh_z)
        n = jnp.tanh(gi1[2][t] + r * gh_n)
        h1 = n + z * (h1 - n)
        h1_buf[t] = h1                                      # stage for layer-2 batched matmul

    # ---------------- layer 2 ----------------
    # Input projection hoisted across all T steps (one (T*B, H) @ (H, H) matmul per gate).
    h1_all = h1_buf[...].reshape(T * B, H)
    gi2 = [
        (jnp.dot(h1_all, w2i_ref[g], preferred_element_type=f32) + b2i_ref[g]).reshape(T, B, H)
        for g in range(3)
    ]
    w2h = [w2h_ref[g] for g in range(3)]
    b2hn = b2hn_ref[...]

    h2 = jnp.zeros((B, H), f32)
    for t in range(T):
        gh_r = jnp.dot(h2, w2h[0], preferred_element_type=f32)
        gh_z = jnp.dot(h2, w2h[1], preferred_element_type=f32)
        gh_n = jnp.dot(h2, w2h[2], preferred_element_type=f32) + b2hn
        r = jax.nn.sigmoid(gi2[0][t] + gh_r)
        z = jax.nn.sigmoid(gi2[1][t] + gh_z)
        n = jnp.tanh(gi2[2][t] + r * gh_n)
        h2 = n + z * (h2 - n)

    # ---------------- FC head (last time step only) ----------------
    out = jnp.dot(h2, wfc_ref[...], preferred_element_type=f32) + bfc_ref[...]
    o_ref[...] = out.astype(o_ref.dtype)


# ----------------------------------------------------------------------------- wrapper
def _split_gates(w_ih, w_hh, b_ih, b_hh):
    """PyTorch-layout GRU params -> gate-stacked, transposed kernel layout.

    Returns (w_i (3,in,H), w_h (3,H,H), b_i_combined (3,1,H), b_hn (1,H)).
    For the r/z gates the input & hidden biases simply add, so they are folded into b_i;
    the n-gate hidden bias must stay inside the r * (.) term and is passed separately.
    """
    H = w_hh.shape[1]
    w_i = jnp.stack([w_ih[g * H:(g + 1) * H, :].T for g in range(3)], axis=0)  # (3, in, H)
    w_h = jnp.stack([w_hh[g * H:(g + 1) * H, :].T for g in range(3)], axis=0)  # (3, H, H)
    b_i = b_ih.reshape(3, 1, H)
    b_h = b_hh.reshape(3, 1, H)
    b_i_comb = jnp.concatenate([b_i[:2] + b_h[:2], b_i[2:3]], axis=0)           # (3, 1, H)
    b_hn = b_h[2]                                                               # (1, H)
    return w_i, w_h, b_i_comb, b_hn


@jax.jit
def heart_rate_gru_model(x_btf, params):
    """Forward pass equivalent to HeartRateGRUModel.forward.

    x_btf : (B, T, F) float32 (PyTorch batch_first layout).  Returns (B, 1) float32.
    """
    assert len(params["gru"]) == 2, "kernel is specialized to num_layers=2"
    B, T, _F = x_btf.shape
    x_tbf = jnp.swapaxes(x_btf, 0, 1)            # time-major: contiguous per-step slabs

    gate_args = []
    for layer in params["gru"]:
        gate_args.extend(_split_gates(*layer))

    wfc = params["fc_w"].T                       # (H, O)
    bfc = params["fc_b"].reshape(1, -1)          # (1, O)
    H, O = wfc.shape

    vmem = pl.BlockSpec(memory_space=pltpu.MemorySpace.VMEM)
    return pl.pallas_call(
        _fused_gru_fc_kernel,
        out_shape=jax.ShapeDtypeStruct((B, O), jnp.float32),
        in_specs=[vmem] * (1 + len(gate_args) + 2),   # whole arrays, VMEM-resident
        out_specs=vmem,
        scratch_shapes=[pltpu.VMEM((T, B, H), jnp.float32)],
    )(x_tbf, *gate_args, wfc, bfc)


# ----------------------------------------------------------------------------- param init (PyTorch layout)
def init_params(key, input_size, hidden_size, num_layers, output_size):
    bound = 1.0 / float(hidden_size) ** 0.5
    params = {"gru": []}
    for layer in range(num_layers):
        in_dim = input_size if layer == 0 else hidden_size
        key, k1, k2, k3, k4 = jax.random.split(key, 5)
        w_ih = jax.random.uniform(k1, (3 * hidden_size, in_dim), jnp.float32, -bound, bound)
        w_hh = jax.random.uniform(k2, (3 * hidden_size, hidden_size), jnp.float32, -bound, bound)
        b_ih = jax.random.uniform(k3, (3 * hidden_size,), jnp.float32, -bound, bound)
        b_hh = jax.random.uniform(k4, (3 * hidden_size,), jnp.float32, -bound, bound)
        params["gru"].append((w_ih, w_hh, b_ih, b_hh))
    key, k5, k6 = jax.random.split(key, 3)
    params["fc_w"] = jax.random.uniform(k5, (output_size, hidden_size), jnp.float32, -bound, bound)
    params["fc_b"] = jax.random.uniform(k6, (output_size,), jnp.float32, -bound, bound)
    return params


# ----------------------------------------------------------------------------- pure-JAX reference
def reference_forward(x_btf, params):
    B, T, _ = x_btf.shape
    seq = x_btf
    for (w_ih, w_hh, b_ih, b_hh) in params["gru"]:
        H = w_hh.shape[1]
        h = jnp.zeros((B, H), jnp.float32)
        outs = []
        for t in range(T):
            gi = seq[:, t, :] @ w_ih.T + b_ih
            gh = h @ w_hh.T + b_hh
            r = jax.nn.sigmoid(gi[:, :H] + gh[:, :H])
            z = jax.nn.sigmoid(gi[:, H:2 * H] + gh[:, H:2 * H])
            n = jnp.tanh(gi[:, 2 * H:] + r * gh[:, 2 * H:])
            h = (1.0 - z) * n + z * h
            outs.append(h)
        seq = jnp.stack(outs, axis=1)
    return seq[:, -1, :] @ params["fc_w"].T + params["fc_b"]


# ----------------------------------------------------------------------------- main
if __name__ == "__main__":
    B, T, F = 4, 8, 16            # batch, sequence length, input features
    HIDDEN, LAYERS, OUT = 64, 2, 1

    key = jax.random.PRNGKey(0)
    key, kx = jax.random.split(key)
    x = jax.random.normal(kx, (B, T, F), jnp.float32)
    params = init_params(key, F, HIDDEN, LAYERS, OUT)

    y = heart_rate_gru_model(x, params)
    y = jax.block_until_ready(y)

    y_ref = reference_forward(x, params)
    assert y.shape == (B, OUT)
    assert jnp.allclose(y, y_ref, atol=1e-4, rtol=1e-4), "mismatch vs pure-JAX reference"

    print("KERNEL_OK")
</pallas_src>

<mosaic_0001>
module attributes {stable_mosaic.version = 11 : i64} {
  func.func @_fused_gru_fc_kernel(%arg0: memref<8x4x16xf32, #tpu.memory_space<vmem>>, %arg1: memref<3x16x64xf32, #tpu.memory_space<vmem>>, %arg2: memref<3x64x64xf32, #tpu.memory_space<vmem>>, %arg3: memref<3x1x64xf32, #tpu.memory_space<vmem>>, %arg4: memref<1x64xf32, #tpu.memory_space<vmem>>, %arg5: memref<3x64x64xf32, #tpu.memory_space<vmem>>, %arg6: memref<3x64x64xf32, #tpu.memory_space<vmem>>, %arg7: memref<3x1x64xf32, #tpu.memory_space<vmem>>, %arg8: memref<1x64xf32, #tpu.memory_space<vmem>>, %arg9: memref<64x1xf32, #tpu.memory_space<vmem>>, %arg10: memref<1x1xf32, #tpu.memory_space<vmem>>, %arg11: memref<4x1xf32, #tpu.memory_space<vmem>>, %arg12: memref<8x4x64xf32, #tpu.memory_space<vmem>>) attributes {dimension_semantics = [], scalar_prefetch = 0 : i64, scratch_operands = 1 : i64, tpu.core_type = #tpu.core_type<tc>} {
    %c0 = arith.constant 0 : index
    %c0_0 = arith.constant 0 : index
    %c0_1 = arith.constant 0 : index
    %0 = vector.load %arg0[%c0, %c0_0, %c0_1] : memref<8x4x16xf32, #tpu.memory_space<vmem>>, vector<8x4x16xf32>
    %1 = vector.shape_cast %0 : vector<8x4x16xf32> to vector<32x16xf32>
    %c0_2 = arith.constant 0 : index
    %c0_3 = arith.constant 0 : index
    %c0_4 = arith.constant 0 : index
    %2 = vector.load %arg1[%c0_2, %c0_3, %c0_4] : memref<3x16x64xf32, #tpu.memory_space<vmem>>, vector<1x16x64xf32>
    %3 = vector.shape_cast %2 : vector<1x16x64xf32> to vector<16x64xf32>
    %cst = arith.constant dense<0.000000e+00> : vector<32x64xf32>
    %4 = tpu.matmul %1, %3, %cst {dimension_numbers = #tpu.dot_dimension_numbers<[1], [0], [0], [1], [0, 0, 1, 1], [], []>} : vector<32x16xf32>, vector<16x64xf32>, vector<32x64xf32> -> vector<32x64xf32>
    %c0_5 = arith.constant 0 : index
    %c0_6 = arith.constant 0 : index
    %c0_7 = arith.constant 0 : index
    %5 = vector.load %arg3[%c0_5, %c0_6, %c0_7] : memref<3x1x64xf32, #tpu.memory_space<vmem>>, vector<1x1x64xf32>
    %6 = vector.shape_cast %5 : vector<1x1x64xf32> to vector<1x64xf32>
    %7 = vector.broadcast %6 : vector<1x64xf32> to vector<32x64xf32>
    %8 = arith.addf %4, %7 : vector<32x64xf32>
    %9 = vector.shape_cast %8 : vector<32x64xf32> to vector<8x4x64xf32>
    %c1 = arith.constant 1 : index
    %c0_8 = arith.constant 0 : index
    %c0_9 = arith.constant 0 : index
    %10 = vector.load %arg1[%c1, %c0_8, %c0_9] : memref<3x16x64xf32, #tpu.memory_space<vmem>>, vector<1x16x64xf32>
    %11 = vector.shape_cast %10 : vector<1x16x64xf32> to vector<16x64xf32>
    %cst_10 = arith.constant dense<0.000000e+00> : vector<32x64xf32>
    %12 = tpu.matmul %1, %11, %cst_10 {dimension_numbers = #tpu.dot_dimension_numbers<[1], [0], [0], [1], [0, 0, 1, 1], [], []>} : vector<32x16xf32>, vector<16x64xf32>, vector<32x64xf32> -> vector<32x64xf32>
    %c1_11 = arith.constant 1 : index
    %c0_12 = arith.constant 0 : index
    %c0_13 = arith.constant 0 : index
    %13 = vector.load %arg3[%c1_11, %c0_12, %c0_13] : memref<3x1x64xf32, #tpu.memory_space<vmem>>, vector<1x1x64xf32>
    %14 = vector.shape_cast %13 : vector<1x1x64xf32> to vector<1x64xf32>
    %15 = vector.broadcast %14 : vector<1x64xf32> to vector<32x64xf32>
    %16 = arith.addf %12, %15 : vector<32x64xf32>
    %17 = vector.shape_cast %16 : vector<32x64xf32> to vector<8x4x64xf32>
    %c2 = arith.constant 2 : index
    %c0_14 = arith.constant 0 : index
    %c0_15 = arith.constant 0 : index
    %18 = vector.load %arg1[%c2, %c0_14, %c0_15] : memref<3x16x64xf32, #tpu.memory_space<vmem>>, vector<1x16x64xf32>
    %19 = vector.shape_cast %18 : vector<1x16x64xf32> to vector<16x64xf32>
    %cst_16 = arith.constant dense<0.000000e+00> : vector<32x64xf32>
    %20 = tpu.matmul %1, %19, %cst_16 {dimension_numbers = #tpu.dot_dimension_numbers<[1], [0], [0], [1], [0, 0, 1, 1], [], []>} : vector<32x16xf32>, vector<16x64xf32>, vector<32x64xf32> -> vector<32x64xf32>
    %c2_17 = arith.constant 2 : index
    %c0_18 = arith.constant 0 : index
    %c0_19 = arith.constant 0 : index
    %21 = vector.load %arg3[%c2_17, %c0_18, %c0_19] : memref<3x1x64xf32, #tpu.memory_space<vmem>>, vector<1x1x64xf32>
    %22 = vector.shape_cast %21 : vector<1x1x64xf32> to vector<1x64xf32>
    %23 = vector.broadcast %22 : vector<1x64xf32> to vector<32x64xf32>
    %24 = arith.addf %20, %23 : vector<32x64xf32>
    %25 = vector.shape_cast %24 : vector<32x64xf32> to vector<8x4x64xf32>
    %c0_20 = arith.constant 0 : index
    %c0_21 = arith.constant 0 : index
    %c0_22 = arith.constant 0 : index
    %26 = vector.load %arg2[%c0_20, %c0_21, %c0_22] : memref<3x64x64xf32, #tpu.memory_space<vmem>>, vector<1x64x64xf32>
    %27 = vector.shape_cast %26 : vector<1x64x64xf32> to vector<64x64xf32>
    %c1_23 = arith.constant 1 : index
    %c0_24 = arith.constant 0 : index
    %c0_25 = arith.constant 0 : index
    %28 = vector.load %arg2[%c1_23, %c0_24, %c0_25] : memref<3x64x64xf32, #tpu.memory_space<vmem>>, vector<1x64x64xf32>
    %29 = vector.shape_cast %28 : vector<1x64x64xf32> to vector<64x64xf32>
    %c2_26 = arith.constant 2 : index
    %c0_27 = arith.constant 0 : index
    %c0_28 = arith.constant 0 : index
    %30 = vector.load %arg2[%c2_26, %c0_27, %c0_28] : memref<3x64x64xf32, #tpu.memory_space<vmem>>, vector<1x64x64xf32>
    %31 = vector.shape_cast %30 : vector<1x64x64xf32> to vector<64x64xf32>
    %c0_29 = arith.constant 0 : index
    %c0_30 = arith.constant 0 : index
    %32 = vector.load %arg4[%c0_29, %c0_30] : memref<1x64xf32, #tpu.memory_space<vmem>>, vector<1x64xf32>
    %cst_31 = arith.constant 0.000000e+00 : f32
    %33 = vector.broadcast %cst_31 : f32 to vector<4x64xf32>
    %cst_32 = arith.constant dense<0.000000e+00> : vector<4x64xf32>
    %34 = tpu.matmul %33, %27, %cst_32 {dimension_numbers = #tpu.dot_dimension_numbers<[1], [0], [0], [1], [0, 0, 1, 1], [], []>} : vector<4x64xf32>, vector<64x64xf32>, vector<4x64xf32> -> vector<4x64xf32>
    %cst_33 = arith.constant dense<0.000000e+00> : vector<4x64xf32>
    %35 = tpu.matmul %33, %29, %cst_33 {dimension_numbers = #tpu.dot_dimension_numbers<[1], [0], [0], [1], [0, 0, 1, 1], [], []>} : vector<4x64xf32>, vector<64x64xf32>, vector<4x64xf32> -> vector<4x64xf32>
    %cst_34 = arith.constant dense<0.000000e+00> : vector<4x64xf32>
    %36 = tpu.matmul %33, %31, %cst_34 {dimension_numbers = #tpu.dot_dimension_numbers<[1], [0], [0], [1], [0, 0, 1, 1], [], []>} : vector<4x64xf32>, vector<64x64xf32>, vector<4x64xf32> -> vector<4x64xf32>
    %37 = vector.broadcast %32 : vector<1x64xf32> to vector<4x64xf32>
    %38 = arith.addf %36, %37 : vector<4x64xf32>
    %39 = vector.extract_strided_slice %9 {offsets = [0, 0, 0], sizes = [1, 4, 64], strides = [1, 1, 1]} : vector<8x4x64xf32> to vector<1x4x64xf32>
    %40 = vector.shape_cast %39 : vector<1x4x64xf32> to vector<4x64xf32>
    %41 = arith.addf %40, %34 : vector<4x64xf32>
    %42 = arith.negf %41 : vector<4x64xf32>
    %43 = math.exp %42 : vector<4x64xf32>
    %cst_35 = arith.constant 1.000000e+00 : f32
    %44 = vector.broadcast %cst_35 : f32 to vector<4x64xf32>
    %45 = arith.addf %44, %43 : vector<4x64xf32>
    %46 = arith.divf %44, %45 : vector<4x64xf32>
    %47 = vector.extract_strided_slice %17 {offsets = [0, 0, 0], sizes = [1, 4, 64], strides = [1, 1, 1]} : vector<8x4x64xf32> to vector<1x4x64xf32>
    %48 = vector.shape_cast %47 : vector<1x4x64xf32> to vector<4x64xf32>
    %49 = arith.addf %48, %35 : vector<4x64xf32>
    %50 = arith.negf %49 : vector<4x64xf32>
    %51 = math.exp %50 : vector<4x64xf32>
    %cst_36 = arith.constant 1.000000e+00 : f32
    %52 = vector.broadcast %cst_36 : f32 to vector<4x64xf32>
    %53 = arith.addf %52, %51 : vector<4x64xf32>
    %54 = arith.divf %52, %53 : vector<4x64xf32>
    %55 = vector.extract_strided_slice %25 {offsets = [0, 0, 0], sizes = [1, 4, 64], strides = [1, 1, 1]} : vector<8x4x64xf32> to vector<1x4x64xf32>
    %56 = vector.shape_cast %55 : vector<1x4x64xf32> to vector<4x64xf32>
    %57 = arith.mulf %46, %38 : vector<4x64xf32>
    %58 = arith.addf %56, %57 : vector<4x64xf32>
    %59 = math.tanh %58 : vector<4x64xf32>
    %60 = arith.subf %33, %59 : vector<4x64xf32>
    %61 = arith.mulf %54, %60 : vector<4x64xf32>
    %62 = arith.addf %59, %61 : vector<4x64xf32>
    %c0_37 = arith.constant 0 : index
    %c0_38 = arith.constant 0 : index
    %c0_39 = arith.constant 0 : index
    %63 = vector.load %arg12[%c0_37, %c0_38, %c0_39] : memref<8x4x64xf32, #tpu.memory_space<vmem>>, vector<1x4x64xf32>
    %64 = vector.shape_cast %63 : vector<1x4x64xf32> to vector<4x64xf32>
    %65 = vector.shape_cast %62 : vector<4x64xf32> to vector<1x4x64xf32>
    tpu.vector_store %arg12[%c0_37, %c0_38, %c0_39], %65 {strides = array<i32>} : memref<8x4x64xf32, #tpu.memory_space<vmem>>, vector<1x4x64xf32>,
    %cst_40 = arith.constant dense<0.000000e+00> : vector<4x64xf32>
    %66 = tpu.matmul %62, %27, %cst_40 {dimension_numbers = #tpu.dot_dimension_numbers<[1], [0], [0], [1], [0, 0, 1, 1], [], []>} : vector<4x64xf32>, vector<64x64xf32>, vector<4x64xf32> -> vector<4x64xf32>
    %cst_41 = arith.constant dense<0.000000e+00> : vector<4x64xf32>
    %67 = tpu.matmul %62, %29, %cst_41 {dimension_numbers = #tpu.dot_dimension_numbers<[1], [0], [0], [1], [0, 0, 1, 1], [], []>} : vector<4x64xf32>, vector<64x64xf32>, vector<4x64xf32> -> vector<4x64xf32>
    %cst_42 = arith.constant dense<0.000000e+00> : vector<4x64xf32>
    %68 = tpu.matmul %62, %31, %cst_42 {dimension_numbers = #tpu.dot_dimension_numbers<[1], [0], [0], [1], [0, 0, 1, 1], [], []>} : vector<4x64xf32>, vector<64x64xf32>, vector<4x64xf32> -> vector<4x64xf32>
    %69 = vector.broadcast %32 : vector<1x64xf32> to vector<4x64xf32>
    %70 = arith.addf %68, %69 : vector<4x64xf32>
    %71 = vector.extract_strided_slice %9 {offsets = [1, 0, 0], sizes = [1, 4, 64], strides = [1, 1, 1]} : vector<8x4x64xf32> to vector<1x4x64xf32>
    %72 = vector.shape_cast %71 : vector<1x4x64xf32> to vector<4x64xf32>
    %73 = arith.addf %72, %66 : vector<4x64xf32>
    %74 = arith.negf %73 : vector<4x64xf32>
    %75 = math.exp %74 : vector<4x64xf32>
    %cst_43 = arith.constant 1.000000e+00 : f32
    %76 = vector.broadcast %cst_43 : f32 to vector<4x64xf32>
    %77 = arith.addf %76, %75 : vector<4x64xf32>
    %78 = arith.divf %76, %77 : vector<4x64xf32>
    %79 = vector.extract_strided_slice %17 {offsets = [1, 0, 0], sizes = [1, 4, 64], strides = [1, 1, 1]} : vector<8x4x64xf32> to vector<1x4x64xf32>
    %80 = vector.shape_cast %79 : vector<1x4x64xf32> to vector<4x64xf32>
    %81 = arith.addf %80, %67 : vector<4x64xf32>
    %82 = arith.negf %81 : vector<4x64xf32>
    %83 = math.exp %82 : vector<4x64xf32>
    %cst_44 = arith.constant 1.000000e+00 : f32
    %84 = vector.broadcast %cst_44 : f32 to vector<4x64xf32>
    %85 = arith.addf %84, %83 : vector<4x64xf32>
    %86 = arith.divf %84, %85 : vector<4x64xf32>
    %87 = vector.extract_strided_slice %25 {offsets = [1, 0, 0], sizes = [1, 4, 64], strides = [1, 1, 1]} : vector<8x4x64xf32> to vector<1x4x64xf32>
    %88 = vector.shape_cast %87 : vector<1x4x64xf32> to vector<4x64xf32>
    %89 = arith.mulf %78, %70 : vector<4x64xf32>
    %90 = arith.addf %88, %89 : vector<4x64xf32>
    %91 = math.tanh %90 : vector<4x64xf32>
    %92 = arith.subf %62, %91 : vector<4x64xf32>
    %93 = arith.mulf %86, %92 : vector<4x64xf32>
    %94 = arith.addf %91, %93 : vector<4x64xf32>
    %c1_45 = arith.constant 1 : index
    %c0_46 = arith.constant 0 : index
    %c0_47 = arith.constant 0 : index
    %95 = vector.load %arg12[%c1_45, %c0_46, %c0_47] : memref<8x4x64xf32, #tpu.memory_space<vmem>>, vector<1x4x64xf32>
    %96 = vector.shape_cast %95 : vector<1x4x64xf32> to vector<4x64xf32>
    %97 = vector.shape_cast %94 : vector<4x64xf32> to vector<1x4x64xf32>
    tpu.vector_store %arg12[%c1_45, %c0_46, %c0_47], %97 {strides = array<i32>} : memref<8x4x64xf32, #tpu.memory_space<vmem>>, vector<1x4x64xf32>,
    %cst_48 = arith.constant dense<0.000000e+00> : vector<4x64xf32>
    %98 = tpu.matmul %94, %27, %cst_48 {dimension_numbers = #tpu.dot_dimension_numbers<[1], [0], [0], [1], [0, 0, 1, 1], [], []>} : vector<4x64xf32>, vector<64x64xf32>, vector<4x64xf32> -> vector<4x64xf32>
    %cst_49 = arith.constant dense<0.000000e+00> : vector<4x64xf32>
    %99 = tpu.matmul %94, %29, %cst_49 {dimension_numbers = #tpu.dot_dimension_numbers<[1], [0], [0], [1], [0, 0, 1, 1], [], []>} : vector<4x64xf32>, vector<64x64xf32>, vector<4x64xf32> -> vector<4x64xf32>
    %cst_50 = arith.constant dense<0.000000e+00> : vector<4x64xf32>
    %100 = tpu.matmul %94, %31, %cst_50 {dimension_numbers = #tpu.dot_dimension_numbers<[1], [0], [0], [1], [0, 0, 1, 1], [], []>} : vector<4x64xf32>, vector<64x64xf32>, vector<4x64xf32> -> vector<4x64xf32>
    %101 = vector.broadcast %32 : vector<1x64xf32> to vector<4x64xf32>
    %102 = arith.addf %100, %101 : vector<4x64xf32>
    %103 = vector.extract_strided_slice %9 {offsets = [2, 0, 0], sizes = [1, 4, 64], strides = [1, 1, 1]} : vector<8x4x64xf32> to vector<1x4x64xf32>
    %104 = vector.shape_cast %103 : vector<1x4x64xf32> to vector<4x64xf32>
    %105 = arith.addf %104, %98 : vector<4x64xf32>
    %106 = arith.negf %105 : vector<4x64xf32>
    %107 = math.exp %106 : vector<4x64xf32>
    %cst_51 = arith.constant 1.000000e+00 : f32
    %108 = vector.broadcast %cst_51 : f32 to vector<4x64xf32>
    %109 = arith.addf %108, %107 : vector<4x64xf32>
    %110 = arith.divf %108, %109 : vector<4x64xf32>
    %111 = vector.extract_strided_slice %17 {offsets = [2, 0, 0], sizes = [1, 4, 64], strides = [1, 1, 1]} : vector<8x4x64xf32> to vector<1x4x64xf32>
    %112 = vector.shape_cast %111 : vector<1x4x64xf32> to vector<4x64xf32>
    %113 = arith.addf %112, %99 : vector<4x64xf32>
    %114 = arith.negf %113 : vector<4x64xf32>
    %115 = math.exp %114 : vector<4x64xf32>
    %cst_52 = arith.constant 1.000000e+00 : f32
    %116 = vector.broadcast %cst_52 : f32 to vector<4x64xf32>
    %117 = arith.addf %116, %115 : vector<4x64xf32>
    %118 = arith.divf %116, %117 : vector<4x64xf32>
    %119 = vector.extract_strided_slice %25 {offsets = [2, 0, 0], sizes = [1, 4, 64], strides = [1, 1, 1]} : vector<8x4x64xf32> to vector<1x4x64xf32>
    %120 = vector.shape_cast %119 : vector<1x4x64xf32> to vector<4x64xf32>
    %121 = arith.mulf %110, %102 : vector<4x64xf32>
    %122 = arith.addf %120, %121 : vector<4x64xf32>
    %123 = math.tanh %122 : vector<4x64xf32>
    %124 = arith.subf %94, %123 : vector<4x64xf32>
    %125 = arith.mulf %118, %124 : vector<4x64xf32>
    %126 = arith.addf %123, %125 : vector<4x64xf32>
    %c2_53 = arith.constant 2 : index
    %c0_54 = arith.constant 0 : index
    %c0_55 = arith.constant 0 : index
    %127 = vector.load %arg12[%c2_53, %c0_54, %c0_55] : memref<8x4x64xf32, #tpu.memory_space<vmem>>, vector<1x4x64xf32>
    %128 = vector.shape_cast %127 : vector<1x4x64xf32> to vector<4x64xf32>
    %129 = vector.shape_cast %126 : vector<4x64xf32> to vector<1x4x64xf32>
    tpu.vector_store %arg12[%c2_53, %c0_54, %c0_55], %129 {strides = array<i32>} : memref<8x4x64xf32, #tpu.memory_space<vmem>>, vector<1x4x64xf32>,
    %cst_56 = arith.constant dense<0.000000e+00> : vector<4x64xf32>
    %130 = tpu.matmul %126, %27, %cst_56 {dimension_numbers = #tpu.dot_dimension_numbers<[1], [0], [0], [1], [0, 0, 1, 1], [], []>} : vector<4x64xf32>, vector<64x64xf32>, vector<4x64xf32> -> vector<4x64xf32>
    %cst_57 = arith.constant dense<0.000000e+00> : vector<4x64xf32>
    %131 = tpu.matmul %126, %29, %cst_57 {dimension_numbers = #tpu.dot_dimension_numbers<[1], [0], [0], [1], [0, 0, 1, 1], [], []>} : vector<4x64xf32>, vector<64x64xf32>, vector<4x64xf32> -> vector<4x64xf32>
    %cst_58 = arith.constant dense<0.000000e+00> : vector<4x64xf32>
    %132 = tpu.matmul %126, %31, %cst_58 {dimension_numbers = #tpu.dot_dimension_numbers<[1], [0], [0], [1], [0, 0, 1, 1], [], []>} : vector<4x64xf32>, vector<64x64xf32>, vector<4x64xf32> -> vector<4x64xf32>
    %133 = vector.broadcast %32 : vector<1x64xf32> to vector<4x64xf32>
    %134 = arith.addf %132, %133 : vector<4x64xf32>
    %135 = vector.extract_strided_slice %9 {offsets = [3, 0, 0], sizes = [1, 4, 64], strides = [1, 1, 1]} : vector<8x4x64xf32> to vector<1x4x64xf32>
    %136 = vector.shape_cast %135 : vector<1x4x64xf32> to vector<4x64xf32>
    %137 = arith.addf %136, %130 : vector<4x64xf32>
    %138 = arith.negf %137 : vector<4x64xf32>
    %139 = math.exp %138 : vector<4x64xf32>
    %cst_59 = arith.constant 1.000000e+00 : f32
    %140 = vector.broadcast %cst_59 : f32 to vector<4x64xf32>
    %141 = arith.addf %140, %139 : vector<4x64xf32>
    %142 = arith.divf %140, %141 : vector<4x64xf32>
    %143 = vector.extract_strided_slice %17 {offsets = [3, 0, 0], sizes = [1, 4, 64], strides = [1, 1, 1]} : vector<8x4x64xf32> to vector<1x4x64xf32>
    %144 = vector.shape_cast %143 : vector<1x4x64xf32> to vector<4x64xf32>
    %145 = arith.addf %144, %131 : vector<4x64xf32>
    %146 = arith.negf %145 : vector<4x64xf32>
    %147 = math.exp %146 : vector<4x64xf32>
    %cst_60 = arith.constant 1.000000e+00 : f32
    %148 = vector.broadcast %cst_60 : f32 to vector<4x64xf32>
    %149 = arith.addf %148, %147 : vector<4x64xf32>
    %150 = arith.divf %148, %149 : vector<4x64xf32>
    %151 = vector.extract_strided_slice %25 {offsets = [3, 0, 0], sizes = [1, 4, 64], strides = [1, 1, 1]} : vector<8x4x64xf32> to vector<1x4x64xf32>
    %152 = vector.shape_cast %151 : vector<1x4x64xf32> to vector<4x64xf32>
    %153 = arith.mulf %142, %134 : vector<4x64xf32>
    %154 = arith.addf %152, %153 : vector<4x64xf32>
    %155 = math.tanh %154 : vector<4x64xf32>
    %156 = arith.subf %126, %155 : vector<4x64xf32>
    %157 = arith.mulf %150, %156 : vector<4x64xf32>
    %158 = arith.addf %155, %157 : vector<4x64xf32>
    %c3 = arith.constant 3 : index
    %c0_61 = arith.constant 0 : index
    %c0_62 = arith.constant 0 : index
    %159 = vector.load %arg12[%c3, %c0_61, %c0_62] : memref<8x4x64xf32, #tpu.memory_space<vmem>>, vector<1x4x64xf32>
    %160 = vector.shape_cast %159 : vector<1x4x64xf32> to vector<4x64xf32>
    %161 = vector.shape_cast %158 : vector<4x64xf32> to vector<1x4x64xf32>
    tpu.vector_store %arg12[%c3, %c0_61, %c0_62], %161 {strides = array<i32>} : memref<8x4x64xf32, #tpu.memory_space<vmem>>, vector<1x4x64xf32>,
    %cst_63 = arith.constant dense<0.000000e+00> : vector<4x64xf32>
    %162 = tpu.matmul %158, %27, %cst_63 {dimension_numbers = #tpu.dot_dimension_numbers<[1], [0], [0], [1], [0, 0, 1, 1], [], []>} : vector<4x64xf32>, vector<64x64xf32>, vector<4x64xf32> -> vector<4x64xf32>
    %cst_64 = arith.constant dense<0.000000e+00> : vector<4x64xf32>
    %163 = tpu.matmul %158, %29, %cst_64 {dimension_numbers = #tpu.dot_dimension_numbers<[1], [0], [0], [1], [0, 0, 1, 1], [], []>} : vector<4x64xf32>, vector<64x64xf32>, vector<4x64xf32> -> vector<4x64xf32>
    %cst_65 = arith.constant dense<0.000000e+00> : vector<4x64xf32>
    %164 = tpu.matmul %158, %31, %cst_65 {dimension_numbers = #tpu.dot_dimension_numbers<[1], [0], [0], [1], [0, 0, 1, 1], [], []>} : vector<4x64xf32>, vector<64x64xf32>, vector<4x64xf32> -> vector<4x64xf32>
    %165 = vector.broadcast %32 : vector<1x64xf32> to vector<4x64xf32>
    %166 = arith.addf %164, %165 : vector<4x64xf32>
    %167 = vector.extract_strided_slice %9 {offsets = [4, 0, 0], sizes = [1, 4, 64], strides = [1, 1, 1]} : vector<8x4x64xf32> to vector<1x4x64xf32>
    %168 = vector.shape_cast %167 : vector<1x4x64xf32> to vector<4x64xf32>
    %169 = arith.addf %168, %162 : vector<4x64xf32>
    %170 = arith.negf %169 : vector<4x64xf32>
    %171 = math.exp %170 : vector<4x64xf32>
    %cst_66 = arith.constant 1.000000e+00 : f32
    %172 = vector.broadcast %cst_66 : f32 to vector<4x64xf32>
    %173 = arith.addf %172, %171 : vector<4x64xf32>
    %174 = arith.divf %172, %173 : vector<4x64xf32>
    %175 = vector.extract_strided_slice %17 {offsets = [4, 0, 0], sizes = [1, 4, 64], strides = [1, 1, 1]} : vector<8x4x64xf32> to vector<1x4x64xf32>
    %176 = vector.shape_cast %175 : vector<1x4x64xf32> to vector<4x64xf32>
    %177 = arith.addf %176, %163 : vector<4x64xf32>
    %178 = arith.negf %177 : vector<4x64xf32>
    %179 = math.exp %178 : vector<4x64xf32>
    %cst_67 = arith.constant 1.000000e+00 : f32
    %180 = vector.broadcast %cst_67 : f32 to vector<4x64xf32>
    %181 = arith.addf %180, %179 : vector<4x64xf32>
    %182 = arith.divf %180, %181 : vector<4x64xf32>
    %183 = vector.extract_strided_slice %25 {offsets = [4, 0, 0], sizes = [1, 4, 64], strides = [1, 1, 1]} : vector<8x4x64xf32> to vector<1x4x64xf32>
    %184 = vector.shape_cast %183 : vector<1x4x64xf32> to vector<4x64xf32>
    %185 = arith.mulf %174, %166 : vector<4x64xf32>
    %186 = arith.addf %184, %185 : vector<4x64xf32>
    %187 = math.tanh %186 : vector<4x64xf32>
    %188 = arith.subf %158, %187 : vector<4x64xf32>
    %189 = arith.mulf %182, %188 : vector<4x64xf32>
    %190 = arith.addf %187, %189 : vector<4x64xf32>
    %c4 = arith.constant 4 : index
    %c0_68 = arith.constant 0 : index
    %c0_69 = arith.constant 0 : index
    %191 = vector.load %arg12[%c4, %c0_68, %c0_69] : memref<8x4x64xf32, #tpu.memory_space<vmem>>, vector<1x4x64xf32>
    %192 = vector.shape_cast %191 : vector<1x4x64xf32> to vector<4x64xf32>
    %193 = vector.shape_cast %190 : vector<4x64xf32> to vector<1x4x64xf32>
    tpu.vector_store %arg12[%c4, %c0_68, %c0_69], %193 {strides = array<i32>} : memref<8x4x64xf32, #tpu.memory_space<vmem>>, vector<1x4x64xf32>,
    %cst_70 = arith.constant dense<0.000000e+00> : vector<4x64xf32>
    %194 = tpu.matmul %190, %27, %cst_70 {dimension_numbers = #tpu.dot_dimension_numbers<[1], [0], [0], [1], [0, 0, 1, 1], [], []>} : vector<4x64xf32>, vector<64x64xf32>, vector<4x64xf32> -> vector<4x64xf32>
    %cst_71 = arith.constant dense<0.000000e+00> : vector<4x64xf32>
    %195 = tpu.matmul %190, %29, %cst_71 {dimension_numbers = #tpu.dot_dimension_numbers<[1], [0], [0], [1], [0, 0, 1, 1], [], []>} : vector<4x64xf32>, vector<64x64xf32>, vector<4x64xf32> -> vector<4x64xf32>
    %cst_72 = arith.constant dense<0.000000e+00> : vector<4x64xf32>
    %196 = tpu.matmul %190, %31, %cst_72 {dimension_numbers = #tpu.dot_dimension_numbers<[1], [0], [0], [1], [0, 0, 1, 1], [], []>} : vector<4x64xf32>, vector<64x64xf32>, vector<4x64xf32> -> vector<4x64xf32>
    %197 = vector.broadcast %32 : vector<1x64xf32> to vector<4x64xf32>
    %198 = arith.addf %196, %197 : vector<4x64xf32>
    %199 = vector.extract_strided_slice %9 {offsets = [5, 0, 0], sizes = [1, 4, 64], strides = [1, 1, 1]} : vector<8x4x64xf32> to vector<1x4x64xf32>
    %200 = vector.shape_cast %199 : vector<1x4x64xf32> to vector<4x64xf32>
    %201 = arith.addf %200, %194 : vector<4x64xf32>
    %202 = arith.negf %201 : vector<4x64xf32>
    %203 = math.exp %202 : vector<4x64xf32>
    %cst_73 = arith.constant 1.000000e+00 : f32
    %204 = vector.broadcast %cst_73 : f32 to vector<4x64xf32>
    %205 = arith.addf %204, %203 : vector<4x64xf32>
    %206 = arith.divf %204, %205 : vector<4x64xf32>
    %207 = vector.extract_strided_slice %17 {offsets = [5, 0, 0], sizes = [1, 4, 64], strides = [1, 1, 1]} : vector<8x4x64xf32> to vector<1x4x64xf32>
    %208 = vector.shape_cast %207 : vector<1x4x64xf32> to vector<4x64xf32>
    %209 = arith.addf %208, %195 : vector<4x64xf32>
    %210 = arith.negf %209 : vector<4x64xf32>
    %211 = math.exp %210 : vector<4x64xf32>
    %cst_74 = arith.constant 1.000000e+00 : f32
    %212 = vector.broadcast %cst_74 : f32 to vector<4x64xf32>
    %213 = arith.addf %212, %211 : vector<4x64xf32>
    %214 = arith.divf %212, %213 : vector<4x64xf32>
    %215 = vector.extract_strided_slice %25 {offsets = [5, 0, 0], sizes = [1, 4, 64], strides = [1, 1, 1]} : vector<8x4x64xf32> to vector<1x4x64xf32>
    %216 = vector.shape_cast %215 : vector<1x4x64xf32> to vector<4x64xf32>
    %217 = arith.mulf %206, %198 : vector<4x64xf32>
    %218 = arith.addf %216, %217 : vector<4x64xf32>
    %219 = math.tanh %218 : vector<4x64xf32>
    %220 = arith.subf %190, %219 : vector<4x64xf32>
    %221 = arith.mulf %214, %220 : vector<4x64xf32>
    %222 = arith.addf %219, %221 : vector<4x64xf32>
    %c5 = arith.constant 5 : index
    %c0_75 = arith.constant 0 : index
    %c0_76 = arith.constant 0 : index
    %223 = vector.load %arg12[%c5, %c0_75, %c0_76] : memref<8x4x64xf32, #tpu.memory_space<vmem>>, vector<1x4x64xf32>
    %224 = vector.shape_cast %223 : vector<1x4x64xf32> to vector<4x64xf32>
    %225 = vector.shape_cast %222 : vector<4x64xf32> to vector<1x4x64xf32>
    tpu.vector_store %arg12[%c5, %c0_75, %c0_76], %225 {strides = array<i32>} : memref<8x4x64xf32, #tpu.memory_space<vmem>>, vector<1x4x64xf32>,
    %cst_77 = arith.constant dense<0.000000e+00> : vector<4x64xf32>
    %226 = tpu.matmul %222, %27, %cst_77 {dimension_numbers = #tpu.dot_dimension_numbers<[1], [0], [0], [1], [0, 0, 1, 1], [], []>} : vector<4x64xf32>, vector<64x64xf32>, vector<4x64xf32> -> vector<4x64xf32>
    %cst_78 = arith.constant dense<0.000000e+00> : vector<4x64xf32>
    %227 = tpu.matmul %222, %29, %cst_78 {dimension_numbers = #tpu.dot_dimension_numbers<[1], [0], [0], [1], [0, 0, 1, 1], [], []>} : vector<4x64xf32>, vector<64x64xf32>, vector<4x64xf32> -> vector<4x64xf32>
    %cst_79 = arith.constant dense<0.000000e+00> : vector<4x64xf32>
    %228 = tpu.matmul %222, %31, %cst_79 {dimension_numbers = #tpu.dot_dimension_numbers<[1], [0], [0], [1], [0, 0, 1, 1], [], []>} : vector<4x64xf32>, vector<64x64xf32>, vector<4x64xf32> -> vector<4x64xf32>
    %229 = vector.broadcast %32 : vector<1x64xf32> to vector<4x64xf32>
    %230 = arith.addf %228, %229 : vector<4x64xf32>
    %231 = vector.extract_strided_slice %9 {offsets = [6, 0, 0], sizes = [1, 4, 64], strides = [1, 1, 1]} : vector<8x4x64xf32> to vector<1x4x64xf32>
    %232 = vector.shape_cast %231 : vector<1x4x64xf32> to vector<4x64xf32>
    %233 = arith.addf %232, %226 : vector<4x64xf32>
    %234 = arith.negf %233 : vector<4x64xf32>
    %235 = math.exp %234 : vector<4x64xf32>
    %cst_80 = arith.constant 1.000000e+00 : f32
    %236 = vector.broadcast %cst_80 : f32 to vector<4x64xf32>
    %237 = arith.addf %236, %235 : vector<4x64xf32>
    %238 = arith.divf %236, %237 : vector<4x64xf32>
    %239 = vector.extract_strided_slice %17 {offsets = [6, 0, 0], sizes = [1, 4, 64], strides = [1, 1, 1]} : vector<8x4x64xf32> to vector<1x4x64xf32>
    %240 = vector.shape_cast %239 : vector<1x4x64xf32> to vector<4x64xf32>
    %241 = arith.addf %240, %227 : vector<4x64xf32>
    %242 = arith.negf %241 : vector<4x64xf32>
    %243 = math.exp %242 : vector<4x64xf32>
    %cst_81 = arith.constant 1.000000e+00 : f32
    %244 = vector.broadcast %cst_81 : f32 to vector<4x64xf32>
    %245 = arith.addf %244, %243 : vector<4x64xf32>
    %246 = arith.divf %244, %245 : vector<4x64xf32>
    %247 = vector.extract_strided_slice %25 {offsets = [6, 0, 0], sizes = [1, 4, 64], strides = [1, 1, 1]} : vector<8x4x64xf32> to vector<1x4x64xf32>
    %248 = vector.shape_cast %247 : vector<1x4x64xf32> to vector<4x64xf32>
    %249 = arith.mulf %238, %230 : vector<4x64xf32>
    %250 = arith.addf %248, %249 : vector<4x64xf32>
    %251 = math.tanh %250 : vector<4x64xf32>
    %252 = arith.subf %222, %251 : vector<4x64xf32>
    %253 = arith.mulf %246, %252 : vector<4x64xf32>
    %254 = arith.addf %251, %253 : vector<4x64xf32>
    %c6 = arith.constant 6 : index
    %c0_82 = arith.constant 0 : index
    %c0_83 = arith.constant 0 : index
    %255 = vector.load %arg12[%c6, %c0_82, %c0_83] : memref<8x4x64xf32, #tpu.memory_space<vmem>>, vector<1x4x64xf32>
    %256 = vector.shape_cast %255 : vector<1x4x64xf32> to vector<4x64xf32>
    %257 = vector.shape_cast %254 : vector<4x64xf32> to vector<1x4x64xf32>
    tpu.vector_store %arg12[%c6, %c0_82, %c0_83], %257 {strides = array<i32>} : memref<8x4x64xf32, #tpu.memory_space<vmem>>, vector<1x4x64xf32>,
    %cst_84 = arith.constant dense<0.000000e+00> : vector<4x64xf32>
    %258 = tpu.matmul %254, %27, %cst_84 {dimension_numbers = #tpu.dot_dimension_numbers<[1], [0], [0], [1], [0, 0, 1, 1], [], []>} : vector<4x64xf32>, vector<64x64xf32>, vector<4x64xf32> -> vector<4x64xf32>
    %cst_85 = arith.constant dense<0.000000e+00> : vector<4x64xf32>
    %259 = tpu.matmul %254, %29, %cst_85 {dimension_numbers = #tpu.dot_dimension_numbers<[1], [0], [0], [1], [0, 0, 1, 1], [], []>} : vector<4x64xf32>, vector<64x64xf32>, vector<4x64xf32> -> vector<4x64xf32>
    %cst_86 = arith.constant dense<0.000000e+00> : vector<4x64xf32>
    %260 = tpu.matmul %254, %31, %cst_86 {dimension_numbers = #tpu.dot_dimension_numbers<[1], [0], [0], [1], [0, 0, 1, 1], [], []>} : vector<4x64xf32>, vector<64x64xf32>, vector<4x64xf32> -> vector<4x64xf32>
    %261 = vector.broadcast %32 : vector<1x64xf32> to vector<4x64xf32>
    %262 = arith.addf %260, %261 : vector<4x64xf32>
    %263 = vector.extract_strided_slice %9 {offsets = [7, 0, 0], sizes = [1, 4, 64], strides = [1, 1, 1]} : vector<8x4x64xf32> to vector<1x4x64xf32>
    %264 = vector.shape_cast %263 : vector<1x4x64xf32> to vector<4x64xf32>
    %265 = arith.addf %264, %258 : vector<4x64xf32>
    %266 = arith.negf %265 : vector<4x64xf32>
    %267 = math.exp %266 : vector<4x64xf32>
    %cst_87 = arith.constant 1.000000e+00 : f32
    %268 = vector.broadcast %cst_87 : f32 to vector<4x64xf32>
    %269 = arith.addf %268, %267 : vector<4x64xf32>
    %270 = arith.divf %268, %269 : vector<4x64xf32>
    %271 = vector.extract_strided_slice %17 {offsets = [7, 0, 0], sizes = [1, 4, 64], strides = [1, 1, 1]} : vector<8x4x64xf32> to vector<1x4x64xf32>
    %272 = vector.shape_cast %271 : vector<1x4x64xf32> to vector<4x64xf32>
    %273 = arith.addf %272, %259 : vector<4x64xf32>
    %274 = arith.negf %273 : vector<4x64xf32>
    %275 = math.exp %274 : vector<4x64xf32>
    %cst_88 = arith.constant 1.000000e+00 : f32
    %276 = vector.broadcast %cst_88 : f32 to vector<4x64xf32>
    %277 = arith.addf %276, %275 : vector<4x64xf32>
    %278 = arith.divf %276, %277 : vector<4x64xf32>
    %279 = vector.extract_strided_slice %25 {offsets = [7, 0, 0], sizes = [1, 4, 64], strides = [1, 1, 1]} : vector<8x4x64xf32> to vector<1x4x64xf32>
    %280 = vector.shape_cast %279 : vector<1x4x64xf32> to vector<4x64xf32>
    %281 = arith.mulf %270, %262 : vector<4x64xf32>
    %282 = arith.addf %280, %281 : vector<4x64xf32>
    %283 = math.tanh %282 : vector<4x64xf32>
    %284 = arith.subf %254, %283 : vector<4x64xf32>
    %285 = arith.mulf %278, %284 : vector<4x64xf32>
    %286 = arith.addf %283, %285 : vector<4x64xf32>
    %c7 = arith.constant 7 : index
    %c0_89 = arith.constant 0 : index
    %c0_90 = arith.constant 0 : index
    %287 = vector.load %arg12[%c7, %c0_89, %c0_90] : memref<8x4x64xf32, #tpu.memory_space<vmem>>, vector<1x4x64xf32>
    %288 = vector.shape_cast %287 : vector<1x4x64xf32> to vector<4x64xf32>
    %289 = vector.shape_cast %286 : vector<4x64xf32> to vector<1x4x64xf32>
    tpu.vector_store %arg12[%c7, %c0_89, %c0_90], %289 {strides = array<i32>} : memref<8x4x64xf32, #tpu.memory_space<vmem>>, vector<1x4x64xf32>,
    %c0_91 = arith.constant 0 : index
    %c0_92 = arith.constant 0 : index
    %c0_93 = arith.constant 0 : index
    %290 = vector.load %arg12[%c0_91, %c0_92, %c0_93] : memref<8x4x64xf32, #tpu.memory_space<vmem>>, vector<8x4x64xf32>
    %291 = vector.shape_cast %290 : vector<8x4x64xf32> to vector<32x64xf32>
    %c0_94 = arith.constant 0 : index
    %c0_95 = arith.constant 0 : index
    %c0_96 = arith.constant 0 : index
    %292 = vector.load %arg5[%c0_94, %c0_95, %c0_96] : memref<3x64x64xf32, #tpu.memory_space<vmem>>, vector<1x64x64xf32>
    %293 = vector.shape_cast %292 : vector<1x64x64xf32> to vector<64x64xf32>
    %cst_97 = arith.constant dense<0.000000e+00> : vector<32x64xf32>
    %294 = tpu.matmul %291, %293, %cst_97 {dimension_numbers = #tpu.dot_dimension_numbers<[1], [0], [0], [1], [0, 0, 1, 1], [], []>} : vector<32x64xf32>, vector<64x64xf32>, vector<32x64xf32> -> vector<32x64xf32>
    %c0_98 = arith.constant 0 : index
    %c0_99 = arith.constant 0 : index
    %c0_100 = arith.constant 0 : index
    %295 = vector.load %arg7[%c0_98, %c0_99, %c0_100] : memref<3x1x64xf32, #tpu.memory_space<vmem>>, vector<1x1x64xf32>
    %296 = vector.shape_cast %295 : vector<1x1x64xf32> to vector<1x64xf32>
    %297 = vector.broadcast %296 : vector<1x64xf32> to vector<32x64xf32>
    %298 = arith.addf %294, %297 : vector<32x64xf32>
    %299 = vector.shape_cast %298 : vector<32x64xf32> to vector<8x4x64xf32>
    %c1_101 = arith.constant 1 : index
    %c0_102 = arith.constant 0 : index
    %c0_103 = arith.constant 0 : index
    %300 = vector.load %arg5[%c1_101, %c0_102, %c0_103] : memref<3x64x64xf32, #tpu.memory_space<vmem>>, vector<1x64x64xf32>
    %301 = vector.shape_cast %300 : vector<1x64x64xf32> to vector<64x64xf32>
    %cst_104 = arith.constant dense<0.000000e+00> : vector<32x64xf32>
    %302 = tpu.matmul %291, %301, %cst_104 {dimension_numbers = #tpu.dot_dimension_numbers<[1], [0], [0], [1], [0, 0, 1, 1], [], []>} : vector<32x64xf32>, vector<64x64xf32>, vector<32x64xf32> -> vector<32x64xf32>
    %c1_105 = arith.constant 1 : index
    %c0_106 = arith.constant 0 : index
    %c0_107 = arith.constant 0 : index
    %303 = vector.load %arg7[%c1_105, %c0_106, %c0_107] : memref<3x1x64xf32, #tpu.memory_space<vmem>>, vector<1x1x64xf32>
    %304 = vector.shape_cast %303 : vector<1x1x64xf32> to vector<1x64xf32>
    %305 = vector.broadcast %304 : vector<1x64xf32> to vector<32x64xf32>
    %306 = arith.addf %302, %305 : vector<32x64xf32>
    %307 = vector.shape_cast %306 : vector<32x64xf32> to vector<8x4x64xf32>
    %c2_108 = arith.constant 2 : index
    %c0_109 = arith.constant 0 : index
    %c0_110 = arith.constant 0 : index
    %308 = vector.load %arg5[%c2_108, %c0_109, %c0_110] : memref<3x64x64xf32, #tpu.memory_space<vmem>>, vector<1x64x64xf32>
    %309 = vector.shape_cast %308 : vector<1x64x64xf32> to vector<64x64xf32>
    %cst_111 = arith.constant dense<0.000000e+00> : vector<32x64xf32>
    %310 = tpu.matmul %291, %309, %cst_111 {dimension_numbers = #tpu.dot_dimension_numbers<[1], [0], [0], [1], [0, 0, 1, 1], [], []>} : vector<32x64xf32>, vector<64x64xf32>, vector<32x64xf32> -> vector<32x64xf32>
    %c2_112 = arith.constant 2 : index
    %c0_113 = arith.constant 0 : index
    %c0_114 = arith.constant 0 : index
    %311 = vector.load %arg7[%c2_112, %c0_113, %c0_114] : memref<3x1x64xf32, #tpu.memory_space<vmem>>, vector<1x1x64xf32>
    %312 = vector.shape_cast %311 : vector<1x1x64xf32> to vector<1x64xf32>
    %313 = vector.broadcast %312 : vector<1x64xf32> to vector<32x64xf32>
    %314 = arith.addf %310, %313 : vector<32x64xf32>
    %315 = vector.shape_cast %314 : vector<32x64xf32> to vector<8x4x64xf32>
    %c0_115 = arith.constant 0 : index
    %c0_116 = arith.constant 0 : index
    %c0_117 = arith.constant 0 : index
    %316 = vector.load %arg6[%c0_115, %c0_116, %c0_117] : memref<3x64x64xf32, #tpu.memory_space<vmem>>, vector<1x64x64xf32>
    %317 = vector.shape_cast %316 : vector<1x64x64xf32> to vector<64x64xf32>
    %c1_118 = arith.constant 1 : index
    %c0_119 = arith.constant 0 : index
    %c0_120 = arith.constant 0 : index
    %318 = vector.load %arg6[%c1_118, %c0_119, %c0_120] : memref<3x64x64xf32, #tpu.memory_space<vmem>>, vector<1x64x64xf32>
    %319 = vector.shape_cast %318 : vector<1x64x64xf32> to vector<64x64xf32>
    %c2_121 = arith.constant 2 : index
    %c0_122 = arith.constant 0 : index
    %c0_123 = arith.constant 0 : index
    %320 = vector.load %arg6[%c2_121, %c0_122, %c0_123] : memref<3x64x64xf32, #tpu.memory_space<vmem>>, vector<1x64x64xf32>
    %321 = vector.shape_cast %320 : vector<1x64x64xf32> to vector<64x64xf32>
    %c0_124 = arith.constant 0 : index
    %c0_125 = arith.constant 0 : index
    %322 = vector.load %arg8[%c0_124, %c0_125] : memref<1x64xf32, #tpu.memory_space<vmem>>, vector<1x64xf32>
    %cst_126 = arith.constant 0.000000e+00 : f32
    %323 = vector.broadcast %cst_126 : f32 to vector<4x64xf32>
    %cst_127 = arith.constant dense<0.000000e+00> : vector<4x64xf32>
    %324 = tpu.matmul %323, %317, %cst_127 {dimension_numbers = #tpu.dot_dimension_numbers<[1], [0], [0], [1], [0, 0, 1, 1], [], []>} : vector<4x64xf32>, vector<64x64xf32>, vector<4x64xf32> -> vector<4x64xf32>
    %cst_128 = arith.constant dense<0.000000e+00> : vector<4x64xf32>
    %325 = tpu.matmul %323, %319, %cst_128 {dimension_numbers = #tpu.dot_dimension_numbers<[1], [0], [0], [1], [0, 0, 1, 1], [], []>} : vector<4x64xf32>, vector<64x64xf32>, vector<4x64xf32> -> vector<4x64xf32>
    %cst_129 = arith.constant dense<0.000000e+00> : vector<4x64xf32>
    %326 = tpu.matmul %323, %321, %cst_129 {dimension_numbers = #tpu.dot_dimension_numbers<[1], [0], [0], [1], [0, 0, 1, 1], [], []>} : vector<4x64xf32>, vector<64x64xf32>, vector<4x64xf32> -> vector<4x64xf32>
    %327 = vector.broadcast %322 : vector<1x64xf32> to vector<4x64xf32>
    %328 = arith.addf %326, %327 : vector<4x64xf32>
    %329 = vector.extract_strided_slice %299 {offsets = [0, 0, 0], sizes = [1, 4, 64], strides = [1, 1, 1]} : vector<8x4x64xf32> to vector<1x4x64xf32>
    %330 = vector.shape_cast %329 : vector<1x4x64xf32> to vector<4x64xf32>
    %331 = arith.addf %330, %324 : vector<4x64xf32>
    %332 = arith.negf %331 : vector<4x64xf32>
    %333 = math.exp %332 : vector<4x64xf32>
    %cst_130 = arith.constant 1.000000e+00 : f32
    %334 = vector.broadcast %cst_130 : f32 to vector<4x64xf32>
    %335 = arith.addf %334, %333 : vector<4x64xf32>
    %336 = arith.divf %334, %335 : vector<4x64xf32>
    %337 = vector.extract_strided_slice %307 {offsets = [0, 0, 0], sizes = [1, 4, 64], strides = [1, 1, 1]} : vector<8x4x64xf32> to vector<1x4x64xf32>
    %338 = vector.shape_cast %337 : vector<1x4x64xf32> to vector<4x64xf32>
    %339 = arith.addf %338, %325 : vector<4x64xf32>
    %340 = arith.negf %339 : vector<4x64xf32>
    %341 = math.exp %340 : vector<4x64xf32>
    %cst_131 = arith.constant 1.000000e+00 : f32
    %342 = vector.broadcast %cst_131 : f32 to vector<4x64xf32>
    %343 = arith.addf %342, %341 : vector<4x64xf32>
    %344 = arith.divf %342, %343 : vector<4x64xf32>
    %345 = vector.extract_strided_slice %315 {offsets = [0, 0, 0], sizes = [1, 4, 64], strides = [1, 1, 1]} : vector<8x4x64xf32> to vector<1x4x64xf32>
    %346 = vector.shape_cast %345 : vector<1x4x64xf32> to vector<4x64xf32>
    %347 = arith.mulf %336, %328 : vector<4x64xf32>
    %348 = arith.addf %346, %347 : vector<4x64xf32>
    %349 = math.tanh %348 : vector<4x64xf32>
    %350 = arith.subf %323, %349 : vector<4x64xf32>
    %351 = arith.mulf %344, %350 : vector<4x64xf32>
    %352 = arith.addf %349, %351 : vector<4x64xf32>
    %cst_132 = arith.constant dense<0.000000e+00> : vector<4x64xf32>
    %353 = tpu.matmul %352, %317, %cst_132 {dimension_numbers = #tpu.dot_dimension_numbers<[1], [0], [0], [1], [0, 0, 1, 1], [], []>} : vector<4x64xf32>, vector<64x64xf32>, vector<4x64xf32> -> vector<4x64xf32>
    %cst_133 = arith.constant dense<0.000000e+00> : vector<4x64xf32>
    %354 = tpu.matmul %352, %319, %cst_133 {dimension_numbers = #tpu.dot_dimension_numbers<[1], [0], [0], [1], [0, 0, 1, 1], [], []>} : vector<4x64xf32>, vector<64x64xf32>, vector<4x64xf32> -> vector<4x64xf32>
    %cst_134 = arith.constant dense<0.000000e+00> : vector<4x64xf32>
    %355 = tpu.matmul %352, %321, %cst_134 {dimension_numbers = #tpu.dot_dimension_numbers<[1], [0], [0], [1], [0, 0, 1, 1], [], []>} : vector<4x64xf32>, vector<64x64xf32>, vector<4x64xf32> -> vector<4x64xf32>
    %356 = vector.broadcast %322 : vector<1x64xf32> to vector<4x64xf32>
    %357 = arith.addf %355, %356 : vector<4x64xf32>
    %358 = vector.extract_strided_slice %299 {offsets = [1, 0, 0], sizes = [1, 4, 64], strides = [1, 1, 1]} : vector<8x4x64xf32> to vector<1x4x64xf32>
    %359 = vector.shape_cast %358 : vector<1x4x64xf32> to vector<4x64xf32>
    %360 = arith.addf %359, %353 : vector<4x64xf32>
    %361 = arith.negf %360 : vector<4x64xf32>
    %362 = math.exp %361 : vector<4x64xf32>
    %cst_135 = arith.constant 1.000000e+00 : f32
    %363 = vector.broadcast %cst_135 : f32 to vector<4x64xf32>
    %364 = arith.addf %363, %362 : vector<4x64xf32>
    %365 = arith.divf %363, %364 : vector<4x64xf32>
    %366 = vector.extract_strided_slice %307 {offsets = [1, 0, 0], sizes = [1, 4, 64], strides = [1, 1, 1]} : vector<8x4x64xf32> to vector<1x4x64xf32>
    %367 = vector.shape_cast %366 : vector<1x4x64xf32> to vector<4x64xf32>
    %368 = arith.addf %367, %354 : vector<4x64xf32>
    %369 = arith.negf %368 : vector<4x64xf32>
    %370 = math.exp %369 : vector<4x64xf32>
    %cst_136 = arith.constant 1.000000e+00 : f32
    %371 = vector.broadcast %cst_136 : f32 to vector<4x64xf32>
    %372 = arith.addf %371, %370 : vector<4x64xf32>
    %373 = arith.divf %371, %372 : vector<4x64xf32>
    %374 = vector.extract_strided_slice %315 {offsets = [1, 0, 0], sizes = [1, 4, 64], strides = [1, 1, 1]} : vector<8x4x64xf32> to vector<1x4x64xf32>
    %375 = vector.shape_cast %374 : vector<1x4x64xf32> to vector<4x64xf32>
    %376 = arith.mulf %365, %357 : vector<4x64xf32>
    %377 = arith.addf %375, %376 : vector<4x64xf32>
    %378 = math.tanh %377 : vector<4x64xf32>
    %379 = arith.subf %352, %378 : vector<4x64xf32>
    %380 = arith.mulf %373, %379 : vector<4x64xf32>
    %381 = arith.addf %378, %380 : vector<4x64xf32>
    %cst_137 = arith.constant dense<0.000000e+00> : vector<4x64xf32>
    %382 = tpu.matmul %381, %317, %cst_137 {dimension_numbers = #tpu.dot_dimension_numbers<[1], [0], [0], [1], [0, 0, 1, 1], [], []>} : vector<4x64xf32>, vector<64x64xf32>, vector<4x64xf32> -> vector<4x64xf32>
    %cst_138 = arith.constant dense<0.000000e+00> : vector<4x64xf32>
    %383 = tpu.matmul %381, %319, %cst_138 {dimension_numbers = #tpu.dot_dimension_numbers<[1], [0], [0], [1], [0, 0, 1, 1], [], []>} : vector<4x64xf32>, vector<64x64xf32>, vector<4x64xf32> -> vector<4x64xf32>
    %cst_139 = arith.constant dense<0.000000e+00> : vector<4x64xf32>
    %384 = tpu.matmul %381, %321, %cst_139 {dimension_numbers = #tpu.dot_dimension_numbers<[1], [0], [0], [1], [0, 0, 1, 1], [], []>} : vector<4x64xf32>, vector<64x64xf32>, vector<4x64xf32> -> vector<4x64xf32>
    %385 = vector.broadcast %322 : vector<1x64xf32> to vector<4x64xf32>
    %386 = arith.addf %384, %385 : vector<4x64xf32>
    %387 = vector.extract_strided_slice %299 {offsets = [2, 0, 0], sizes = [1, 4, 64], strides = [1, 1, 1]} : vector<8x4x64xf32> to vector<1x4x64xf32>
    %388 = vector.shape_cast %387 : vector<1x4x64xf32> to vector<4x64xf32>
    %389 = arith.addf %388, %382 : vector<4x64xf32>
    %390 = arith.negf %389 : vector<4x64xf32>
    %391 = math.exp %390 : vector<4x64xf32>
    %cst_140 = arith.constant 1.000000e+00 : f32
    %392 = vector.broadcast %cst_140 : f32 to vector<4x64xf32>
    %393 = arith.addf %392, %391 : vector<4x64xf32>
    %394 = arith.divf %392, %393 : vector<4x64xf32>
    %395 = vector.extract_strided_slice %307 {offsets = [2, 0, 0], sizes = [1, 4, 64], strides = [1, 1, 1]} : vector<8x4x64xf32> to vector<1x4x64xf32>
    %396 = vector.shape_cast %395 : vector<1x4x64xf32> to vector<4x64xf32>
    %397 = arith.addf %396, %383 : vector<4x64xf32>
    %398 = arith.negf %397 : vector<4x64xf32>
    %399 = math.exp %398 : vector<4x64xf32>
    %cst_141 = arith.constant 1.000000e+00 : f32
    %400 = vector.broadcast %cst_141 : f32 to vector<4x64xf32>
    %401 = arith.addf %400, %399 : vector<4x64xf32>
    %402 = arith.divf %400, %401 : vector<4x64xf32>
    %403 = vector.extract_strided_slice %315 {offsets = [2, 0, 0], sizes = [1, 4, 64], strides = [1, 1, 1]} : vector<8x4x64xf32> to vector<1x4x64xf32>
    %404 = vector.shape_cast %403 : vector<1x4x64xf32> to vector<4x64xf32>
    %405 = arith.mulf %394, %386 : vector<4x64xf32>
    %406 = arith.addf %404, %405 : vector<4x64xf32>
    %407 = math.tanh %406 : vector<4x64xf32>
    %408 = arith.subf %381, %407 : vector<4x64xf32>
    %409 = arith.mulf %402, %408 : vector<4x64xf32>
    %410 = arith.addf %407, %409 : vector<4x64xf32>
    %cst_142 = arith.constant dense<0.000000e+00> : vector<4x64xf32>
    %411 = tpu.matmul %410, %317, %cst_142 {dimension_numbers = #tpu.dot_dimension_numbers<[1], [0], [0], [1], [0, 0, 1, 1], [], []>} : vector<4x64xf32>, vector<64x64xf32>, vector<4x64xf32> -> vector<4x64xf32>
    %cst_143 = arith.constant dense<0.000000e+00> : vector<4x64xf32>
    %412 = tpu.matmul %410, %319, %cst_143 {dimension_numbers = #tpu.dot_dimension_numbers<[1], [0], [0], [1], [0, 0, 1, 1], [], []>} : vector<4x64xf32>, vector<64x64xf32>, vector<4x64xf32> -> vector<4x64xf32>
    %cst_144 = arith.constant dense<0.000000e+00> : vector<4x64xf32>
    %413 = tpu.matmul %410, %321, %cst_144 {dimension_numbers = #tpu.dot_dimension_numbers<[1], [0], [0], [1], [0, 0, 1, 1], [], []>} : vector<4x64xf32>, vector<64x64xf32>, vector<4x64xf32> -> vector<4x64xf32>
    %414 = vector.broadcast %322 : vector<1x64xf32> to vector<4x64xf32>
    %415 = arith.addf %413, %414 : vector<4x64xf32>
    %416 = vector.extract_strided_slice %299 {offsets = [3, 0, 0], sizes = [1, 4, 64], strides = [1, 1, 1]} : vector<8x4x64xf32> to vector<1x4x64xf32>
    %417 = vector.shape_cast %416 : vector<1x4x64xf32> to vector<4x64xf32>
    %418 = arith.addf %417, %411 : vector<4x64xf32>
    %419 = arith.negf %418 : vector<4x64xf32>
    %420 = math.exp %419 : vector<4x64xf32>
    %cst_145 = arith.constant 1.000000e+00 : f32
    %421 = vector.broadcast %cst_145 : f32 to vector<4x64xf32>
    %422 = arith.addf %421, %420 : vector<4x64xf32>
    %423 = arith.divf %421, %422 : vector<4x64xf32>
    %424 = vector.extract_strided_slice %307 {offsets = [3, 0, 0], sizes = [1, 4, 64], strides = [1, 1, 1]} : vector<8x4x64xf32> to vector<1x4x64xf32>
    %425 = vector.shape_cast %424 : vector<1x4x64xf32> to vector<4x64xf32>
    %426 = arith.addf %425, %412 : vector<4x64xf32>
    %427 = arith.negf %426 : vector<4x64xf32>
    %428 = math.exp %427 : vector<4x64xf32>
    %cst_146 = arith.constant 1.000000e+00 : f32
    %429 = vector.broadcast %cst_146 : f32 to vector<4x64xf32>
    %430 = arith.addf %429, %428 : vector<4x64xf32>
    %431 = arith.divf %429, %430 : vector<4x64xf32>
    %432 = vector.extract_strided_slice %315 {offsets = [3, 0, 0], sizes = [1, 4, 64], strides = [1, 1, 1]} : vector<8x4x64xf32> to vector<1x4x64xf32>
    %433 = vector.shape_cast %432 : vector<1x4x64xf32> to vector<4x64xf32>
    %434 = arith.mulf %423, %415 : vector<4x64xf32>
    %435 = arith.addf %433, %434 : vector<4x64xf32>
    %436 = math.tanh %435 : vector<4x64xf32>
    %437 = arith.subf %410, %436 : vector<4x64xf32>
    %438 = arith.mulf %431, %437 : vector<4x64xf32>
    %439 = arith.addf %436, %438 : vector<4x64xf32>
    %cst_147 = arith.constant dense<0.000000e+00> : vector<4x64xf32>
    %440 = tpu.matmul %439, %317, %cst_147 {dimension_numbers = #tpu.dot_dimension_numbers<[1], [0], [0], [1], [0, 0, 1, 1], [], []>} : vector<4x64xf32>, vector<64x64xf32>, vector<4x64xf32> -> vector<4x64xf32>
    %cst_148 = arith.constant dense<0.000000e+00> : vector<4x64xf32>
    %441 = tpu.matmul %439, %319, %cst_148 {dimension_numbers = #tpu.dot_dimension_numbers<[1], [0], [0], [1], [0, 0, 1, 1], [], []>} : vector<4x64xf32>, vector<64x64xf32>, vector<4x64xf32> -> vector<4x64xf32>
    %cst_149 = arith.constant dense<0.000000e+00> : vector<4x64xf32>
    %442 = tpu.matmul %439, %321, %cst_149 {dimension_numbers = #tpu.dot_dimension_numbers<[1], [0], [0], [1], [0, 0, 1, 1], [], []>} : vector<4x64xf32>, vector<64x64xf32>, vector<4x64xf32> -> vector<4x64xf32>
    %443 = vector.broadcast %322 : vector<1x64xf32> to vector<4x64xf32>
    %444 = arith.addf %442, %443 : vector<4x64xf32>
    %445 = vector.extract_strided_slice %299 {offsets = [4, 0, 0], sizes = [1, 4, 64], strides = [1, 1, 1]} : vector<8x4x64xf32> to vector<1x4x64xf32>
    %446 = vector.shape_cast %445 : vector<1x4x64xf32> to vector<4x64xf32>
    %447 = arith.addf %446, %440 : vector<4x64xf32>
    %448 = arith.negf %447 : vector<4x64xf32>
    %449 = math.exp %448 : vector<4x64xf32>
    %cst_150 = arith.constant 1.000000e+00 : f32
    %450 = vector.broadcast %cst_150 : f32 to vector<4x64xf32>
    %451 = arith.addf %450, %449 : vector<4x64xf32>
    %452 = arith.divf %450, %451 : vector<4x64xf32>
    %453 = vector.extract_strided_slice %307 {offsets = [4, 0, 0], sizes = [1, 4, 64], strides = [1, 1, 1]} : vector<8x4x64xf32> to vector<1x4x64xf32>
    %454 = vector.shape_cast %453 : vector<1x4x64xf32> to vector<4x64xf32>
    %455 = arith.addf %454, %441 : vector<4x64xf32>
    %456 = arith.negf %455 : vector<4x64xf32>
    %457 = math.exp %456 : vector<4x64xf32>
    %cst_151 = arith.constant 1.000000e+00 : f32
    %458 = vector.broadcast %cst_151 : f32 to vector<4x64xf32>
    %459 = arith.addf %458, %457 : vector<4x64xf32>
    %460 = arith.divf %458, %459 : vector<4x64xf32>
    %461 = vector.extract_strided_slice %315 {offsets = [4, 0, 0], sizes = [1, 4, 64], strides = [1, 1, 1]} : vector<8x4x64xf32> to vector<1x4x64xf32>
    %462 = vector.shape_cast %461 : vector<1x4x64xf32> to vector<4x64xf32>
    %463 = arith.mulf %452, %444 : vector<4x64xf32>
    %464 = arith.addf %462, %463 : vector<4x64xf32>
    %465 = math.tanh %464 : vector<4x64xf32>
    %466 = arith.subf %439, %465 : vector<4x64xf32>
    %467 = arith.mulf %460, %466 : vector<4x64xf32>
    %468 = arith.addf %465, %467 : vector<4x64xf32>
    %cst_152 = arith.constant dense<0.000000e+00> : vector<4x64xf32>
    %469 = tpu.matmul %468, %317, %cst_152 {dimension_numbers = #tpu.dot_dimension_numbers<[1], [0], [0], [1], [0, 0, 1, 1], [], []>} : vector<4x64xf32>, vector<64x64xf32>, vector<4x64xf32> -> vector<4x64xf32>
    %cst_153 = arith.constant dense<0.000000e+00> : vector<4x64xf32>
    %470 = tpu.matmul %468, %319, %cst_153 {dimension_numbers = #tpu.dot_dimension_numbers<[1], [0], [0], [1], [0, 0, 1, 1], [], []>} : vector<4x64xf32>, vector<64x64xf32>, vector<4x64xf32> -> vector<4x64xf32>
    %cst_154 = arith.constant dense<0.000000e+00> : vector<4x64xf32>
    %471 = tpu.matmul %468, %321, %cst_154 {dimension_numbers = #tpu.dot_dimension_numbers<[1], [0], [0], [1], [0, 0, 1, 1], [], []>} : vector<4x64xf32>, vector<64x64xf32>, vector<4x64xf32> -> vector<4x64xf32>
    %472 = vector.broadcast %322 : vector<1x64xf32> to vector<4x64xf32>
    %473 = arith.addf %471, %472 : vector<4x64xf32>
    %474 = vector.extract_strided_slice %299 {offsets = [5, 0, 0], sizes = [1, 4, 64], strides = [1, 1, 1]} : vector<8x4x64xf32> to vector<1x4x64xf32>
    %475 = vector.shape_cast %474 : vector<1x4x64xf32> to vector<4x64xf32>
    %476 = arith.addf %475, %469 : vector<4x64xf32>
    %477 = arith.negf %476 : vector<4x64xf32>
    %478 = math.exp %477 : vector<4x64xf32>
    %cst_155 = arith.constant 1.000000e+00 : f32
    %479 = vector.broadcast %cst_155 : f32 to vector<4x64xf32>
    %480 = arith.addf %479, %478 : vector<4x64xf32>
    %481 = arith.divf %479, %480 : vector<4x64xf32>
    %482 = vector.extract_strided_slice %307 {offsets = [5, 0, 0], sizes = [1, 4, 64], strides = [1, 1, 1]} : vector<8x4x64xf32> to vector<1x4x64xf32>
    %483 = vector.shape_cast %482 : vector<1x4x64xf32> to vector<4x64xf32>
    %484 = arith.addf %483, %470 : vector<4x64xf32>
    %485 = arith.negf %484 : vector<4x64xf32>
    %486 = math.exp %485 : vector<4x64xf32>
    %cst_156 = arith.constant 1.000000e+00 : f32
    %487 = vector.broadcast %cst_156 : f32 to vector<4x64xf32>
    %488 = arith.addf %487, %486 : vector<4x64xf32>
    %489 = arith.divf %487, %488 : vector<4x64xf32>
    %490 = vector.extract_strided_slice %315 {offsets = [5, 0, 0], sizes = [1, 4, 64], strides = [1, 1, 1]} : vector<8x4x64xf32> to vector<1x4x64xf32>
    %491 = vector.shape_cast %490 : vector<1x4x64xf32> to vector<4x64xf32>
    %492 = arith.mulf %481, %473 : vector<4x64xf32>
    %493 = arith.addf %491, %492 : vector<4x64xf32>
    %494 = math.tanh %493 : vector<4x64xf32>
    %495 = arith.subf %468, %494 : vector<4x64xf32>
    %496 = arith.mulf %489, %495 : vector<4x64xf32>
    %497 = arith.addf %494, %496 : vector<4x64xf32>
    %cst_157 = arith.constant dense<0.000000e+00> : vector<4x64xf32>
    %498 = tpu.matmul %497, %317, %cst_157 {dimension_numbers = #tpu.dot_dimension_numbers<[1], [0], [0], [1], [0, 0, 1, 1], [], []>} : vector<4x64xf32>, vector<64x64xf32>, vector<4x64xf32> -> vector<4x64xf32>
    %cst_158 = arith.constant dense<0.000000e+00> : vector<4x64xf32>
    %499 = tpu.matmul %497, %319, %cst_158 {dimension_numbers = #tpu.dot_dimension_numbers<[1], [0], [0], [1], [0, 0, 1, 1], [], []>} : vector<4x64xf32>, vector<64x64xf32>, vector<4x64xf32> -> vector<4x64xf32>
    %cst_159 = arith.constant dense<0.000000e+00> : vector<4x64xf32>
    %500 = tpu.matmul %497, %321, %cst_159 {dimension_numbers = #tpu.dot_dimension_numbers<[1], [0], [0], [1], [0, 0, 1, 1], [], []>} : vector<4x64xf32>, vector<64x64xf32>, vector<4x64xf32> -> vector<4x64xf32>
    %501 = vector.broadcast %322 : vector<1x64xf32> to vector<4x64xf32>
    %502 = arith.addf %500, %501 : vector<4x64xf32>
    %503 = vector.extract_strided_slice %299 {offsets = [6, 0, 0], sizes = [1, 4, 64], strides = [1, 1, 1]} : vector<8x4x64xf32> to vector<1x4x64xf32>
    %504 = vector.shape_cast %503 : vector<1x4x64xf32> to vector<4x64xf32>
    %505 = arith.addf %504, %498 : vector<4x64xf32>
    %506 = arith.negf %505 : vector<4x64xf32>
    %507 = math.exp %506 : vector<4x64xf32>
    %cst_160 = arith.constant 1.000000e+00 : f32
    %508 = vector.broadcast %cst_160 : f32 to vector<4x64xf32>
    %509 = arith.addf %508, %507 : vector<4x64xf32>
    %510 = arith.divf %508, %509 : vector<4x64xf32>
    %511 = vector.extract_strided_slice %307 {offsets = [6, 0, 0], sizes = [1, 4, 64], strides = [1, 1, 1]} : vector<8x4x64xf32> to vector<1x4x64xf32>
    %512 = vector.shape_cast %511 : vector<1x4x64xf32> to vector<4x64xf32>
    %513 = arith.addf %512, %499 : vector<4x64xf32>
    %514 = arith.negf %513 : vector<4x64xf32>
    %515 = math.exp %514 : vector<4x64xf32>
    %cst_161 = arith.constant 1.000000e+00 : f32
    %516 = vector.broadcast %cst_161 : f32 to vector<4x64xf32>
    %517 = arith.addf %516, %515 : vector<4x64xf32>
    %518 = arith.divf %516, %517 : vector<4x64xf32>
    %519 = vector.extract_strided_slice %315 {offsets = [6, 0, 0], sizes = [1, 4, 64], strides = [1, 1, 1]} : vector<8x4x64xf32> to vector<1x4x64xf32>
    %520 = vector.shape_cast %519 : vector<1x4x64xf32> to vector<4x64xf32>
    %521 = arith.mulf %510, %502 : vector<4x64xf32>
    %522 = arith.addf %520, %521 : vector<4x64xf32>
    %523 = math.tanh %522 : vector<4x64xf32>
    %524 = arith.subf %497, %523 : vector<4x64xf32>
    %525 = arith.mulf %518, %524 : vector<4x64xf32>
    %526 = arith.addf %523, %525 : vector<4x64xf32>
    %cst_162 = arith.constant dense<0.000000e+00> : vector<4x64xf32>
    %527 = tpu.matmul %526, %317, %cst_162 {dimension_numbers = #tpu.dot_dimension_numbers<[1], [0], [0], [1], [0, 0, 1, 1], [], []>} : vector<4x64xf32>, vector<64x64xf32>, vector<4x64xf32> -> vector<4x64xf32>
    %cst_163 = arith.constant dense<0.000000e+00> : vector<4x64xf32>
    %528 = tpu.matmul %526, %319, %cst_163 {dimension_numbers = #tpu.dot_dimension_numbers<[1], [0], [0], [1], [0, 0, 1, 1], [], []>} : vector<4x64xf32>, vector<64x64xf32>, vector<4x64xf32> -> vector<4x64xf32>
    %cst_164 = arith.constant dense<0.000000e+00> : vector<4x64xf32>
    %529 = tpu.matmul %526, %321, %cst_164 {dimension_numbers = #tpu.dot_dimension_numbers<[1], [0], [0], [1], [0, 0, 1, 1], [], []>} : vector<4x64xf32>, vector<64x64xf32>, vector<4x64xf32> -> vector<4x64xf32>
    %530 = vector.broadcast %322 : vector<1x64xf32> to vector<4x64xf32>
    %531 = arith.addf %529, %530 : vector<4x64xf32>
    %532 = vector.extract_strided_slice %299 {offsets = [7, 0, 0], sizes = [1, 4, 64], strides = [1, 1, 1]} : vector<8x4x64xf32> to vector<1x4x64xf32>
    %533 = vector.shape_cast %532 : vector<1x4x64xf32> to vector<4x64xf32>
    %534 = arith.addf %533, %527 : vector<4x64xf32>
    %535 = arith.negf %534 : vector<4x64xf32>
    %536 = math.exp %535 : vector<4x64xf32>
    %cst_165 = arith.constant 1.000000e+00 : f32
    %537 = vector.broadcast %cst_165 : f32 to vector<4x64xf32>
    %538 = arith.addf %537, %536 : vector<4x64xf32>
    %539 = arith.divf %537, %538 : vector<4x64xf32>
    %540 = vector.extract_strided_slice %307 {offsets = [7, 0, 0], sizes = [1, 4, 64], strides = [1, 1, 1]} : vector<8x4x64xf32> to vector<1x4x64xf32>
    %541 = vector.shape_cast %540 : vector<1x4x64xf32> to vector<4x64xf32>
    %542 = arith.addf %541, %528 : vector<4x64xf32>
    %543 = arith.negf %542 : vector<4x64xf32>
    %544 = math.exp %543 : vector<4x64xf32>
    %cst_166 = arith.constant 1.000000e+00 : f32
    %545 = vector.broadcast %cst_166 : f32 to vector<4x64xf32>
    %546 = arith.addf %545, %544 : vector<4x64xf32>
    %547 = arith.divf %545, %546 : vector<4x64xf32>
    %548 = vector.extract_strided_slice %315 {offsets = [7, 0, 0], sizes = [1, 4, 64], strides = [1, 1, 1]} : vector<8x4x64xf32> to vector<1x4x64xf32>
    %549 = vector.shape_cast %548 : vector<1x4x64xf32> to vector<4x64xf32>
    %550 = arith.mulf %539, %531 : vector<4x64xf32>
    %551 = arith.addf %549, %550 : vector<4x64xf32>
    %552 = math.tanh %551 : vector<4x64xf32>
    %553 = arith.subf %526, %552 : vector<4x64xf32>
    %554 = arith.mulf %547, %553 : vector<4x64xf32>
    %555 = arith.addf %552, %554 : vector<4x64xf32>
    %c0_167 = arith.constant 0 : index
    %c0_168 = arith.constant 0 : index
    %556 = vector.load %arg9[%c0_167, %c0_168] : memref<64x1xf32, #tpu.memory_space<vmem>>, vector<64x1xf32>
    %cst_169 = arith.constant dense<0.000000e+00> : vector<4x1xf32>
    %557 = tpu.matmul %555, %556, %cst_169 {dimension_numbers = #tpu.dot_dimension_numbers<[1], [0], [0], [1], [0, 0, 1, 1], [], []>} : vector<4x64xf32>, vector<64x1xf32>, vector<4x1xf32> -> vector<4x1xf32>
    %c0_170 = arith.constant 0 : index
    %c0_171 = arith.constant 0 : index
    %558 = vector.load %arg10[%c0_170, %c0_171] : memref<1x1xf32, #tpu.memory_space<vmem>>, vector<1x1xf32>
    %559 = vector.broadcast %558 : vector<1x1xf32> to vector<4x1xf32>
    %560 = arith.addf %557, %559 : vector<4x1xf32>
    %c0_172 = arith.constant 0 : index
    %c0_173 = arith.constant 0 : index
    %561 = vector.load %arg11[%c0_172, %c0_173] : memref<4x1xf32, #tpu.memory_space<vmem>>, vector<4x1xf32>
    tpu.vector_store %arg11[%c0_172, %c0_173], %560 {strides = array<i32>} : memref<4x1xf32, #tpu.memory_space<vmem>>, vector<4x1xf32>,
    return
  }
}

</mosaic_0001>

<bundles_post_ra>
// kernel: heart_rate_gru_model.1
= control target key start
LH: loop header
LB: loop body
LE: loop exit
PB: predicated region body
PF: predicated region fallthrough
CT: control target
= control target key end

     0   :  { %vm81_vm0 = vcmask 130048   ;;  %v2756_v32 = vmov 0.0   ;;  %vm423_vm9 = vcmask 519168   ;;  %vm310_vm10 = vcmask 523264   ;;  %s4127_s2 = inlined_call_operand.vmem [shape: f32[3,64,64], index: 2, kind: input, shape index: {}]   ;;  %s4128_s1 = inlined_call_operand.vmem [shape: f32[3,16,64], index: 1, kind: input, shape index: {}]   ;;  %s4129_s0 = inlined_call_operand.vmem [shape: f32[8,4,16], index: 0, kind: input, shape index: {}]   ;;  %s4130_s3 = inlined_call_operand.vmem [shape: f32[3,1,64], index: 3, kind: input, shape index: {}]   ;;  %s4131_s4 = inlined_call_operand.vmem [shape: f32[1,64], index: 4, kind: input, shape index: {}]   ;;  %s4132_s5 = inlined_call_operand.vmem [shape: f32[3,64,64], index: 5, kind: input, shape index: {}]   ;;  %s4133_s7 = inlined_call_operand.vmem [shape: f32[3,1,64], index: 7, kind: input, shape index: {}]   ;;  %s4134_s6 = inlined_call_operand.vmem [shape: f32[3,64,64], index: 6, kind: input, shape index: {}]   ;;  %s4135_s8 = inlined_call_operand.vmem [shape: f32[1,64], index: 8, kind: input, shape index: {}]   ;;  %s4136_s9 = inlined_call_operand.vmem [shape: f32[64,1], index: 9, kind: input, shape index: {}]   ;;  %s4137_s10 = inlined_call_operand.<no memory space> [shape: f32[1,1], index: 10, kind: input, shape index: {}]   ;;  %s4138_s11 = inlined_call_operand.vmem [shape: f32[4,1], index: 11, kind: output, shape index: {}]  }
   0x1   :  { %v2820_v0 = vld [vmem:[%s4127_s2 + $0x38] sm:$0xff]  ;;  %v2825_v1 = vld [vmem:[%s4127_s2 + $0x30] sm:$0xff]  ;;  %v2831_v2 = vld [vmem:[%s4127_s2 + $0x28] sm:$0xff] }
   0x2   :  { %322 = vmatpush.msra.mxu3 %v2820_v0  ;;  %v49_v3 = vld [vmem:[%s4128_s1 + $0x8] sm:$0xff]  ;;  %v48_v4 = vld [vmem:[%s4128_s1] sm:$0xff]  ;;  %v2859_v8 = vld [vmem:[%s4127_s2 + $0x18] sm:$0xff] }
   0x3   :  { %v2843_v5 = vld [vmem:[%s4127_s2 + $0x20] sm:$0xff]  ;;  %104 = vmatpush.msra.mxu0 %v49_v3  ;;  %2557 = vmatpush.msra.mxu1 %v49_v3  ;;  %v2866_v9 = vld [vmem:[%s4129_s0 + $0x18] sm:$0xf]  ;;  %v2871_v10 = vld [vmem:[%s4129_s0 + $0x1c] sm:$0xf] }
   0x4   :  { %323 = vmatpush.msra.mxu3 %v2825_v1  ;;  %v2848_v6 = vld [vmem:[%s4129_s0] sm:$0xf]  ;;  %v2853_v7 = vld [vmem:[%s4129_s0 + $0x4] sm:$0xf]  ;;  %74 = vst [vmem:[#allocation1 + $0x30] ss:$2 sm:$0xff] %v2866_v9 }
   0x5   :  { %62 = vst [vmem:[#allocation1] ss:$2 sm:$0xff] %v2848_v6  ;;  %105 = vmatpush.msra.mxu0 %v48_v4  ;;  %2558 = vmatpush.msra.mxu1 %v48_v4  ;;  %v2407_v11 = vld [vmem:[%s4128_s1 + $0x18] sm:$0xff]  ;;  %v2886_v13 = vld [vmem:[%s4127_s2 + $0x10] sm:$0xff]  ;;  %v2902_v16 = vld [vmem:[%s4129_s0 + $0x8] sm:$0xf] }
   0x6   :  { %324 = vmatpush.msra.mxu3 %v2831_v2  ;;  %64 = vst [vmem:[#allocation1 + $0x1] ss:$2 sm:$0xff] %v2853_v7  ;;  %v2881_v12 = vld [vmem:[%s4127_s2 + $0xb8] sm:$0xff]  ;;  %v2406_v14 = vld [vmem:[%s4128_s1 + $0x10] sm:$0xff]  ;;  %v2907_v17 = vld [vmem:[%s4129_s0 + $0xc] sm:$0xf] }
   0x7   :  { %76 = vst [vmem:[#allocation1 + $0x31] ss:$2 sm:$0xff] %v2871_v10  ;;  %180 = vmatpush.msrb.mxu1 %v2407_v11  ;;  %365 = vmatpush.msrb.mxu0 %v2881_v12  ;;  %v2896_v15 = vld [vmem:[%s4127_s2 + $0xb0] sm:$0xff]  ;;  %v2912_v18 = vld [vmem:[%s4127_s2 + $0xa8] sm:$0xff]  ;;  %v2939_v23 = vld [vmem:[%s4127_s2] sm:$0xff] }
   0x8   :  { %325 = vmatpush.msra.mxu3 %v2843_v5  ;;  %v2917_v19 = vld [vmem:[%s4127_s2 + $0x8] sm:$0xff]  ;;  %66 = vst [vmem:[#allocation1 + $0x10] ss:$2 sm:$0xff] %v2902_v16  ;;  %v2924_v20 = vld [vmem:[%s4129_s0 + $0x10] sm:$0xf]  ;;  %v2945_v24 = vld [vmem:[%s4127_s2 + $0xa0] sm:$0xff] }
   0x9   :  { %181 = vmatpush.msrb.mxu1 %v2406_v14  ;;  %366 = vmatpush.msrb.mxu0 %v2896_v15  ;;  %68 = vst [vmem:[#allocation1 + $0x11] ss:$2 sm:$0xff] %v2907_v17  ;;  %v2931_v21 = vld [vmem:[%s4129_s0 + $0x14] sm:$0xf]  ;;  %v2414_v22 = vld [vmem:[%s4128_s1 + $0x28] sm:$0xff]  ;;  %v2413_v25 = vld [vmem:[%s4128_s1 + $0x20] sm:$0xff] }
   0xa   :  { %326 = vmatpush.msra.mxu3 %v2859_v8  ;;  %70 = vst [vmem:[#allocation1 + $0x20] ss:$2 sm:$0xff] %v2924_v20  ;;  %256 = vmatpush.msra.mxu2 %v2414_v22  ;;  %v2955_v26 = vld [vmem:[%s4127_s2 + $0x78] sm:$0xff]  ;;  %v2961_v28 = vld [vmem:[%s4127_s2 + $0x70] sm:$0xff]  ;;  %v2987_v33 = vld [vmem:[%s4127_s2 + $0x68] sm:$0xff] }
   0xb   :  { %367 = vmatpush.msrb.mxu0 %v2912_v18  ;;  %72 = vst [vmem:[#allocation1 + $0x21] ss:$2 sm:$0xff] %v2931_v21  ;;  %v2968_v29 = vld [vmem:[%s4127_s2 + $0x98] sm:$0xff]  ;;  %v2976_v31 = vld [vmem:[%s4127_s2 + $0x90] sm:$0xff]  ;;  %v2992_v35 = vld [vmem:[%s4127_s2 + $0x88] sm:$0xff] }
   0xc   :  { %327 = vmatpush.msra.mxu3 %v2886_v13  ;;  %257 = vmatpush.msra.mxu2 %v2413_v25  ;;  %v3000_v36 = vld [vmem:[%s4127_s2 + $0x60] sm:$0xff]  ;;  %v3018_v39 = vld [vmem:[%s4127_s2 + $0x58] sm:$0xff]  ;;  %v3029_v41 = vld [vmem:[%s4127_s2 + $0x50] sm:$0xff] }
   0xd   :  { %v77_v27 = vld.sshfl [vmem:[#allocation1] sm:$0xff pattern:$0x75316420]  ;;  %368 = vmatpush.msrb.mxu0 %v2945_v24  ;;  %v3039_v42 = vld [vmem:[%s4127_s2 + $0x48] sm:$0xff] }
   0xe   :  { %328 = vmatpush.msra.mxu3 %v2917_v19  ;;  %2402 = vmatmul.msk.f32.vlgmr.msra.gmra.mxu0 %vm81_vm0, %v77_v27  ;;  %139 = vst [vmem:[#allocation1] ss:$2 sm:$0xff] %v2848_v6  ;;  %v80_v30 = vld.sshfl [vmem:[#allocation1 + $0x30] sm:$0xff pattern:$0x75316420]  ;;  %v3008_v38 = vld [vmem:[%s4127_s2 + $0x80] sm:$0xff] }
   0xf   :  { %141 = vst [vmem:[#allocation1 + $0x1] ss:$2 sm:$0xff] %v2853_v7  ;;  %2405 = vmatmul.msk.f32.vlgmr.msra.gmra.mxu1 %vm81_vm0, %v80_v30  ;;  %369 = vmatpush.msrb.mxu0 %v2968_v29  ;;  %v3048_v43 = vld [vmem:[%s4127_s2 + $0x40] sm:$0xff] }
  0x10   :  { %329 = vmatpush.msra.mxu3 %v2939_v23  ;;  %151 = vst [vmem:[#allocation1 + $0x30] ss:$2 sm:$0xff] %v2866_v9  ;;  %v78_v34 = vld.sshfl [vmem:[#allocation1 + $0x10] sm:$0xff pattern:$0x75316420]  ;;  %436 = vmatpush.msra.mxu1 %v2820_v0 }
  0x11   :  { %330 = vmatmul.f32.vlgmr.msra.gmra.mxu3 %v2756_v32  ;;  %153 = vst [vmem:[#allocation1 + $0x31] ss:$2 sm:$0xff] %v2871_v10  ;;  %456 = vmatpush.msrb.mxu2 %v2955_v26  ;;  %v2560_v47 = vld [vmem:[%s4130_s3] ss:$0 sm:$0xff]  ;;  %v3134_v61 = vld [vmem:[%s4130_s3 + $0x1] ss:$0 sm:$0xff] }
  0x12   :  { %342 = vmatpush.msrb.mxu3 %v2955_v26  ;;  %143 = vst [vmem:[#allocation1 + $0x10] ss:$2 sm:$0xff] %v2902_v16  ;;  %370 = vmatpush.msrb.mxu0 %v2976_v31  ;;  %v79_v37 = vld.sshfl [vmem:[#allocation1 + $0x20] sm:$0xff pattern:$0x75316420] }
  0x13   :  { %145 = vst [vmem:[#allocation1 + $0x11] ss:$2 sm:$0xff] %v2907_v17  ;;  %437 = vmatpush.msra.mxu1 %v2825_v1  ;;  %457 = vmatpush.msrb.mxu2 %v2961_v28  ;;  %v3151_v30 = vld [vmem:[%s4130_s3 + $0x2] ss:$0 sm:$0xff] }
  0x14   :  { %343 = vmatpush.msrb.mxu3 %v2961_v28  ;;  %147 = vst [vmem:[#allocation1 + $0x20] ss:$2 sm:$0xff] %v2924_v20  ;;  %371 = vmatpush.msrb.mxu0 %v2992_v35 }
  0x15   :  { %149 = vst [vmem:[#allocation1 + $0x21] ss:$2 sm:$0xff] %v2931_v21  ;;  %438 = vmatpush.msra.mxu1 %v2831_v2  ;;  %458 = vmatpush.msrb.mxu2 %v2987_v33 }
  0x16   :  { %344 = vmatpush.msrb.mxu3 %v2987_v33  ;;  %2403 = vmatmul.msk.f32.gmra.mxu0 %vm81_vm0, %v78_v34  ;;  %v154_v40 = vld.sshfl [vmem:[#allocation1] sm:$0xff pattern:$0x75316420] }
  0x17   :  { %215 = vst [vmem:[#allocation1] ss:$2 sm:$0xff] %v2848_v6  ;;  %372 = vmatpush.msrb.mxu0 %v3008_v38  ;;  %2409 = vmatmul.msk.f32.vlgmr.msrb.gmra.mxu1 %vm81_vm0, %v154_v40 }
  0x18   :  { %345 = vmatpush.msrb.mxu3 %v3000_v36  ;;  %217 = vst [vmem:[#allocation1 + $0x1] ss:$2 sm:$0xff] %v2853_v7  ;;  %439 = vmatpush.msra.mxu1 %v2843_v5  ;;  %v157_v58 = vld.sshfl [vmem:[#allocation1 + $0x30] sm:$0xff pattern:$0x75316420] }
  0x19   :  { %459 = vmatpush.msrb.mxu2 %v3000_v36  ;;  %547 = vmatpush.msra.mxu0 %v2820_v0  ;;  %227 = vst [vmem:[#allocation1 + $0x30] ss:$2 sm:$0xff] %v2866_v9 }
  0x1a   :  { %346 = vmatpush.msrb.mxu3 %v3018_v39  ;;  %440 = vmatpush.msra.mxu1 %v2859_v8  ;;  %v155_v45 = vld.sshfl [vmem:[#allocation1 + $0x10] sm:$0xff pattern:$0x75316420]  ;;  %229 = vst [vmem:[#allocation1 + $0x31] ss:$2 sm:$0xff] %v2871_v10 }
  0x1b   :  { %460 = vmatpush.msrb.mxu2 %v3018_v39  ;;  %548 = vmatpush.msra.mxu0 %v2825_v1  ;;  %219 = vst [vmem:[#allocation1 + $0x10] ss:$2 sm:$0xff] %v2902_v16 }
  0x1c   :  { %347 = vmatpush.msrb.mxu3 %v3029_v41  ;;  %441 = vmatpush.msra.mxu1 %v2886_v13  ;;  %221 = vst [vmem:[#allocation1 + $0x11] ss:$2 sm:$0xff] %v2907_v17  ;;  %v156_v51 = vld.sshfl [vmem:[#allocation1 + $0x20] sm:$0xff pattern:$0x75316420] }
  0x1d   :  { %461 = vmatpush.msrb.mxu2 %v3029_v41  ;;  %549 = vmatpush.msra.mxu0 %v2831_v2  ;;  %223 = vst [vmem:[#allocation1 + $0x20] ss:$2 sm:$0xff] %v2924_v20  ;;  %v3146_v17 = vld [vmem:[%s4131_s4] ss:$0 sm:$0xff] }
  0x1e   :  { %348 = vmatpush.msrb.mxu3 %v3039_v42  ;;  %2404 = vmatmul.msk.f32.gmra.mxu0 %vm81_vm0, %v79_v37  ;;  %225 = vst [vmem:[#allocation1 + $0x21] ss:$2 sm:$0xff] %v2931_v21 }
  0x1f   :  { %v230_v44 = vld.sshfl [vmem:[#allocation1] sm:$0xff pattern:$0x75316420]  ;;  %442 = vmatpush.msra.mxu1 %v2917_v19  ;;  %462 = vmatpush.msrb.mxu2 %v3039_v42 }
  0x20   :  { %349 = vmatpush.msrb.mxu3 %v3048_v43  ;;  %2416 = vmatmul.msk.f32.vlgmr.msra.gmra.mxu2 %vm81_vm0, %v230_v44 }
  0x21   :  { %350 = vmatmul.f32.vlgmr.msrb.gmra.mxu3 %v2756_v32  ;;  %443 = vmatpush.msra.mxu1 %v2939_v23  ;;  %v233_v6 = vld.sshfl [vmem:[#allocation1 + $0x30] sm:$0xff pattern:$0x75316420] }
  0x22   :  { %476 = vmatpush.msra.mxu3 %v2881_v12  ;;  %463 = vmatpush.msrb.mxu2 %v3048_v43 }
  0x23   :  { %567 = vmatpush.msrb.mxu1 %v2955_v26  ;;  %550 = vmatpush.msra.mxu0 %v2843_v5  ;;  %v231_v50 = vld.sshfl [vmem:[#allocation1 + $0x10] sm:$0xff pattern:$0x75316420] }
  0x24   :  { %477 = vmatpush.msra.mxu3 %v2896_v15  ;;  %587 = vmatpush.msra.mxu2 %v2881_v12 }
  0x25   :  { %568 = vmatpush.msrb.mxu1 %v2961_v28  ;;  %551 = vmatpush.msra.mxu0 %v2859_v8  ;;  %v232_v59 = vld.sshfl [vmem:[#allocation1 + $0x20] sm:$0xff pattern:$0x75316420] }
  0x26   :  { %478 = vmatpush.msra.mxu3 %v2912_v18  ;;  %373 = vmatmul.f32.vlgmr.msrb.gmra.mxu0 %v2756_v32 }
  0x27   :  { %569 = vmatpush.msrb.mxu1 %v2987_v33  ;;  %588 = vmatpush.msra.mxu2 %v2896_v15 }
  0x28   :  { %479 = vmatpush.msra.mxu3 %v2945_v24  ;;  %552 = vmatpush.msra.mxu0 %v2886_v13 }
  0x29   :  { %570 = vmatpush.msrb.mxu1 %v3000_v36  ;;  %589 = vmatpush.msra.mxu2 %v2912_v18 }
  0x2a   :  { %480 = vmatpush.msra.mxu3 %v2968_v29  ;;  %553 = vmatpush.msra.mxu0 %v2917_v19 }
  0x2b   :  { %571 = vmatpush.msrb.mxu1 %v3018_v39  ;;  %590 = vmatpush.msra.mxu2 %v2945_v24 }
  0x2c   :  { %481 = vmatpush.msra.mxu3 %v2976_v31  ;;  %554 = vmatpush.msra.mxu0 %v2939_v23 }
  0x2d   :  { %572 = vmatpush.msrb.mxu1 %v3029_v41  ;;  %591 = vmatpush.msra.mxu2 %v2968_v29 }
  0x2e   :  { %482 = vmatpush.msra.mxu3 %v2992_v35  ;;  %678 = vmatpush.msrb.mxu0 %v2955_v26 }
  0x2f   :  { %573 = vmatpush.msrb.mxu1 %v3039_v42  ;;  %592 = vmatpush.msra.mxu2 %v2976_v31 }
  0x30   :  { %483 = vmatpush.msra.mxu3 %v3008_v38  ;;  %679 = vmatpush.msrb.mxu0 %v2961_v28 }
  0x31   :  { %574 = vmatpush.msrb.mxu1 %v3048_v43  ;;  %593 = vmatpush.msra.mxu2 %v2992_v35 }
  0x32   :  { %658 = vmatpush.msrb.mxu3 %v2820_v0  ;;  %680 = vmatpush.msrb.mxu0 %v2987_v33 }
  0x33   :  { %594 = vmatpush.msra.mxu2 %v3008_v38  ;;  %2410 = vmatmul.msk.f32.gmra.mxu1 %vm81_vm0, %v155_v45 }
  0x34   :  { %659 = vmatpush.msrb.mxu3 %v2825_v1  ;;  %681 = vmatpush.msrb.mxu0 %v3000_v36 }
  0x35   :  { %2417 = vmatmul.msk.f32.gmra.mxu2 %vm81_vm0, %v231_v50 }
  0x36   :  { %660 = vmatpush.msrb.mxu3 %v2831_v2  ;;  %682 = vmatpush.msrb.mxu0 %v3018_v39 }
  0x38   :  { %661 = vmatpush.msrb.mxu3 %v2843_v5  ;;  %683 = vmatpush.msrb.mxu0 %v3029_v41 }
  0x3a   :  { %662 = vmatpush.msrb.mxu3 %v2859_v8  ;;  %684 = vmatpush.msrb.mxu0 %v3039_v42 }
  0x3b   :  { %2411 = vmatmul.msk.f32.gmra.mxu1 %vm81_vm0, %v156_v51 }
  0x3c   :  { %663 = vmatpush.msrb.mxu3 %v2886_v13  ;;  %685 = vmatpush.msrb.mxu0 %v3048_v43 }
  0x3d   :  { %2418 = vmatmul.msk.f32.gmra.mxu2 %vm81_vm0, %v232_v59 }
  0x3e   :  { %664 = vmatpush.msrb.mxu3 %v2917_v19 }
  0x40   :  { %665 = vmatpush.msrb.mxu3 %v2939_v23 }
  0x43   :  { %2412 = vmatmul.msk.f32.gmra.mxu1 %vm81_vm0, %v157_v58 }
  0x45   :  { %2419 = vmatmul.msk.f32.gmra.mxu2 %vm81_vm0, %v233_v6 }
  0x8b   :  { %v107_v46 = vpop.f32.mrf.mxu0 }
  0x8c   :  { %v116_v48 = vpop.f32.mrf.mxu1  ;;  %v3121_v52 = vadd.f32 %v2560_v47, %v107_v46 }
  0x8d   :  { %v3116_v49 = vadd.f32 %v2560_v47, %v116_v48 }
  0x93   :  { %v110_v54 = vpop.f32.mrf.mxu0 }
  0x94   :  { %v331_v53 = vpop.f32.mrf.mxu3  ;;  %v3125_v56 = vadd.f32 %v2560_v47, %v110_v54  ;;  %v183_v63 = vpop.f32.mrf.mxu1 }
  0x95   :  { %v377_v55 = vadd.f32 %v331_v53, %v3121_v52  ;;  %v3139_v7 = vadd.f32 %v3134_v61, %v183_v63 }
  0x97   :  { %v2436_v57 = vmul.f32 -1.442695, %v377_v55 }
  0x99   :  { %2569 = vpow2.f32 %v2436_v57 }
  0x9b   :  { %v113_v60 = vpop.f32.mrf.mxu0 }
  0x9c   :  { %v3136_v62 = vadd.f32 %v2560_v47, %v113_v60 }
  0x9f   :  { %v2570_v3 = vpop.eup %2569 }
  0xa0   :  { %v381_v4 = vadd.f32 1.0, %v2570_v3 }
  0xa2   :  { %2571 = vrcp.f32 %v381_v4  ;;  %v393_v22 = vand.u32 2147483648, %v381_v4  ;;  %v391_v27 = vand.u32 2147483647, %v381_v4  ;;  %vm387_vm2 = vweird.f32 %v381_v4 }
  0xa3   :  { %v374_v21 = vpop.f32.mrf.mxu0  ;;  %v259_v34 = vpop.f32.mrf.mxu2 }
  0xa4   :  { %v351_v9 = vpop.f32.mrf.mxu3  ;;  %v375_v40 = vadd.f32 %v3146_v17, %v374_v21  ;;  %v394_v46 = vor.u32 1.1754944e-38, %v393_v22  ;;  %vm392_vm4 = vcmp.eq.f32.partialorder %v391_v27, 8.507059e+37  ;;  %v3155_v48 = vadd.f32 %v3151_v30, %v259_v34 }
  0xa5   :  { %v397_v10 = vadd.f32 %v351_v9, %v3139_v7 }
  0xa7   :  { %v2437_v11 = vmul.f32 -1.442695, %v397_v10 }
  0xa8   :  { %v2572_v14 = vpop.eup %2571 }
  0xa9   :  { %2573 = vpow2.f32 %v2437_v11  ;;  %v383_v16 = vmul.f32 %v2572_v14, %v381_v4  ;;  %vm388_vm1 = vweird.f32 %v2572_v14 }
  0xaa   :  { %vm389_vm3 = vmor %vm387_vm2, %vm388_vm1 }
  0xab   :  { %v384_v20 = vsub.f32 1.0, %v383_v16 }
  0xad   :  { %v385_v25 = vmul.f32 %v2572_v14, %v384_v20 }
  0xaf   :  { %v2574_v37 = vpop.eup %2573  ;;  %v386_v44 = vadd.f32 %v2572_v14, %v385_v25 }
  0xb0   :  { %v401_v45 = vadd.f32 1.0, %v2574_v37  ;;  %v3195_v20 = vpop.f32.mrf.mxu1  ;;  %v123_v37 = vrot.slane %v3121_v52, 4 }
  0xb1   :  { %v390_v47 = vsel %vm389_vm3, %v2572_v14, %v386_v44 }
  0xb2   :  { %2575 = vrcp.f32 %v401_v45  ;;  %v395_v50 = vsel %vm392_vm4, %v394_v46, %v390_v47  ;;  %v413_v58 = vand.u32 2147483648, %v401_v45  ;;  %v411_v60 = vand.u32 2147483647, %v401_v45 }
  0xb3   :  { %v417_v51 = vmul.f32 %v395_v50, %v375_v40  ;;  %vm407_vm6 = vweird.f32 %v401_v45  ;;  %v199_v46 = vrot.slane %v3139_v7, 4 }
  0xb4   :  { %v414_v4 = vor.u32 1.1754944e-38, %v413_v58  ;;  %vm412_vm8 = vcmp.eq.f32.partialorder %v411_v60, 8.507059e+37 }
  0xb5   :  { %v418_v53 = vadd.f32 %v417_v51, %v3155_v48 }
  0xb7   :  { %2577 = vtanh.f32 %v418_v53 }
  0xb8   :  { %v2576_v54 = vpop.eup %2575  ;;  %v3197_v21 = vpop.f32.mrf.mxu2 }
  0xb9   :  { %v403_v55 = vmul.f32 %v2576_v54, %v401_v45  ;;  %vm408_vm5 = vweird.f32 %v2576_v54  ;;  %v3199_v22 = vpop.f32.mrf.mxu1 }
  0xba   :  { %vm409_vm7 = vmor %vm407_vm6, %vm408_vm5 }
  0xbb   :  { %v404_v57 = vsub.f32 1.0, %v403_v55 }
  0xbd   :  { %v405_v59 = vmul.f32 %v2576_v54, %v404_v57  ;;  %v2578_v63 = vpop.eup %2577 }
  0xbe   :  { %v420_v9 = vsub.f32 0.0, %v2578_v63 }
  0xbf   :  { %v406_v3 = vadd.f32 %v2576_v54, %v405_v59 }
  0xc0   :  { %v3201_v25 = vpop.f32.mrf.mxu2 }
  0xc1   :  { %v410_v6 = vsel %vm409_vm7, %v2576_v54, %v406_v3  ;;  %v3203_v27 = vpop.f32.mrf.mxu1 }
  0xc2   :  { %v415_v10 = vsel %vm412_vm8, %v414_v4, %v410_v6 }
  0xc3   :  { %v421_v11 = vmul.f32 %v420_v9, %v415_v10 }
  0xc5   :  { %v3158_v14 = vadd.f32 %v2578_v63, %v421_v11 }
  0xc7   :  { %424 = vst.msk [vmem:[#allocation2] sm:$0xf] %vm423_vm9, %v3158_v14  ;;  %2438 = vmatmul.msk.f32.vlgmr.msra.gmra.mxu1 %vm310_vm10, %v3158_v14  ;;  %2439 = vmatmul.msk.f32.vlgmr.msrb.gmra.mxu2 %vm310_vm10, %v3158_v14 }
  0xc8   :  { %2440 = vmatmul.msk.f32.vlgmr.msra.gmra.mxu3 %vm310_vm10, %v3158_v14  ;;  %698 = vmatpush.msra.mxu1 %v2881_v12  ;;  %v3205_v34 = vpop.f32.mrf.mxu2 }
  0xc9   :  { %769 = vmatpush.msrb.mxu2 %v2820_v0  ;;  %789 = vmatpush.msra.mxu3 %v2955_v26 }
  0xca   :  { %699 = vmatpush.msra.mxu1 %v2896_v15 }
  0xcb   :  { %770 = vmatpush.msrb.mxu2 %v2825_v1  ;;  %790 = vmatpush.msra.mxu3 %v2961_v28 }
  0xcc   :  { %700 = vmatpush.msra.mxu1 %v2912_v18 }
  0xcd   :  { %771 = vmatpush.msrb.mxu2 %v2831_v2  ;;  %791 = vmatpush.msra.mxu3 %v2987_v33 }
  0xce   :  { %701 = vmatpush.msra.mxu1 %v2945_v24  ;;  %v3178_v16 = vld [vmem:[#allocation2] sm:$0xf] }
  0xcf   :  { %772 = vmatpush.msrb.mxu2 %v2843_v5  ;;  %792 = vmatpush.msra.mxu3 %v3000_v36  ;;  %1230 = vst [vmem:[#allocation1] ss:$2 sm:$0xff] %v3178_v16 }
  0xd0   :  { %702 = vmatpush.msra.mxu1 %v2968_v29 }
  0xd1   :  { %773 = vmatpush.msrb.mxu2 %v2859_v8  ;;  %793 = vmatpush.msra.mxu3 %v3018_v39 }
  0xd2   :  { %703 = vmatpush.msra.mxu1 %v2976_v31 }
  0xd3   :  { %774 = vmatpush.msrb.mxu2 %v2886_v13  ;;  %794 = vmatpush.msra.mxu3 %v3029_v41 }
  0xd4   :  { %704 = vmatpush.msra.mxu1 %v2992_v35 }
  0xd5   :  { %775 = vmatpush.msrb.mxu2 %v2917_v19  ;;  %795 = vmatpush.msra.mxu3 %v3039_v42 }
  0xd6   :  { %705 = vmatpush.msra.mxu1 %v3008_v38 }
  0xd7   :  { %776 = vmatpush.msrb.mxu2 %v2939_v23  ;;  %796 = vmatpush.msra.mxu3 %v3048_v43 }
 0x144   :  { %v445_v40 = vpop.f32.mrf.mxu1 }
 0x145   :  { %v488_v44 = vadd.f32 %v445_v40, %v123_v37 }
 0x147   :  { %v2441_v45 = vmul.f32 -1.442695, %v488_v44 }
 0x149   :  { %2579 = vpow2.f32 %v2441_v45  ;;  %v275_v45 = vrot.slane %v3155_v48, 4 }
 0x14a   :  { %v465_v47 = vpop.f32.mrf.mxu2 }
 0x14b   :  { %v508_v50 = vadd.f32 %v465_v47, %v199_v46  ;;  %v485_v6 = vpop.f32.mrf.mxu3 }
 0x14c   :  { %v486_v37 = vadd.f32 %v3146_v17, %v485_v6 }
 0x14d   :  { %v2442_v51 = vmul.f32 -1.442695, %v508_v50 }
 0x14f   :  { %v2580_v53 = vpop.eup %2579  ;;  %2581 = vpow2.f32 %v2442_v51 }
 0x150   :  { %v492_v54 = vadd.f32 1.0, %v2580_v53 }
 0x152   :  { %2583 = vrcp.f32 %v492_v54  ;;  %v504_v52 = vand.u32 2147483648, %v492_v54  ;;  %v502_v3 = vand.u32 2147483647, %v492_v54  ;;  %vm498_vm12 = vweird.f32 %v492_v54 }
 0x154   :  { %v505_v10 = vor.u32 1.1754944e-38, %v504_v52  ;;  %vm503_vm14 = vcmp.eq.f32.partialorder %v502_v3, 8.507059e+37 }
 0x155   :  { %v2582_v55 = vpop.eup %2581 }
 0x156   :  { %v512_v57 = vadd.f32 1.0, %v2582_v55 }
 0x158   :  { %v2584_v58 = vpop.eup %2583  ;;  %2585 = vrcp.f32 %v512_v57  ;;  %v524_v53 = vand.u32 2147483648, %v512_v57  ;;  %vm518_vm0 = vweird.f32 %v512_v57  ;;  %v522_v55 = vand.u32 2147483647, %v512_v57 }
 0x159   :  { %v494_v59 = vmul.f32 %v2584_v58, %v492_v54  ;;  %vm499_vm11 = vweird.f32 %v2584_v58 }
 0x15a   :  { %vm500_vm13 = vmor %vm498_vm12, %vm499_vm11  ;;  %vm523_vm2 = vcmp.eq.f32.partialorder %v522_v55, 8.507059e+37 }
 0x15b   :  { %v495_v60 = vsub.f32 1.0, %v494_v59 }
 0x15d   :  { %v496_v63 = vmul.f32 %v2584_v58, %v495_v60  ;;  %v525_v60 = vor.u32 1.1754944e-38, %v524_v53 }
 0x15e   :  { %v2586_v4 = vpop.eup %2585 }
 0x15f   :  { %v514_v7 = vmul.f32 %v2586_v4, %v512_v57  ;;  %v497_v9 = vadd.f32 %v2584_v58, %v496_v63  ;;  %vm519_vm15 = vweird.f32 %v2586_v4 }
 0x160   :  { %vm520_vm1 = vmor %vm518_vm0, %vm519_vm15 }
 0x161   :  { %v515_v11 = vsub.f32 1.0, %v514_v7  ;;  %v501_v40 = vsel %vm500_vm13, %v2584_v58, %v497_v9 }
 0x162   :  { %v506_v44 = vsel %vm503_vm14, %v505_v10, %v501_v40 }
 0x163   :  { %v528_v46 = vmul.f32 %v506_v44, %v486_v37  ;;  %v516_v47 = vmul.f32 %v2586_v4, %v515_v11 }
 0x165   :  { %v529_v50 = vadd.f32 %v528_v46, %v275_v45  ;;  %v517_v51 = vadd.f32 %v2586_v4, %v516_v47 }
 0x167   :  { %2587 = vtanh.f32 %v529_v50  ;;  %v521_v54 = vsel %vm520_vm1, %v2586_v4, %v517_v51  ;;  %v3254_v4 = vadd.f32 %v3134_v61, %v3195_v20 }
 0x168   :  { %v526_v52 = vsel %vm523_vm2, %v525_v60, %v521_v54 }
 0x16d   :  { %v2588_v59 = vpop.eup %2587 }
 0x16e   :  { %v531_v58 = vsub.f32 %v3158_v14, %v2588_v59 }
 0x170   :  { %v532_v63 = vmul.f32 %v531_v58, %v526_v52 }
 0x172   :  { %v3212_v3 = vadd.f32 %v2588_v59, %v532_v63 }
 0x174   :  { %535 = vst.msk [vmem:[#allocation2 + $0x4] sm:$0xf] %vm423_vm9, %v3212_v3  ;;  %2443 = vmatmul.msk.f32.vlgmr.msra.gmra.mxu0 %vm310_vm10, %v3212_v3  ;;  %2444 = vmatmul.msk.f32.vlgmr.msrb.gmra.mxu1 %vm310_vm10, %v3212_v3 }
 0x175   :  { %2445 = vmatmul.msk.f32.vlgmr.msra.gmra.mxu2 %vm310_vm10, %v3212_v3  ;;  %809 = vmatpush.msra.mxu0 %v2881_v12 }
 0x176   :  { %880 = vmatpush.msrb.mxu1 %v2820_v0  ;;  %900 = vmatpush.msra.mxu2 %v2955_v26 }
 0x177   :  { %810 = vmatpush.msra.mxu0 %v2896_v15 }
 0x178   :  { %881 = vmatpush.msrb.mxu1 %v2825_v1  ;;  %901 = vmatpush.msra.mxu2 %v2961_v28 }
 0x179   :  { %811 = vmatpush.msra.mxu0 %v2912_v18 }
 0x17a   :  { %882 = vmatpush.msrb.mxu1 %v2831_v2  ;;  %902 = vmatpush.msra.mxu2 %v2987_v33 }
 0x17b   :  { %812 = vmatpush.msra.mxu0 %v2945_v24  ;;  %v1203_v48 = vld [vmem:[#allocation2 + $0x4] sm:$0xf] }
 0x17c   :  { %883 = vmatpush.msrb.mxu1 %v2843_v5  ;;  %903 = vmatpush.msra.mxu2 %v3000_v36  ;;  %1232 = vst [vmem:[#allocation1 + $0x1] ss:$2 sm:$0xff] %v1203_v48 }
 0x17d   :  { %813 = vmatpush.msra.mxu0 %v2968_v29 }
 0x17e   :  { %884 = vmatpush.msrb.mxu1 %v2859_v8  ;;  %904 = vmatpush.msra.mxu2 %v3018_v39 }
 0x17f   :  { %814 = vmatpush.msra.mxu0 %v2976_v31 }
 0x180   :  { %885 = vmatpush.msrb.mxu1 %v2886_v13  ;;  %905 = vmatpush.msra.mxu2 %v3029_v41 }
 0x181   :  { %815 = vmatpush.msra.mxu0 %v2992_v35 }
 0x182   :  { %886 = vmatpush.msrb.mxu1 %v2917_v19  ;;  %906 = vmatpush.msra.mxu2 %v3039_v42 }
 0x183   :  { %816 = vmatpush.msra.mxu0 %v3008_v38  ;;  %v3244_v14 = vld.sshfl [vmem:[#allocation1] sm:$0xff pattern:$0x75316420] }
 0x184   :  { %887 = vmatpush.msrb.mxu1 %v2939_v23  ;;  %907 = vmatpush.msra.mxu2 %v3048_v43  ;;  %1312 = vst [vmem:[#allocation1] ss:$2 sm:$0xff] %v3178_v16 }
 0x185   :  { %1314 = vst [vmem:[#allocation1 + $0x1] ss:$2 sm:$0xff] %v1203_v48 }
 0x18c   :  { %v3249_v57 = vld.sshfl [vmem:[#allocation1] sm:$0xff pattern:$0x75316420] }
 0x18d   :  { %1394 = vst [vmem:[#allocation1] ss:$2 sm:$0xff] %v3178_v16 }
 0x18e   :  { %1396 = vst [vmem:[#allocation1 + $0x1] ss:$2 sm:$0xff] %v1203_v48 }
 0x1f1   :  { %v556_v6 = vpop.f32.mrf.mxu0  ;;  %v576_v7 = vpop.f32.mrf.mxu1 }
 0x1f2   :  { %v599_v9 = vadd.f32 %v556_v6, %v3125_v56  ;;  %v619_v10 = vadd.f32 %v576_v7, %v3254_v4  ;;  %v3261_v7 = vadd.f32 %v3151_v30, %v3197_v21 }
 0x1f4   :  { %v2446_v11 = vmul.f32 -1.442695, %v599_v9  ;;  %v2447_v37 = vmul.f32 -1.442695, %v619_v10 }
 0x1f6   :  { %2589 = vpow2.f32 %v2446_v11 }
 0x1f7   :  { %2591 = vpow2.f32 %v2447_v37 }
 0x1f8   :  { %v596_v59 = vpop.f32.mrf.mxu2 }
 0x1f9   :  { %v597_v63 = vadd.f32 %v3146_v17, %v596_v59 }
 0x1fc   :  { %v2590_v40 = vpop.eup %2589 }
 0x1fd   :  { %v2592_v44 = vpop.eup %2591  ;;  %v603_v45 = vadd.f32 1.0, %v2590_v40 }
 0x1fe   :  { %v623_v46 = vadd.f32 1.0, %v2592_v44 }
 0x1ff   :  { %2593 = vrcp.f32 %v603_v45  ;;  %v615_v53 = vand.u32 2147483648, %v603_v45  ;;  %v613_v54 = vand.u32 2147483647, %v603_v45  ;;  %vm609_vm4 = vweird.f32 %v603_v45 }
 0x200   :  { %2595 = vrcp.f32 %v623_v46  ;;  %v635_v40 = vand.u32 2147483648, %v623_v46  ;;  %vm629_vm8 = vweird.f32 %v623_v46  ;;  %v633_v44 = vand.u32 2147483647, %v623_v46 }
 0x201   :  { %v616_v52 = vor.u32 1.1754944e-38, %v615_v53  ;;  %vm614_vm6 = vcmp.eq.f32.partialorder %v613_v54, 8.507059e+37 }
 0x202   :  { %vm634_vm12 = vcmp.eq.f32.partialorder %v633_v44, 8.507059e+37 }
 0x205   :  { %v2594_v16 = vpop.eup %2593 }
 0x206   :  { %v2596_v47 = vpop.eup %2595  ;;  %v605_v20 = vmul.f32 %v2594_v16, %v603_v45  ;;  %vm610_vm3 = vweird.f32 %v2594_v16 }
 0x207   :  { %v625_v51 = vmul.f32 %v2596_v47, %v623_v46  ;;  %vm611_vm5 = vmor %vm609_vm4, %vm610_vm3  ;;  %vm630_vm7 = vweird.f32 %v2596_v47 }
 0x208   :  { %v606_v50 = vsub.f32 1.0, %v605_v20  ;;  %vm631_vm11 = vmor %vm629_vm8, %vm630_vm7 }
 0x209   :  { %v626_v58 = vsub.f32 1.0, %v625_v51 }
 0x20a   :  { %v607_v55 = vmul.f32 %v2594_v16, %v606_v50 }
 0x20b   :  { %v627_v10 = vmul.f32 %v2596_v47, %v626_v58 }
 0x20c   :  { %v608_v60 = vadd.f32 %v2594_v16, %v607_v55 }
 0x20d   :  { %v628_v37 = vadd.f32 %v2596_v47, %v627_v10 }
 0x20e   :  { %v612_v48 = vsel %vm611_vm5, %v2594_v16, %v608_v60  ;;  %v636_v16 = vor.u32 1.1754944e-38, %v635_v40 }
 0x20f   :  { %v617_v6 = vsel %vm614_vm6, %v616_v52, %v612_v48  ;;  %v632_v45 = vsel %vm631_vm11, %v2596_v47, %v628_v37 }
 0x210   :  { %v639_v9 = vmul.f32 %v617_v6, %v597_v63  ;;  %v637_v51 = vsel %vm634_vm12, %v636_v16, %v632_v45 }
 0x212   :  { %v640_v11 = vadd.f32 %v639_v9, %v3261_v7 }
 0x214   :  { %2597 = vtanh.f32 %v640_v11 }
 0x21a   :  { %v2598_v20 = vpop.eup %2597 }
 0x21b   :  { %v642_v50 = vsub.f32 %v3212_v3, %v2598_v20 }
 0x21d   :  { %v643_v21 = vmul.f32 %v642_v50, %v637_v51 }
 0x21f   :  { %v3265_v53 = vadd.f32 %v2598_v20, %v643_v21  ;;  %v276_v20 = vrot.slane %v3261_v7, 4  ;;  %v2729_v7 = vld [vmem:[%s4127_s2 + $0x38] sm:$0xff] }
 0x221   :  { %646 = vst.msk [vmem:[#allocation2 + $0x8] sm:$0xf] %vm423_vm9, %v3265_v53  ;;  %2448 = vmatmul.msk.f32.vlgmr.msrb.gmra.mxu3 %vm310_vm10, %v3265_v53  ;;  %2449 = vmatmul.msk.f32.vlgmr.msrb.gmra.mxu0 %vm310_vm10, %v3265_v53 }
 0x222   :  { %2450 = vmatmul.msk.f32.vlgmr.msra.gmra.mxu1 %vm310_vm10, %v3265_v53  ;;  %920 = vmatpush.msrb.mxu3 %v2881_v12 }
 0x223   :  { %991 = vmatpush.msrb.mxu0 %v2820_v0  ;;  %1011 = vmatpush.msra.mxu1 %v2955_v26  ;;  %v200_v0 = vrot.slane %v3254_v4, 4 }
 0x224   :  { %921 = vmatpush.msrb.mxu3 %v2896_v15 }
 0x225   :  { %992 = vmatpush.msrb.mxu0 %v2825_v1  ;;  %1012 = vmatpush.msra.mxu1 %v2961_v28 }
 0x226   :  { %922 = vmatpush.msrb.mxu3 %v2912_v18 }
 0x227   :  { %993 = vmatpush.msrb.mxu0 %v2831_v2  ;;  %1013 = vmatpush.msra.mxu1 %v2987_v33 }
 0x228   :  { %923 = vmatpush.msrb.mxu3 %v2945_v24  ;;  %v3285_v3 = vld [vmem:[#allocation2 + $0x8] sm:$0xf] }
 0x229   :  { %994 = vmatpush.msrb.mxu0 %v2843_v5  ;;  %1014 = vmatpush.msra.mxu1 %v3000_v36  ;;  %1234 = vst [vmem:[#allocation1 + $0x10] ss:$2 sm:$0xff] %v3285_v3 }
 0x22a   :  { %924 = vmatpush.msrb.mxu3 %v2968_v29 }
 0x22b   :  { %995 = vmatpush.msrb.mxu0 %v2859_v8  ;;  %1015 = vmatpush.msra.mxu1 %v3018_v39  ;;  %v124_v8 = vrot.slane %v3125_v56, 4 }
 0x22c   :  { %925 = vmatpush.msrb.mxu3 %v2976_v31 }
 0x22d   :  { %996 = vmatpush.msrb.mxu0 %v2886_v13  ;;  %1016 = vmatpush.msra.mxu1 %v3029_v41 }
 0x22e   :  { %926 = vmatpush.msrb.mxu3 %v2992_v35 }
 0x22f   :  { %997 = vmatpush.msrb.mxu0 %v2917_v19  ;;  %1017 = vmatpush.msra.mxu1 %v3039_v42 }
 0x230   :  { %927 = vmatpush.msrb.mxu3 %v3008_v38 }
 0x231   :  { %998 = vmatpush.msrb.mxu0 %v2939_v23  ;;  %1018 = vmatpush.msra.mxu1 %v3048_v43 }
 0x29e   :  { %v687_v1 = vpop.f32.mrf.mxu0 }
 0x29f   :  { %v730_v2 = vadd.f32 %v687_v1, %v200_v0  ;;  %v707_v9 = vpop.f32.mrf.mxu1 }
 0x2a0   :  { %v708_v40 = vadd.f32 %v3146_v17, %v707_v9 }
 0x2a1   :  { %v2452_v5 = vmul.f32 -1.442695, %v730_v2 }
 0x2a3   :  { %2599 = vpow2.f32 %v2452_v5 }
 0x2a4   :  { %v667_v13 = vpop.f32.mrf.mxu3 }
 0x2a5   :  { %v710_v46 = vadd.f32 %v667_v13, %v124_v8 }
 0x2a7   :  { %v2451_v47 = vmul.f32 -1.442695, %v710_v46 }
 0x2a9   :  { %2601 = vpow2.f32 %v2451_v47  ;;  %v2600_v19 = vpop.eup %2599 }
 0x2aa   :  { %v734_v54 = vadd.f32 1.0, %v2600_v19 }
 0x2ac   :  { %v746_v0 = vand.u32 2147483648, %v734_v54  ;;  %vm740_vm2 = vweird.f32 %v734_v54  ;;  %v744_v1 = vand.u32 2147483647, %v734_v54 }
 0x2ae   :  { %v747_v8 = vor.u32 1.1754944e-38, %v746_v0  ;;  %vm745_vm4 = vcmp.eq.f32.partialorder %v744_v1, 8.507059e+37 }
 0x2af   :  { %v2602_v55 = vpop.eup %2601 }
 0x2b0   :  { %v714_v59 = vadd.f32 1.0, %v2602_v55 }
 0x2b2   :  { %2603 = vrcp.f32 %v714_v59  ;;  %v726_v48 = vand.u32 2147483648, %v714_v59  ;;  %v724_v56 = vand.u32 2147483647, %v714_v59  ;;  %vm720_vm14 = vweird.f32 %v714_v59 }
 0x2b3   :  { %2605 = vrcp.f32 %v734_v54 }
 0x2b4   :  { %v727_v37 = vor.u32 1.1754944e-38, %v726_v48  ;;  %vm725_vm0 = vcmp.eq.f32.partialorder %v724_v56, 8.507059e+37 }
 0x2b8   :  { %v2604_v60 = vpop.eup %2603 }
 0x2b9   :  { %v2606_v58 = vpop.eup %2605  ;;  %v716_v52 = vmul.f32 %v2604_v60, %v714_v59  ;;  %vm721_vm13 = vweird.f32 %v2604_v60 }
 0x2ba   :  { %v736_v63 = vmul.f32 %v2606_v58, %v734_v54  ;;  %vm722_vm15 = vmor %vm720_vm14, %vm721_vm13  ;;  %vm741_vm1 = vweird.f32 %v2606_v58 }
 0x2bb   :  { %v717_v4 = vsub.f32 1.0, %v716_v52  ;;  %vm742_vm3 = vmor %vm740_vm2, %vm741_vm1 }
 0x2bc   :  { %v737_v11 = vsub.f32 1.0, %v736_v63 }
 0x2bd   :  { %v718_v6 = vmul.f32 %v2604_v60, %v717_v4 }
 0x2be   :  { %v738_v50 = vmul.f32 %v2606_v58, %v737_v11 }
 0x2bf   :  { %v719_v10 = vadd.f32 %v2604_v60, %v718_v6 }
 0x2c0   :  { %v739_v21 = vadd.f32 %v2606_v58, %v738_v50 }
 0x2c1   :  { %v723_v44 = vsel %vm722_vm15, %v2604_v60, %v719_v10 }
 0x2c2   :  { %v728_v45 = vsel %vm725_vm0, %v727_v37, %v723_v44  ;;  %v743_v2 = vsel %vm742_vm3, %v2606_v58, %v739_v21  ;;  %v3370_v37 = vadd.f32 %v3151_v30, %v3201_v25 }
 0x2c3   :  { %v750_v16 = vmul.f32 %v728_v45, %v708_v40  ;;  %v748_v46 = vsel %vm745_vm4, %v747_v8, %v743_v2  ;;  %v2737_v8 = vld [vmem:[%s4127_s2 + $0xb0] sm:$0xff] }
 0x2c5   :  { %v751_v51 = vadd.f32 %v750_v16, %v276_v20 }
 0x2c7   :  { %2607 = vtanh.f32 %v751_v51 }
 0x2cd   :  { %v2608_v5 = vpop.eup %2607 }
 0x2ce   :  { %v753_v13 = vsub.f32 %v3265_v53, %v2608_v5  ;;  %v2730_v53 = vld [vmem:[%s4127_s2 + $0x30] sm:$0xff] }
 0x2d0   :  { %v754_v47 = vmul.f32 %v753_v13, %v748_v46  ;;  %v2738_v13 = vld [vmem:[%s4127_s2 + $0xa8] sm:$0xff] }
 0x2d2   :  { %v3307_v19 = vadd.f32 %v2608_v5, %v754_v47  ;;  %v2736_v5 = vld [vmem:[%s4127_s2 + $0xb8] sm:$0xff]  ;;  %v2739_v47 = vld [vmem:[%s4127_s2 + $0xa0] sm:$0xff] }
 0x2d4   :  { %757 = vst.msk [vmem:[#allocation2 + $0xc] sm:$0xf] %vm423_vm9, %v3307_v19  ;;  %2453 = vmatmul.msk.f32.vlgmr.msrb.gmra.mxu2 %vm310_vm10, %v3307_v19  ;;  %2454 = vmatmul.msk.f32.vlgmr.msra.gmra.mxu3 %vm310_vm10, %v3307_v19 }
 0x2d5   :  { %2455 = vmatmul.msk.f32.vlgmr.msra.gmra.mxu0 %vm310_vm10, %v3307_v19  ;;  %1031 = vmatpush.msrb.mxu2 %v2881_v12  ;;  %v2731_v12 = vld [vmem:[%s4127_s2 + $0x28] sm:$0xff] }
 0x2d6   :  { %1102 = vmatpush.msra.mxu3 %v2729_v7  ;;  %1122 = vmatpush.msra.mxu0 %v2955_v26  ;;  %v2741_v7 = vld [vmem:[%s4127_s2 + $0x90] sm:$0xff] }
 0x2d7   :  { %1032 = vmatpush.msrb.mxu2 %v2896_v15  ;;  %v2732_v15 = vld [vmem:[%s4127_s2 + $0x20] sm:$0xff] }
 0x2d8   :  { %1103 = vmatpush.msra.mxu3 %v2730_v53  ;;  %1123 = vmatpush.msra.mxu0 %v2961_v28  ;;  %v2735_v28 = vld [vmem:[%s4127_s2 + $0x8] sm:$0xff] }
 0x2d9   :  { %1033 = vmatpush.msrb.mxu2 %v2912_v18  ;;  %v2733_v18 = vld [vmem:[%s4127_s2 + $0x18] sm:$0xff]  ;;  %v2742_v53 = vld [vmem:[%s4127_s2 + $0x88] sm:$0xff] }
 0x2da   :  { %1104 = vmatpush.msra.mxu3 %v2731_v12  ;;  %1124 = vmatpush.msra.mxu0 %v2987_v33  ;;  %v3363_v33 = vadd.f32 %v3134_v61, %v3199_v22  ;;  %v2743_v12 = vld [vmem:[%s4127_s2 + $0x80] sm:$0xff] }
 0x2db   :  { %1034 = vmatpush.msrb.mxu2 %v2945_v24  ;;  %v1205_v26 = vld [vmem:[#allocation2 + $0xc] sm:$0xf] }
 0x2dc   :  { %1236 = vst [vmem:[#allocation1 + $0x11] ss:$2 sm:$0xff] %v1205_v26  ;;  %1105 = vmatpush.msra.mxu3 %v2732_v15  ;;  %1125 = vmatpush.msra.mxu0 %v3000_v36  ;;  %v2734_v24 = vld [vmem:[%s4127_s2 + $0x10] sm:$0xff] }
 0x2dd   :  { %1035 = vmatpush.msrb.mxu2 %v2968_v29 }
 0x2de   :  { %1106 = vmatpush.msra.mxu3 %v2733_v18  ;;  %1126 = vmatpush.msra.mxu0 %v3018_v39 }
 0x2df   :  { %1036 = vmatpush.msrb.mxu2 %v2976_v31 }
 0x2e0   :  { %1107 = vmatpush.msra.mxu3 %v2734_v24  ;;  %1127 = vmatpush.msra.mxu0 %v3029_v41 }
 0x2e1   :  { %1037 = vmatpush.msrb.mxu2 %v2992_v35 }
 0x2e2   :  { %1108 = vmatpush.msra.mxu3 %v2735_v28  ;;  %1128 = vmatpush.msra.mxu0 %v3039_v42  ;;  %v201_v28 = vrot.slane %v3363_v33, 4 }
 0x2e3   :  { %1038 = vmatpush.msrb.mxu2 %v3008_v38  ;;  %v3353_v29 = vld.sshfl [vmem:[#allocation1 + $0x10] sm:$0xff pattern:$0x75316420] }
 0x2e4   :  { %1316 = vst [vmem:[#allocation1 + $0x10] ss:$2 sm:$0xff] %v3285_v3  ;;  %1109 = vmatpush.msra.mxu3 %v2939_v23  ;;  %1129 = vmatpush.msra.mxu0 %v3048_v43 }
 0x2e5   :  { %1318 = vst [vmem:[#allocation1 + $0x11] ss:$2 sm:$0xff] %v1205_v26 }
 0x2ec   :  { %v3358_v31 = vld.sshfl [vmem:[#allocation1 + $0x10] sm:$0xff pattern:$0x75316420] }
 0x2ed   :  { %1398 = vst [vmem:[#allocation1 + $0x10] ss:$2 sm:$0xff] %v3285_v3 }
 0x2ee   :  { %1400 = vst [vmem:[#allocation1 + $0x11] ss:$2 sm:$0xff] %v1205_v26  ;;  %v125_v26 = vrot.slane %v3136_v62, 4 }
 0x352   :  { %v818_v63 = vpop.f32.mrf.mxu0 }
 0x353   :  { %v819_v9 = vadd.f32 %v3146_v17, %v818_v63 }
 0x357   :  { %v778_v35 = vpop.f32.mrf.mxu2  ;;  %v798_v36 = vpop.f32.mrf.mxu3 }
 0x358   :  { %v821_v38 = vadd.f32 %v778_v35, %v3136_v62  ;;  %v841_v39 = vadd.f32 %v798_v36, %v3363_v33  ;;  %v1215_v62 = vld [vmem:[%s4132_s5 + $0x28] sm:$0xff]  ;;  %v1214_v33 = vld [vmem:[%s4132_s5 + $0x20] sm:$0xff] }
 0x35a   :  { %v2456_v41 = vmul.f32 -1.442695, %v821_v38  ;;  %v2457_v23 = vmul.f32 -1.442695, %v841_v39  ;;  %v1217_v39 = vld [vmem:[%s4132_s5 + $0x38] sm:$0xff] }
 0x35c   :  { %2609 = vpow2.f32 %v2456_v41  ;;  %v1216_v41 = vld [vmem:[%s4132_s5 + $0x30] sm:$0xff] }
 0x35d   :  { %2611 = vpow2.f32 %v2457_v23 }
 0x362   :  { %v2610_v42 = vpop.eup %2609 }
 0x363   :  { %v2612_v43 = vpop.eup %2611  ;;  %v825_v55 = vadd.f32 1.0, %v2610_v42 }
 0x364   :  { %v845_v54 = vadd.f32 1.0, %v2612_v43 }
 0x365   :  { %2613 = vrcp.f32 %v825_v55  ;;  %v837_v60 = vand.u32 2147483648, %v825_v55  ;;  %v835_v4 = vand.u32 2147483647, %v825_v55  ;;  %vm831_vm6 = vweird.f32 %v825_v55 }
 0x366   :  { %2615 = vrcp.f32 %v845_v54  ;;  %v857_v16 = vand.u32 2147483648, %v845_v54  ;;  %vm851_vm12 = vweird.f32 %v845_v54  ;;  %v855_v50 = vand.u32 2147483647, %v845_v54 }
 0x367   :  { %v838_v6 = vor.u32 1.1754944e-38, %v837_v60  ;;  %vm836_vm8 = vcmp.eq.f32.partialorder %v835_v4, 8.507059e+37  ;;  %v1210_v60 = vld [vmem:[%s4132_s5] sm:$0xff] }
 0x368   :  { %v858_v0 = vor.u32 1.1754944e-38, %v857_v16  ;;  %vm856_vm14 = vcmp.eq.f32.partialorder %v855_v50, 8.507059e+37 }
 0x36b   :  { %v2614_v3 = vpop.eup %2613 }
 0x36c   :  { %v2616_v59 = vpop.eup %2615  ;;  %v827_v61 = vmul.f32 %v2614_v3, %v825_v55  ;;  %vm832_vm5 = vweird.f32 %v2614_v3  ;;  %v1213_v55 = vld [vmem:[%s4132_s5 + $0x18] sm:$0xff] }
 0x36d   :  { %v847_v58 = vmul.f32 %v2616_v59, %v845_v54  ;;  %vm833_vm7 = vmor %vm831_vm6, %vm832_vm5  ;;  %vm852_vm11 = vweird.f32 %v2616_v59  ;;  %v1212_v54 = vld [vmem:[%s4132_s5 + $0x10] sm:$0xff] }
 0x36e   :  { %v828_v22 = vsub.f32 1.0, %v827_v61  ;;  %vm853_vm13 = vmor %vm851_vm12, %vm852_vm11 }
 0x36f   :  { %v848_v56 = vsub.f32 1.0, %v847_v58 }
 0x370   :  { %v829_v52 = vmul.f32 %v2614_v3, %v828_v22 }
 0x371   :  { %v849_v44 = vmul.f32 %v2616_v59, %v848_v56 }
 0x372   :  { %v830_v48 = vadd.f32 %v2614_v3, %v829_v52 }
 0x373   :  { %v850_v20 = vadd.f32 %v2616_v59, %v849_v44 }
 0x374   :  { %v834_v10 = vsel %vm833_vm7, %v2614_v3, %v830_v48 }
 0x375   :  { %v839_v11 = vsel %vm836_vm8, %v838_v6, %v834_v10  ;;  %v854_v51 = vsel %vm853_vm13, %v2616_v59, %v850_v20  ;;  %v1211_v59 = vld [vmem:[%s4132_s5 + $0x8] sm:$0xff]  ;;  %v277_v20 = vrot.slane %v3370_v37, 4 }
 0x376   :  { %v861_v40 = vmul.f32 %v839_v11, %v819_v9  ;;  %v859_v2 = vsel %vm856_vm14, %v858_v0, %v854_v51 }
 0x378   :  { %v862_v45 = vadd.f32 %v861_v40, %v3370_v37 }
 0x37a   :  { %2617 = vtanh.f32 %v862_v45 }
 0x380   :  { %v2618_v21 = vpop.eup %2617 }
 0x381   :  { %v864_v1 = vsub.f32 %v3307_v19, %v2618_v21  ;;  %v2740_v19 = vld [vmem:[%s4127_s2 + $0x98] sm:$0xff] }
 0x383   :  { %v865_v30 = vmul.f32 %v864_v1, %v859_v2 }
 0x385   :  { %v3374_v25 = vadd.f32 %v2618_v21, %v865_v30 }
 0x387   :  { %868 = vst.msk [vmem:[#allocation2 + $0x10] sm:$0xf] %vm423_vm9, %v3374_v25  ;;  %2458 = vmatmul.msk.f32.vlgmr.msrb.gmra.mxu1 %vm310_vm10, %v3374_v25  ;;  %2459 = vmatmul.msk.f32.vlgmr.msra.gmra.mxu2 %vm310_vm10, %v3374_v25 }
 0x388   :  { %2460 = vmatmul.msk.f32.vlgmr.msrb.gmra.mxu3 %vm310_vm10, %v3374_v25  ;;  %1142 = vmatpush.msrb.mxu1 %v2736_v5 }
 0x389   :  { %1265 = vmatpush.msra.mxu2 %v1217_v39  ;;  %v2483_v39 = vld [vmem:[%s4132_s5 + $0x70] sm:$0xff] }
 0x38a   :  { %1143 = vmatpush.msrb.mxu1 %v2737_v8 }
 0x38b   :  { %1266 = vmatpush.msra.mxu2 %v1216_v41  ;;  %v2496_v41 = vld [vmem:[%s4132_s5 + $0xb0] sm:$0xff] }
 0x38c   :  { %1144 = vmatpush.msrb.mxu1 %v2738_v13 }
 0x38d   :  { %1267 = vmatpush.msra.mxu2 %v1215_v62  ;;  %v3512_v62 = vld [vmem:[%s4134_s6 + $0x10] sm:$0xff] }
 0x38e   :  { %v3393_v46 = vld [vmem:[#allocation2 + $0x10] sm:$0xf]  ;;  %1145 = vmatpush.msrb.mxu1 %v2739_v47 }
 0x38f   :  { %1238 = vst [vmem:[#allocation1 + $0x20] ss:$2 sm:$0xff] %v3393_v46  ;;  %1268 = vmatpush.msra.mxu2 %v1214_v33  ;;  %v2495_v33 = vld [vmem:[%s4132_s5 + $0xa8] sm:$0xff] }
 0x390   :  { %1146 = vmatpush.msrb.mxu1 %v2740_v19 }
 0x391   :  { %1269 = vmatpush.msra.mxu2 %v1213_v55 }
 0x392   :  { %1147 = vmatpush.msrb.mxu1 %v2741_v7  ;;  %v2744_v7 = vld [vmem:[%s4130_s3 + $0x1] ss:$0 sm:$0xff] }
 0x393   :  { %1270 = vmatpush.msra.mxu2 %v1212_v54  ;;  %v3523_v54 = vld [vmem:[%s4134_s6 + $0x8] sm:$0xff] }
 0x394   :  { %1148 = vmatpush.msrb.mxu1 %v2742_v53 }
 0x395   :  { %1271 = vmatpush.msra.mxu2 %v1211_v59  ;;  %v2481_v59 = vld [vmem:[%s4132_s5 + $0x60] sm:$0xff] }
 0x396   :  { %1149 = vmatpush.msrb.mxu1 %v2743_v12 }
 0x397   :  { %1272 = vmatpush.msra.mxu2 %v1210_v60  ;;  %v2480_v60 = vld [vmem:[%s4132_s5 + $0x58] sm:$0xff] }
 0x404   :  { %v889_v15 = vpop.f32.mrf.mxu1 }
 0x405   :  { %v932_v18 = vadd.f32 %v889_v15, %v125_v26  ;;  %v3470_v15 = vld [vmem:[%s4134_s6 + $0x38] sm:$0xff] }
 0x407   :  { %v2461_v24 = vmul.f32 -1.442695, %v932_v18 }
 0x409   :  { %2619 = vpow2.f32 %v2461_v24  ;;  %v3482_v24 = vld [vmem:[%s4134_s6 + $0x28] sm:$0xff] }
 0x40a   :  { %v909_v35 = vpop.f32.mrf.mxu2 }
 0x40b   :  { %v952_v36 = vadd.f32 %v909_v35, %v201_v28  ;;  %v929_v6 = vpop.f32.mrf.mxu3  ;;  %v3488_v28 = vld [vmem:[%s4134_s6 + $0x20] sm:$0xff]  ;;  %v2484_v35 = vld [vmem:[%s4132_s5 + $0x78] sm:$0xff] }
 0x40c   :  { %v930_v40 = vadd.f32 %v3146_v17, %v929_v6  ;;  %1347 = vmatpush.msrb.mxu3 %v2484_v35  ;;  %v2491_v6 = vld [vmem:[%s4132_s5 + $0x88] sm:$0xff] }
 0x40d   :  { %v2462_v38 = vmul.f32 -1.442695, %v952_v36  ;;  %v2497_v36 = vld [vmem:[%s4132_s5 + $0xb8] sm:$0xff] }
 0x40e   :  { %1348 = vmatpush.msrb.mxu3 %v2483_v39  ;;  %v3589_v39 = vld [vmem:[%s4134_s6 + $0x78] sm:$0xff] }
 0x40f   :  { %v2620_v23 = vpop.eup %2619  ;;  %2621 = vpow2.f32 %v2462_v38  ;;  %v3500_v38 = vld [vmem:[%s4134_s6 + $0x18] sm:$0xff] }
 0x410   :  { %v936_v42 = vadd.f32 1.0, %v2620_v23 }
 0x412   :  { %2623 = vrcp.f32 %v936_v42  ;;  %v948_v52 = vand.u32 2147483648, %v936_v42  ;;  %v946_v63 = vand.u32 2147483647, %v936_v42  ;;  %vm942_vm0 = vweird.f32 %v936_v42 }
 0x414   :  { %v949_v10 = vor.u32 1.1754944e-38, %v948_v52  ;;  %vm947_vm2 = vcmp.eq.f32.partialorder %v946_v63, 8.507059e+37  ;;  %v2479_v52 = vld [vmem:[%s4132_s5 + $0x50] sm:$0xff] }
 0x415   :  { %v2622_v43 = vpop.eup %2621 }
 0x416   :  { %v956_v3 = vadd.f32 1.0, %v2622_v43 }
 0x418   :  { %v2624_v61 = vpop.eup %2623  ;;  %2625 = vrcp.f32 %v956_v3  ;;  %v968_v0 = vand.u32 2147483648, %v956_v3  ;;  %vm962_vm4 = vweird.f32 %v956_v3  ;;  %v966_v1 = vand.u32 2147483647, %v956_v3 }
 0x419   :  { %v938_v22 = vmul.f32 %v2624_v61, %v936_v42  ;;  %vm943_vm15 = vweird.f32 %v2624_v61  ;;  %v2482_v42 = vld [vmem:[%s4132_s5 + $0x68] sm:$0xff] }
 0x41a   :  { %vm944_vm1 = vmor %vm942_vm0, %vm943_vm15  ;;  %v969_v5 = vor.u32 1.1754944e-38, %v968_v0  ;;  %vm967_vm6 = vcmp.eq.f32.partialorder %v966_v1, 8.507059e+37  ;;  %1349 = vmatpush.msrb.mxu3 %v2482_v42  ;;  %v3570_v1 = vld [vmem:[%s4131_s4] ss:$0 sm:$0xff]  ;;  %v3626_v42 = vld [vmem:[%s4134_s6 + $0x58] sm:$0xff] }
 0x41b   :  { %v939_v58 = vsub.f32 1.0, %v938_v22  ;;  %v3539_v22 = vld [vmem:[%s4134_s6] sm:$0xff] }
 0x41c   :  { %1350 = vmatpush.msrb.mxu3 %v2481_v59  ;;  %v1410_v59 = vld.sshfl [vmem:[#allocation1 + $0x10] sm:$0xff pattern:$0x75316420] }
 0x41d   :  { %v940_v4 = vmul.f32 %v2624_v61, %v939_v58  ;;  %v2493_v58 = vld [vmem:[%s4132_s5 + $0x98] sm:$0xff] }
 0x41e   :  { %v2626_v48 = vpop.eup %2625  ;;  %1351 = vmatpush.msrb.mxu3 %v2480_v60 }
 0x41f   :  { %v958_v56 = vmul.f32 %v2626_v48, %v956_v3  ;;  %v941_v9 = vadd.f32 %v2624_v61, %v940_v4  ;;  %vm963_vm3 = vweird.f32 %v2626_v48  ;;  %v2492_v4 = vld [vmem:[%s4132_s5 + $0x90] sm:$0xff] }
 0x420   :  { %vm964_vm5 = vmor %vm962_vm4, %vm963_vm3  ;;  %1352 = vmatpush.msrb.mxu3 %v2479_v52 }
 0x421   :  { %v959_v11 = vsub.f32 1.0, %v958_v56  ;;  %v945_v44 = vsel %vm944_vm1, %v2624_v61, %v941_v9  ;;  %v2494_v61 = vld [vmem:[%s4132_s5 + $0xa0] sm:$0xff] }
 0x422   :  { %v950_v45 = vsel %vm947_vm2, %v949_v10, %v945_v44  ;;  %v2477_v10 = vld [vmem:[%s4132_s5 + $0x40] sm:$0xff] }
 0x423   :  { %v972_v16 = vmul.f32 %v950_v45, %v930_v40  ;;  %v960_v50 = vmul.f32 %v2626_v48, %v959_v11  ;;  %v2490_v11 = vld [vmem:[%s4132_s5 + $0x80] sm:$0xff] }
 0x425   :  { %v973_v51 = vadd.f32 %v972_v16, %v277_v20  ;;  %v961_v21 = vadd.f32 %v2626_v48, %v960_v50 }
 0x427   :  { %2627 = vtanh.f32 %v973_v51  ;;  %v965_v2 = vsel %vm964_vm5, %v2626_v48, %v961_v21  ;;  %v2478_v48 = vld [vmem:[%s4132_s5 + $0x48] sm:$0xff] }
 0x428   :  { %v970_v8 = vsel %vm967_vm6, %v969_v5, %v965_v2  ;;  %1353 = vmatpush.msrb.mxu3 %v2478_v48 }
 0x42a   :  { %1354 = vmatpush.msrb.mxu3 %v2477_v10 }
 0x42d   :  { %v2628_v30 = vpop.eup %2627 }
 0x42e   :  { %v975_v17 = vsub.f32 %v3374_v25, %v2628_v30 }
 0x430   :  { %v976_v13 = vmul.f32 %v975_v17, %v970_v8  ;;  %v2746_v17 = vld [vmem:[%s4130_s3 + $0x2] ss:$0 sm:$0xff] }
 0x431   :  { %v3577_v8 = vadd.f32 %v2746_v17, %v3205_v34 }
 0x432   :  { %v3440_v47 = vadd.f32 %v2628_v30, %v976_v13 }
 0x434   :  { %979 = vst.msk [vmem:[#allocation2 + $0x14] sm:$0xf] %vm423_vm9, %v3440_v47  ;;  %2463 = vmatmul.msk.f32.vlgmr.msrb.gmra.mxu0 %vm310_vm10, %v3440_v47  ;;  %2464 = vmatmul.msk.f32.vlgmr.msra.gmra.mxu1 %vm310_vm10, %v3440_v47 }
 0x435   :  { %2465 = vmatmul.msk.f32.vlgmr.msrb.gmra.mxu2 %vm310_vm10, %v3440_v47  ;;  %1497 = vmatpush.msra.mxu1 %v3470_v15 }
 0x436   :  { %1429 = vmatpush.msrb.mxu0 %v2497_v36 }
 0x438   :  { %1430 = vmatpush.msrb.mxu0 %v2496_v41  ;;  %v3610_v41 = vld [vmem:[%s4134_s6 + $0x68] sm:$0xff] }
 0x43a   :  { %1431 = vmatpush.msrb.mxu0 %v2495_v33 }
 0x43b   :  { %v1207_v37 = vld [vmem:[#allocation2 + $0x14] sm:$0xf] }
 0x43c   :  { %1240 = vst [vmem:[#allocation1 + $0x21] ss:$2 sm:$0xff] %v1207_v37  ;;  %1432 = vmatpush.msrb.mxu0 %v2494_v61 }
 0x43d   :  { %2473 = vmatmul.msk.f32.vlgmr.msra.gmra.mxu2 %vm310_vm10, %v3244_v14  ;;  %v3463_v14 = vadd.f32 %v2744_v7, %v3203_v27  ;;  %v3476_v27 = vld [vmem:[%s4134_s6 + $0x30] sm:$0xff] }
 0x43e   :  { %1498 = vmatpush.msra.mxu1 %v3476_v27  ;;  %1433 = vmatpush.msrb.mxu0 %v2493_v58 }
 0x43f   :  { %v202_v61 = vrot.slane %v3463_v14, 4 }
 0x440   :  { %1499 = vmatpush.msra.mxu1 %v3482_v24  ;;  %1434 = vmatpush.msrb.mxu0 %v2492_v4 }
 0x442   :  { %1500 = vmatpush.msra.mxu1 %v3488_v28  ;;  %1435 = vmatpush.msrb.mxu0 %v2491_v6 }
 0x443   :  { %v1247_v25 = vld.sshfl [vmem:[#allocation1 + $0x20] sm:$0xff pattern:$0x75316420] }
 0x444   :  { %1320 = vst [vmem:[#allocation1 + $0x20] ss:$2 sm:$0xff] %v3393_v46  ;;  %1501 = vmatpush.msra.mxu1 %v3500_v38  ;;  %1436 = vmatpush.msrb.mxu0 %v2490_v11  ;;  %v3700_v11 = vld [vmem:[%s4134_s6 + $0xa8] sm:$0xff] }
 0x445   :  { %2474 = vmatmul.msk.f32.gmra.mxu2 %vm310_vm10, %v3353_v29  ;;  %1322 = vst [vmem:[#allocation1 + $0x21] ss:$2 sm:$0xff] %v1207_v37 }
 0x446   :  { %1502 = vmatpush.msra.mxu1 %v3512_v62 }
 0x448   :  { %1503 = vmatpush.msra.mxu1 %v3523_v54 }
 0x44a   :  { %1504 = vmatpush.msra.mxu1 %v3539_v22 }
 0x44c   :  { %v3455_v19 = vld.sshfl [vmem:[#allocation1 + $0x20] sm:$0xff pattern:$0x75316420] }
 0x44d   :  { %2475 = vmatmul.msk.f32.gmra.mxu2 %vm310_vm10, %v1247_v25  ;;  %1402 = vst [vmem:[#allocation1 + $0x20] ss:$2 sm:$0xff] %v3393_v46 }
 0x44e   :  { %1404 = vst [vmem:[#allocation1 + $0x21] ss:$2 sm:$0xff] %v1207_v37 }
 0x4b1   :  { %v1000_v53 = vpop.f32.mrf.mxu0  ;;  %v1020_v12 = vpop.f32.mrf.mxu1 }
 0x4b2   :  { %v1043_v26 = vadd.f32 %v1000_v53, %v3116_v49  ;;  %v1063_v29 = vadd.f32 %v1020_v12, %v3463_v14  ;;  %v3688_v14 = vld [vmem:[%s4134_s6 + $0xb8] sm:$0xff] }
 0x4b3   :  { %1540 = vmatpush.msrb.mxu2 %v3688_v14 }
 0x4b4   :  { %v2466_v46 = vmul.f32 -1.442695, %v1043_v26  ;;  %v2467_v18 = vmul.f32 -1.442695, %v1063_v29 }
 0x4b6   :  { %2629 = vpow2.f32 %v2466_v46 }
 0x4b7   :  { %2631 = vpow2.f32 %v2467_v18 }
 0x4b8   :  { %v1040_v50 = vpop.f32.mrf.mxu2 }
 0x4b9   :  { %v1041_v2 = vadd.f32 %v3570_v1, %v1040_v50 }
 0x4bc   :  { %v2630_v23 = vpop.eup %2629 }
 0x4bd   :  { %v2632_v43 = vpop.eup %2631  ;;  %v1047_v55 = vadd.f32 1.0, %v2630_v23  ;;  %v3618_v23 = vld [vmem:[%s4134_s6 + $0x60] sm:$0xff] }
 0x4be   :  { %v3525_v3 = vadd.f32 1.0, %v2632_v43  ;;  %v1409_v43 = vld.sshfl [vmem:[#allocation1] sm:$0xff pattern:$0x75316420] }
 0x4bf   :  { %2633 = vrcp.f32 %v1047_v55  ;;  %v1059_v45 = vand.u32 2147483648, %v1047_v55  ;;  %v1057_v16 = vand.u32 2147483647, %v1047_v55  ;;  %vm1053_vm8 = vweird.f32 %v1047_v55 }
 0x4c0   :  { %2635 = vrcp.f32 %v3525_v3  ;;  %v1079_v53 = vand.u32 2147483648, %v3525_v3  ;;  %vm1073_vm14 = vweird.f32 %v3525_v3  ;;  %v1077_v12 = vand.u32 2147483647, %v3525_v3 }
 0x4c1   :  { %v1060_v0 = vor.u32 1.1754944e-38, %v1059_v45  ;;  %vm1058_vm12 = vcmp.eq.f32.partialorder %v1057_v16, 8.507059e+37  ;;  %v3718_v16 = vld [vmem:[%s4134_s6 + $0x98] sm:$0xff] }
 0x4c2   :  { %v1080_v46 = vor.u32 1.1754944e-38, %v1079_v53  ;;  %vm1078_vm0 = vcmp.eq.f32.partialorder %v1077_v12, 8.507059e+37  ;;  %v278_v12 = vrot.slane %v3577_v8, 4 }
 0x4c5   :  { %v2634_v63 = vpop.eup %2633 }
 0x4c6   :  { %v2636_v56 = vpop.eup %2635  ;;  %v1049_v9 = vmul.f32 %v2634_v63, %v1047_v55  ;;  %vm1054_vm7 = vweird.f32 %v2634_v63  ;;  %v3640_v55 = vld [vmem:[%s4134_s6 + $0x50] sm:$0xff] }
 0x4c7   :  { %v1069_v44 = vmul.f32 %v2636_v56, %v3525_v3  ;;  %vm1055_vm11 = vmor %vm1053_vm8, %vm1054_vm7  ;;  %vm1074_vm13 = vweird.f32 %v2636_v56  ;;  %v3655_v3 = vld [vmem:[%s4134_s6 + $0x40] sm:$0xff] }
 0x4c8   :  { %v1050_v40 = vsub.f32 1.0, %v1049_v9  ;;  %vm1075_vm15 = vmor %vm1073_vm14, %vm1074_vm13 }
 0x4c9   :  { %v1070_v21 = vsub.f32 1.0, %v1069_v44  ;;  %v3708_v44 = vld [vmem:[%s4134_s6 + $0xa0] sm:$0xff] }
 0x4ca   :  { %v1051_v20 = vmul.f32 %v2634_v63, %v1050_v40 }
 0x4cb   :  { %v1071_v37 = vmul.f32 %v2636_v56, %v1070_v21 }
 0x4cc   :  { %v1052_v51 = vadd.f32 %v2634_v63, %v1051_v20 }
 0x4cd   :  { %v1072_v7 = vadd.f32 %v2636_v56, %v1071_v37 }
 0x4ce   :  { %v1056_v30 = vsel %vm1055_vm11, %v2634_v63, %v1052_v51 }
 0x4cf   :  { %v1061_v5 = vsel %vm1058_vm12, %v1060_v0, %v1056_v30  ;;  %v1076_v26 = vsel %vm1075_vm15, %v2636_v56, %v1072_v7  ;;  %v3728_v0 = vld [vmem:[%s4134_s6 + $0x90] sm:$0xff] }
 0x4d0   :  { %v1083_v13 = vmul.f32 %v1061_v5, %v1041_v2  ;;  %v1081_v18 = vsel %vm1078_vm0, %v1080_v46, %v1076_v26 }
 0x4d2   :  { %v1084_v25 = vadd.f32 %v1083_v13, %v3577_v8 }
 0x4d4   :  { %2637 = vtanh.f32 %v1084_v25 }
 0x4da   :  { %v2638_v29 = vpop.eup %2637 }
 0x4db   :  { %v1086_v34 = vsub.f32 %v3440_v47, %v2638_v29  ;;  %v3602_v47 = vld [vmem:[%s4134_s6 + $0x70] sm:$0xff] }
 0x4dd   :  { %v1087_v35 = vmul.f32 %v1086_v34, %v1081_v18  ;;  %v3743_v34 = vld [vmem:[%s4134_s6 + $0x88] sm:$0xff]  ;;  %v3748_v18 = vld [vmem:[%s4134_s6 + $0x80] sm:$0xff] }
 0x4df   :  { %v3584_v36 = vadd.f32 %v2638_v29, %v1087_v35 }
 0x4e1   :  { %1090 = vst.msk [vmem:[#allocation2 + $0x18] sm:$0xf] %vm423_vm9, %v3584_v36  ;;  %2468 = vmatmul.msk.f32.vlgmr.msra.gmra.mxu3 %vm310_vm10, %v3584_v36  ;;  %2469 = vmatmul.msk.f32.vlgmr.msra.gmra.mxu0 %vm310_vm10, %v3584_v36 }
 0x4e2   :  { %2470 = vmatmul.msk.f32.vlgmr.msrb.gmra.mxu1 %vm310_vm10, %v3584_v36  ;;  %1609 = vmatpush.msra.mxu3 %v3470_v15 }
 0x4e3   :  { %1517 = vmatpush.msrb.mxu1 %v3589_v39  ;;  %1629 = vmatpush.msra.mxu0 %v3589_v39 }
 0x4e4   :  { %1610 = vmatpush.msra.mxu3 %v3476_v27 }
 0x4e5   :  { %1518 = vmatpush.msrb.mxu1 %v3602_v47  ;;  %1630 = vmatpush.msra.mxu0 %v3602_v47 }
 0x4e6   :  { %1611 = vmatpush.msra.mxu3 %v3482_v24 }
 0x4e7   :  { %1519 = vmatpush.msrb.mxu1 %v3610_v41  ;;  %1631 = vmatpush.msra.mxu0 %v3610_v41 }
 0x4e8   :  { %v3628_v33 = vld [vmem:[#allocation2 + $0x18] sm:$0xf]  ;;  %1612 = vmatpush.msra.mxu3 %v3488_v28 }
 0x4e9   :  { %1520 = vmatpush.msrb.mxu1 %v3618_v23  ;;  %2486 = vmatmul.msk.f32.vlgmr.msrb.gmra.mxu3 %vm310_vm10, %v3249_v57  ;;  %1242 = vst [vmem:[#allocation1 + $0x30] ss:$2 sm:$0xff] %v3628_v33  ;;  %v3647_v57 = vld [vmem:[%s4134_s6 + $0x48] sm:$0xff] }
 0x4ea   :  { %2499 = vmatmul.msk.f32.vlgmr.msrb.gmra.mxu0 %vm310_vm10, %v1409_v43  ;;  %1505 = vmatmul.f32.vlgmr.msra.gmra.mxu1 %v2756_v32 }
 0x4eb   :  { %1521 = vmatpush.msrb.mxu1 %v3626_v42  ;;  %1613 = vmatpush.msra.mxu3 %v3500_v38 }
 0x4ec   :  { %1632 = vmatpush.msra.mxu0 %v3618_v23 }
 0x4ed   :  { %1522 = vmatpush.msrb.mxu1 %v3640_v55  ;;  %1614 = vmatpush.msra.mxu3 %v3512_v62 }
 0x4ee   :  { %1633 = vmatpush.msra.mxu0 %v3626_v42 }
 0x4ef   :  { %1523 = vmatpush.msrb.mxu1 %v3647_v57  ;;  %1615 = vmatpush.msra.mxu3 %v3523_v54 }
 0x4f0   :  { %1634 = vmatpush.msra.mxu0 %v3640_v55 }
 0x4f1   :  { %1524 = vmatpush.msrb.mxu1 %v3655_v3  ;;  %2487 = vmatmul.msk.f32.gmra.mxu3 %vm310_vm10, %v3358_v31  ;;  %v1411_v31 = vld.sshfl [vmem:[#allocation1 + $0x20] sm:$0xff pattern:$0x75316420] }
 0x4f2   :  { %2500 = vmatmul.msk.f32.gmra.mxu0 %vm310_vm10, %v1410_v59  ;;  %1525 = vmatmul.f32.vlgmr.msrb.gmra.mxu1 %v2756_v32 }
 0x4f3   :  { %1616 = vmatpush.msra.mxu3 %v3539_v22  ;;  %1635 = vmatpush.msra.mxu0 %v3647_v57 }
 0x4f4   :  { %1649 = vmatpush.msra.mxu1 %v3688_v14 }
 0x4f5   :  { %1738 = vmatpush.msrb.mxu3 %v3589_v39  ;;  %1636 = vmatpush.msra.mxu0 %v3655_v3 }
 0x4f7   :  { %1739 = vmatpush.msrb.mxu3 %v3602_v47  ;;  %1758 = vmatpush.msrb.mxu0 %v3688_v14 }
 0x4f9   :  { %1740 = vmatpush.msrb.mxu3 %v3610_v41 }
 0x4fa   :  { %2488 = vmatmul.msk.f32.gmra.mxu3 %vm310_vm10, %v3455_v19  ;;  %2501 = vmatmul.msk.f32.gmra.mxu0 %vm310_vm10, %v1411_v31  ;;  %v126_v19 = vrot.slane %v3116_v49, 4  ;;  %v3693_v49 = vld [vmem:[%s4134_s6 + $0xb0] sm:$0xff] }
 0x4fb   :  { %1741 = vmatpush.msrb.mxu3 %v3618_v23  ;;  %1541 = vmatpush.msrb.mxu2 %v3693_v49 }
 0x4fc   :  { %1650 = vmatpush.msra.mxu1 %v3693_v49  ;;  %1759 = vmatpush.msrb.mxu0 %v3693_v49 }
 0x4fd   :  { %1742 = vmatpush.msrb.mxu3 %v3626_v42  ;;  %1542 = vmatpush.msrb.mxu2 %v3700_v11 }
 0x4fe   :  { %1651 = vmatpush.msra.mxu1 %v3700_v11  ;;  %1760 = vmatpush.msrb.mxu0 %v3700_v11 }
 0x4ff   :  { %1743 = vmatpush.msrb.mxu3 %v3640_v55  ;;  %1543 = vmatpush.msrb.mxu2 %v3708_v44 }
 0x500   :  { %1652 = vmatpush.msra.mxu1 %v3708_v44  ;;  %1761 = vmatpush.msrb.mxu0 %v3708_v44 }
 0x501   :  { %1744 = vmatpush.msrb.mxu3 %v3647_v57  ;;  %1544 = vmatpush.msrb.mxu2 %v3718_v16 }
 0x502   :  { %1653 = vmatpush.msra.mxu1 %v3718_v16  ;;  %1762 = vmatpush.msrb.mxu0 %v3718_v16 }
 0x503   :  { %1745 = vmatpush.msrb.mxu3 %v3655_v3  ;;  %1545 = vmatpush.msrb.mxu2 %v3728_v0 }
 0x504   :  { %1654 = vmatpush.msra.mxu1 %v3728_v0  ;;  %1763 = vmatpush.msrb.mxu0 %v3728_v0 }
 0x505   :  { %1546 = vmatpush.msrb.mxu2 %v3743_v34 }
 0x506   :  { %1655 = vmatpush.msra.mxu1 %v3743_v34  ;;  %1764 = vmatpush.msrb.mxu0 %v3743_v34 }
 0x507   :  { %1547 = vmatpush.msrb.mxu2 %v3748_v18 }
 0x508   :  { %1656 = vmatpush.msra.mxu1 %v3748_v18  ;;  %1765 = vmatpush.msrb.mxu0 %v3748_v18 }
 0x509   :  { %1718 = vmatpush.msra.mxu2 %v3470_v15 }
 0x50a   :  { %1827 = vmatpush.msrb.mxu1 %v3470_v15 }
 0x50b   :  { %1719 = vmatpush.msra.mxu2 %v3476_v27 }
 0x50c   :  { %1828 = vmatpush.msrb.mxu1 %v3476_v27 }
 0x50d   :  { %1720 = vmatpush.msra.mxu2 %v3482_v24 }
 0x50e   :  { %1829 = vmatpush.msrb.mxu1 %v3482_v24 }
 0x50f   :  { %1721 = vmatpush.msra.mxu2 %v3488_v28 }
 0x510   :  { %1830 = vmatpush.msrb.mxu1 %v3488_v28 }
 0x511   :  { %1722 = vmatpush.msra.mxu2 %v3500_v38 }
 0x512   :  { %1831 = vmatpush.msrb.mxu1 %v3500_v38 }
 0x513   :  { %1723 = vmatpush.msra.mxu2 %v3512_v62 }
 0x514   :  { %1832 = vmatpush.msrb.mxu1 %v3512_v62 }
 0x515   :  { %1724 = vmatpush.msra.mxu2 %v3523_v54 }
 0x516   :  { %1833 = vmatpush.msrb.mxu1 %v3523_v54 }
 0x517   :  { %1725 = vmatpush.msra.mxu2 %v3539_v22 }
 0x518   :  { %1834 = vmatpush.msrb.mxu1 %v3539_v22 }
 0x55e   :  { %v1131_v60 = vpop.f32.mrf.mxu0 }
 0x55f   :  { %v1174_v58 = vadd.f32 %v1131_v60, %v202_v61  ;;  %v1151_v5 = vpop.f32.mrf.mxu1 }
 0x560   :  { %v1152_v25 = vadd.f32 %v3570_v1, %v1151_v5 }
 0x561   :  { %v2472_v52 = vmul.f32 -1.442695, %v1174_v58 }
 0x563   :  { %2639 = vpow2.f32 %v2472_v52 }
 0x564   :  { %v1111_v4 = vpop.f32.mrf.mxu3 }
 0x565   :  { %v1154_v63 = vadd.f32 %v1111_v4, %v126_v19 }
 0x567   :  { %v2471_v48 = vmul.f32 -1.442695, %v1154_v63 }
 0x569   :  { %2641 = vpow2.f32 %v2471_v48  ;;  %v2640_v6 = vpop.eup %2639  ;;  %v1506_v48 = vpop.f32.mrf.mxu1 }
 0x56a   :  { %v3682_v9 = vadd.f32 1.0, %v2640_v6 }
 0x56c   :  { %v1190_v8 = vand.u32 2147483648, %v3682_v9  ;;  %vm1184_vm6 = vweird.f32 %v3682_v9  ;;  %v1188_v35 = vand.u32 2147483647, %v3682_v9 }
 0x56e   :  { %v1191_v31 = vor.u32 1.1754944e-38, %v1190_v8  ;;  %vm1189_vm8 = vcmp.eq.f32.partialorder %v1188_v35, 8.507059e+37  ;;  %v3821_v8 = vld [vmem:[%s4135_s8] ss:$0 sm:$0xff] }
 0x56f   :  { %v2642_v56 = vpop.eup %2641 }
 0x570   :  { %v1158_v10 = vadd.f32 1.0, %v2642_v56 }
 0x572   :  { %2643 = vrcp.f32 %v1158_v10  ;;  %v1170_v21 = vand.u32 2147483648, %v1158_v10  ;;  %v1168_v30 = vand.u32 2147483647, %v1158_v10  ;;  %vm1164_vm2 = vweird.f32 %v1158_v10 }
 0x573   :  { %2645 = vrcp.f32 %v3682_v9 }
 0x574   :  { %v1171_v37 = vor.u32 1.1754944e-38, %v1170_v21  ;;  %vm1169_vm4 = vcmp.eq.f32.partialorder %v1168_v30, 8.507059e+37 }
 0x578   :  { %v2644_v40 = vpop.eup %2643 }
 0x579   :  { %v3711_v45 = vpop.eup %2645  ;;  %v1160_v20 = vmul.f32 %v2644_v40, %v1158_v10  ;;  %vm1165_vm1 = vweird.f32 %v2644_v40  ;;  %v3806_v10 = vld [vmem:[%s4133_s7 + $0x1] ss:$0 sm:$0xff] }
 0x57a   :  { %v1180_v51 = vmul.f32 %v3711_v45, %v3682_v9  ;;  %vm1166_vm3 = vmor %vm1164_vm2, %vm1165_vm1  ;;  %vm1185_vm5 = vweird.f32 %v3711_v45 }
 0x57b   :  { %v1161_v50 = vsub.f32 1.0, %v1160_v20  ;;  %vm1186_vm7 = vmor %vm1184_vm6, %vm1185_vm5  ;;  %v1526_v20 = vpop.f32.mrf.mxu1 }
 0x57c   :  { %v1181_v13 = vsub.f32 1.0, %v1180_v51 }
 0x57d   :  { %v1162_v2 = vmul.f32 %v2644_v40, %v1161_v50 }
 0x57e   :  { %v1182_v29 = vmul.f32 %v3711_v45, %v1181_v13 }
 0x57f   :  { %v1163_v17 = vadd.f32 %v2644_v40, %v1162_v2 }
 0x580   :  { %v1183_v1 = vadd.f32 %v3711_v45, %v1182_v29 }
 0x581   :  { %v1167_v7 = vsel %vm1166_vm3, %v2644_v40, %v1163_v17  ;;  %v1356_v40 = vpop.f32.mrf.mxu3 }
 0x582   :  { %v1172_v53 = vsel %vm1169_vm4, %v1171_v37, %v1167_v7  ;;  %v1187_v43 = vsel %vm1186_vm7, %v3711_v45, %v1183_v1  ;;  %v3809_v45 = vadd.f32 %v3806_v10, %v1356_v40 }
 0x583   :  { %v1194_v26 = vmul.f32 %v1172_v53, %v1152_v25  ;;  %v1192_v60 = vsel %vm1189_vm8, %v1191_v31, %v1187_v43  ;;  %v3826_v43 = vld [vmem:[%s4133_s7 + $0x2] ss:$0 sm:$0xff]  ;;  %v1438_v31 = vpop.f32.mrf.mxu0 }
 0x584   :  { %v1572_v50 = vadd.f32 %v1526_v20, %v3809_v45 }
 0x585   :  { %v1195_v46 = vadd.f32 %v1194_v26, %v278_v12 }
 0x586   :  { %v2520_v21 = vmul.f32 -1.442695, %v1572_v50 }
 0x587   :  { %2647 = vtanh.f32 %v1195_v46 }
 0x58d   :  { %v2648_v59 = vpop.eup %2647 }
 0x58e   :  { %v1197_v61 = vsub.f32 %v3584_v36, %v2648_v59 }
 0x590   :  { %v1198_v58 = vmul.f32 %v1197_v61, %v1192_v60 }
 0x592   :  { %v1199_v52 = vadd.f32 %v2648_v59, %v1198_v58 }
 0x594   :  { %1201 = vst.msk [vmem:[#allocation2 + $0x1c] sm:$0xf] %vm423_vm9, %v1199_v52 }
 0x59b   :  { %v1209_v36 = vld [vmem:[#allocation2 + $0x1c] sm:$0xf] }
 0x59c   :  { %1244 = vst [vmem:[#allocation1 + $0x31] ss:$2 sm:$0xff] %v1209_v36 }
 0x5a3   :  { %v1248_v19 = vld.sshfl [vmem:[#allocation1 + $0x30] sm:$0xff pattern:$0x75316420] }
 0x5a4   :  { %2476 = vmatmul.msk.f32.gmra.mxu2 %vm310_vm10, %v1248_v19  ;;  %1324 = vst [vmem:[#allocation1 + $0x30] ss:$2 sm:$0xff] %v3628_v33  ;;  %v3830_v19 = vadd.f32 %v3826_v43, %v1438_v31 }
 0x5a5   :  { %1326 = vst [vmem:[#allocation1 + $0x31] ss:$2 sm:$0xff] %v1209_v36 }
 0x5ac   :  { %v1330_v4 = vld.sshfl [vmem:[#allocation1 + $0x30] sm:$0xff pattern:$0x75316420]  ;;  %1548 = vmatmul.f32.vlgmr.msrb.gmra.mxu2 %v2756_v32  ;;  %v3797_v32 = vld [vmem:[%s4133_s7] ss:$0 sm:$0xff] }
 0x5ad   :  { %2489 = vmatmul.msk.f32.gmra.mxu3 %vm310_vm10, %v1330_v4  ;;  %1406 = vst [vmem:[#allocation1 + $0x30] ss:$2 sm:$0xff] %v3628_v33  ;;  %1847 = vmatpush.msrb.mxu2 %v3589_v39  ;;  %v1274_v33 = vpop.f32.mrf.mxu2 }
 0x5ae   :  { %1408 = vst [vmem:[#allocation1 + $0x31] ss:$2 sm:$0xff] %v1209_v36  ;;  %v3800_v6 = vadd.f32 %v3797_v32, %v1274_v33 }
 0x5af   :  { %1848 = vmatpush.msrb.mxu2 %v3602_v47 }
 0x5b0   :  { %v1552_v56 = vadd.f32 %v1506_v48, %v3800_v6 }
 0x5b1   :  { %1849 = vmatpush.msrb.mxu2 %v3610_v41 }
 0x5b2   :  { %v2519_v9 = vmul.f32 -1.442695, %v1552_v56 }
 0x5b3   :  { %1850 = vmatpush.msrb.mxu2 %v3618_v23 }
 0x5b4   :  { %2649 = vpow2.f32 %v2519_v9 }
 0x5b5   :  { %v1412_v63 = vld.sshfl [vmem:[#allocation1 + $0x30] sm:$0xff pattern:$0x75316420]  ;;  %1851 = vmatpush.msrb.mxu2 %v3626_v42  ;;  %2651 = vpow2.f32 %v2520_v21  ;;  %v3812_v30 = vpop.f32.mrf.mxu2 }
 0x5b6   :  { %2502 = vmatmul.msk.f32.gmra.mxu0 %vm310_vm10, %v1412_v63 }
 0x5b7   :  { %1852 = vmatpush.msrb.mxu2 %v3640_v55 }
 0x5b9   :  { %1853 = vmatpush.msrb.mxu2 %v3647_v57 }
 0x5ba   :  { %v2650_v51 = vpop.eup %2649 }
 0x5bb   :  { %1854 = vmatpush.msrb.mxu2 %v3655_v3  ;;  %v1556_v2 = vadd.f32 1.0, %v2650_v51  ;;  %v2652_v5 = vpop.eup %2651 }
 0x5bc   :  { %v1576_v13 = vadd.f32 1.0, %v2652_v5 }
 0x5bd   :  { %2653 = vrcp.f32 %v1556_v2  ;;  %v3814_v25 = vpop.f32.mrf.mxu2  ;;  %v1568_v1 = vand.u32 2147483648, %v1556_v2  ;;  %vm1562_vm11 = vweird.f32 %v1556_v2  ;;  %v1566_v35 = vand.u32 2147483647, %v1556_v2 }
 0x5be   :  { %2655 = vrcp.f32 %v1576_v13  ;;  %v1588_v56 = vand.u32 2147483648, %v1576_v13  ;;  %vm1582_vm15 = vweird.f32 %v1576_v13  ;;  %v1586_v9 = vand.u32 2147483647, %v1576_v13 }
 0x5bf   :  { %v1569_v58 = vor.u32 1.1754944e-38, %v1568_v1  ;;  %vm1567_vm13 = vcmp.eq.f32.partialorder %v1566_v35, 8.507059e+37 }
 0x5c0   :  { %v1589_v50 = vor.u32 1.1754944e-38, %v1588_v56  ;;  %vm1587_vm1 = vcmp.eq.f32.partialorder %v1586_v9, 8.507059e+37 }
 0x5c3   :  { %v2654_v17 = vpop.eup %2653 }
 0x5c4   :  { %v1558_v37 = vmul.f32 %v2654_v17, %v1556_v2  ;;  %v2656_v26 = vpop.eup %2655  ;;  %vm1563_vm9 = vweird.f32 %v2654_v17 }
 0x5c5   :  { %v1578_v46 = vmul.f32 %v2656_v26, %v1576_v13  ;;  %vm1564_vm12 = vmor %vm1562_vm11, %vm1563_vm9  ;;  %vm1583_vm14 = vweird.f32 %v2656_v26  ;;  %v3867_v13 = vpop.f32.mrf.mxu3 }
 0x5c6   :  { %v1559_v7 = vsub.f32 1.0, %v1558_v37  ;;  %vm1584_vm0 = vmor %vm1582_vm15, %vm1583_vm14 }
 0x5c7   :  { %v1579_v61 = vsub.f32 1.0, %v1578_v46 }
 0x5c8   :  { %v1560_v53 = vmul.f32 %v2654_v17, %v1559_v7 }
 0x5c9   :  { %v1580_v63 = vmul.f32 %v2656_v26, %v1579_v61 }
 0x5ca   :  { %v1561_v29 = vadd.f32 %v2654_v17, %v1560_v53 }
 0x5cb   :  { %v1581_v48 = vadd.f32 %v2656_v26, %v1580_v63 }
 0x5cc   :  { %v1565_v59 = vsel %vm1564_vm12, %v2654_v17, %v1561_v29  ;;  %v3865_v17 = vpop.f32.mrf.mxu0  ;;  %v1372_v29 = vrot.slane %v3809_v45, 4 }
 0x5cd   :  { %v1570_v36 = vsel %vm1567_vm13, %v1569_v58, %v1565_v59  ;;  %v1585_v40 = vsel %vm1584_vm0, %v2656_v26, %v1581_v48  ;;  %v3871_v7 = vpop.f32.mrf.mxu3  ;;  %v1290_v59 = vrot.slane %v3800_v6, 4 }
 0x5ce   :  { %v1590_v21 = vsel %vm1587_vm1, %v1589_v50, %v1585_v40 }
 0x5d4   :  { %v3869_v37 = vpop.f32.mrf.mxu0 }
 0x627   :  { %v3816_v12 = vpop.f32.mrf.mxu2 }
 0x62f   :  { %v1549_v60 = vpop.f32.mrf.mxu2 }
 0x630   :  { %v1550_v52 = vadd.f32 %v3821_v8, %v1549_v60  ;;  %v3875_v26 = vpop.f32.mrf.mxu3 }
 0x632   :  { %v1592_v4 = vmul.f32 %v1570_v36, %v1550_v52 }
 0x633   :  { %v3873_v53 = vpop.f32.mrf.mxu0 }
 0x634   :  { %v1593_v33 = vadd.f32 %v1592_v4, %v3830_v19 }
 0x636   :  { %2657 = vtanh.f32 %v1593_v33 }
 0x63c   :  { %v2658_v20 = vpop.eup %2657 }
 0x63d   :  { %v1595_v51 = vsub.f32 0.0, %v2658_v20 }
 0x63f   :  { %v1596_v2 = vmul.f32 %v1595_v51, %v1590_v21 }
 0x641   :  { %v3833_v5 = vadd.f32 %v2658_v20, %v1596_v2 }
 0x643   :  { %2521 = vmatmul.msk.f32.vlgmr.msra.gmra.mxu3 %vm310_vm10, %v3833_v5  ;;  %2522 = vmatmul.msk.f32.vlgmr.msra.gmra.mxu0 %vm310_vm10, %v3833_v5 }
 0x644   :  { %2523 = vmatmul.msk.f32.vlgmr.msra.gmra.mxu1 %vm310_vm10, %v3833_v5  ;;  %1867 = vmatpush.msra.mxu3 %v3688_v14 }
 0x645   :  { %1936 = vmatpush.msra.mxu0 %v3470_v15  ;;  %1956 = vmatpush.msra.mxu1 %v3589_v39 }
 0x646   :  { %1868 = vmatpush.msra.mxu3 %v3693_v49 }
 0x647   :  { %1937 = vmatpush.msra.mxu0 %v3476_v27  ;;  %1957 = vmatpush.msra.mxu1 %v3602_v47 }
 0x648   :  { %1869 = vmatpush.msra.mxu3 %v3700_v11 }
 0x649   :  { %1938 = vmatpush.msra.mxu0 %v3482_v24  ;;  %1958 = vmatpush.msra.mxu1 %v3610_v41 }
 0x64a   :  { %1870 = vmatpush.msra.mxu3 %v3708_v44 }
 0x64b   :  { %1939 = vmatpush.msra.mxu0 %v3488_v28  ;;  %1959 = vmatpush.msra.mxu1 %v3618_v23 }
 0x64c   :  { %1871 = vmatpush.msra.mxu3 %v3718_v16 }
 0x64d   :  { %1940 = vmatpush.msra.mxu0 %v3500_v38  ;;  %1960 = vmatpush.msra.mxu1 %v3626_v42 }
 0x64e   :  { %1872 = vmatpush.msra.mxu3 %v3728_v0 }
 0x64f   :  { %1941 = vmatpush.msra.mxu0 %v3512_v62  ;;  %1961 = vmatpush.msra.mxu1 %v3640_v55 }
 0x650   :  { %1873 = vmatpush.msra.mxu3 %v3743_v34 }
 0x651   :  { %1942 = vmatpush.msra.mxu0 %v3523_v54  ;;  %1962 = vmatpush.msra.mxu1 %v3647_v57 }
 0x652   :  { %1874 = vmatpush.msra.mxu3 %v3748_v18 }
 0x653   :  { %1943 = vmatpush.msra.mxu0 %v3539_v22  ;;  %1963 = vmatpush.msra.mxu1 %v3655_v3 }
 0x6c0   :  { %v1638_v46 = vpop.f32.mrf.mxu0 }
 0x6c1   :  { %v1681_v1 = vadd.f32 %v1638_v46, %v1372_v29  ;;  %v1658_v20 = vpop.f32.mrf.mxu1 }
 0x6c2   :  { %v1659_v2 = vadd.f32 %v3821_v8, %v1658_v20 }
 0x6c3   :  { %v2525_v35 = vmul.f32 -1.442695, %v1681_v1  ;;  %v1454_v1 = vrot.slane %v3830_v19, 4 }
 0x6c5   :  { %2659 = vpow2.f32 %v2525_v35 }
 0x6c6   :  { %v1618_v31 = vpop.f32.mrf.mxu3 }
 0x6c7   :  { %v1661_v61 = vadd.f32 %v1618_v31, %v1290_v59 }
 0x6c9   :  { %v2524_v60 = vmul.f32 -1.442695, %v1661_v61 }
 0x6cb   :  { %2661 = vpow2.f32 %v2524_v60  ;;  %v2660_v58 = vpop.eup %2659 }
 0x6cc   :  { %v1685_v36 = vadd.f32 1.0, %v2660_v58 }
 0x6ce   :  { %v1697_v60 = vand.u32 2147483648, %v1685_v36  ;;  %vm1691_vm7 = vweird.f32 %v1685_v36  ;;  %v1695_v58 = vand.u32 2147483647, %v1685_v36 }
 0x6d0   :  { %vm1696_vm9 = vcmp.eq.f32.partialorder %v1695_v58, 8.507059e+37 }
 0x6d1   :  { %v2662_v52 = vpop.eup %2661 }
 0x6d2   :  { %v1665_v4 = vadd.f32 1.0, %v2662_v52 }
 0x6d4   :  { %2663 = vrcp.f32 %v1665_v4  ;;  %v1677_v9 = vand.u32 2147483648, %v1665_v4  ;;  %v1675_v6 = vand.u32 2147483647, %v1665_v4  ;;  %vm1671_vm3 = vweird.f32 %v1665_v4 }
 0x6d5   :  { %2665 = vrcp.f32 %v1685_v36 }
 0x6d6   :  { %v1678_v21 = vor.u32 1.1754944e-38, %v1677_v9  ;;  %vm1676_vm5 = vcmp.eq.f32.partialorder %v1675_v6, 8.507059e+37 }
 0x6da   :  { %v2664_v63 = vpop.eup %2663 }
 0x6db   :  { %v2666_v33 = vpop.eup %2665  ;;  %v1667_v48 = vmul.f32 %v2664_v63, %v1665_v4  ;;  %vm1672_vm2 = vweird.f32 %v2664_v63 }
 0x6dc   :  { %v1687_v56 = vmul.f32 %v2666_v33, %v1685_v36  ;;  %vm1673_vm4 = vmor %vm1671_vm3, %vm1672_vm2  ;;  %vm1692_vm6 = vweird.f32 %v2666_v33 }
 0x6dd   :  { %v1668_v45 = vsub.f32 1.0, %v1667_v48  ;;  %vm1693_vm8 = vmor %vm1691_vm7, %vm1692_vm6  ;;  %v1698_v48 = vor.u32 1.1754944e-38, %v1697_v60 }
 0x6de   :  { %v1688_v51 = vsub.f32 1.0, %v1687_v56 }
 0x6df   :  { %v1669_v40 = vmul.f32 %v2664_v63, %v1668_v45 }
 0x6e0   :  { %v1689_v59 = vmul.f32 %v2666_v33, %v1688_v51 }
 0x6e1   :  { %v1670_v50 = vadd.f32 %v2664_v63, %v1669_v40 }
 0x6e2   :  { %v1690_v61 = vadd.f32 %v2666_v33, %v1689_v59 }
 0x6e3   :  { %v1674_v29 = vsel %vm1673_vm4, %v2664_v63, %v1670_v50 }
 0x6e4   :  { %v1679_v46 = vsel %vm1676_vm5, %v1678_v21, %v1674_v29  ;;  %v1694_v52 = vsel %vm1693_vm8, %v2666_v33, %v1690_v61 }
 0x6e5   :  { %v1701_v35 = vmul.f32 %v1679_v46, %v1659_v2  ;;  %v1699_v45 = vsel %vm1696_vm9, %v1698_v48, %v1694_v52 }
 0x6e7   :  { %v1702_v31 = vadd.f32 %v1701_v35, %v1454_v1 }
 0x6e9   :  { %2667 = vtanh.f32 %v1702_v31 }
 0x6ef   :  { %v2668_v4 = vpop.eup %2667 }
 0x6f0   :  { %v1704_v63 = vsub.f32 %v3833_v5, %v2668_v4 }
 0x6f2   :  { %v1705_v56 = vmul.f32 %v1704_v63, %v1699_v45 }
 0x6f4   :  { %v3882_v9 = vadd.f32 %v2668_v4, %v1705_v56  ;;  %v3927_v4 = vadd.f32 %v3826_v43, %v3865_v17 }
 0x6f6   :  { %2526 = vmatmul.msk.f32.vlgmr.msra.gmra.mxu2 %vm310_vm10, %v3882_v9  ;;  %2527 = vmatmul.msk.f32.vlgmr.msrb.gmra.mxu3 %vm310_vm10, %v3882_v9 }
 0x6f7   :  { %2528 = vmatmul.msk.f32.vlgmr.msrb.gmra.mxu0 %vm310_vm10, %v3882_v9  ;;  %1976 = vmatpush.msra.mxu2 %v3688_v14 }
 0x6f8   :  { %2045 = vmatpush.msrb.mxu3 %v3470_v15  ;;  %2065 = vmatpush.msrb.mxu0 %v3589_v39  ;;  %v3916_v15 = vadd.f32 %v3797_v32, %v3812_v30 }
 0x6f9   :  { %1977 = vmatpush.msra.mxu2 %v3693_v49 }
 0x6fa   :  { %2046 = vmatpush.msrb.mxu3 %v3476_v27  ;;  %2066 = vmatpush.msrb.mxu0 %v3602_v47  ;;  %v3920_v27 = vadd.f32 %v3806_v10, %v3867_v13 }
 0x6fb   :  { %1978 = vmatpush.msra.mxu2 %v3700_v11 }
 0x6fc   :  { %2047 = vmatpush.msrb.mxu3 %v3482_v24  ;;  %2067 = vmatpush.msrb.mxu0 %v3610_v41 }
 0x6fd   :  { %1979 = vmatpush.msra.mxu2 %v3708_v44 }
 0x6fe   :  { %2048 = vmatpush.msrb.mxu3 %v3488_v28  ;;  %2068 = vmatpush.msrb.mxu0 %v3618_v23 }
 0x6ff   :  { %1980 = vmatpush.msra.mxu2 %v3718_v16 }
 0x700   :  { %2049 = vmatpush.msrb.mxu3 %v3500_v38  ;;  %2069 = vmatpush.msrb.mxu0 %v3626_v42 }
 0x701   :  { %1981 = vmatpush.msra.mxu2 %v3728_v0 }
 0x702   :  { %2050 = vmatpush.msrb.mxu3 %v3512_v62  ;;  %2070 = vmatpush.msrb.mxu0 %v3640_v55 }
 0x703   :  { %1982 = vmatpush.msra.mxu2 %v3743_v34 }
 0x704   :  { %2051 = vmatpush.msrb.mxu3 %v3523_v54  ;;  %2071 = vmatpush.msrb.mxu0 %v3647_v57 }
 0x705   :  { %1983 = vmatpush.msra.mxu2 %v3748_v18 }
 0x706   :  { %2052 = vmatpush.msrb.mxu3 %v3539_v22  ;;  %2072 = vmatpush.msrb.mxu0 %v3655_v3 }
 0x774   :  { %v1767_v35 = vpop.f32.mrf.mxu0 }
 0x775   :  { %v1768_v60 = vadd.f32 %v3821_v8, %v1767_v35 }
 0x779   :  { %v1727_v24 = vpop.f32.mrf.mxu2  ;;  %v1747_v28 = vpop.f32.mrf.mxu3 }
 0x77a   :  { %v1770_v19 = vadd.f32 %v1727_v24, %v3916_v15  ;;  %v1790_v5 = vadd.f32 %v1747_v28, %v3920_v27 }
 0x77c   :  { %v2529_v36 = vmul.f32 -1.442695, %v1770_v19  ;;  %v2530_v33 = vmul.f32 -1.442695, %v1790_v5 }
 0x77e   :  { %2669 = vpow2.f32 %v2529_v36 }
 0x77f   :  { %2671 = vpow2.f32 %v2530_v33 }
 0x784   :  { %v2670_v40 = vpop.eup %2669 }
 0x785   :  { %v2672_v6 = vpop.eup %2671  ;;  %v1774_v20 = vadd.f32 1.0, %v2670_v40 }
 0x786   :  { %v1794_v50 = vadd.f32 1.0, %v2672_v6 }
 0x787   :  { %2673 = vrcp.f32 %v1774_v20  ;;  %v1786_v2 = vand.u32 2147483648, %v1774_v20  ;;  %v1784_v1 = vand.u32 2147483647, %v1774_v20  ;;  %vm1780_vm12 = vweird.f32 %v1774_v20 }
 0x788   :  { %2675 = vrcp.f32 %v1794_v50  ;;  %v1806_v24 = vand.u32 2147483648, %v1794_v50  ;;  %vm1800_vm0 = vweird.f32 %v1794_v50  ;;  %v1804_v28 = vand.u32 2147483647, %v1794_v50 }
 0x789   :  { %v1787_v31 = vor.u32 1.1754944e-38, %v1786_v2  ;;  %vm1785_vm14 = vcmp.eq.f32.partialorder %v1784_v1, 8.507059e+37 }
 0x78a   :  { %v1807_v36 = vor.u32 1.1754944e-38, %v1806_v24  ;;  %vm1805_vm2 = vcmp.eq.f32.partialorder %v1804_v28, 8.507059e+37 }
 0x78d   :  { %v2674_v30 = vpop.eup %2673 }
 0x78e   :  { %v2676_v51 = vpop.eup %2675  ;;  %v1776_v13 = vmul.f32 %v2674_v30, %v1774_v20  ;;  %vm1781_vm11 = vweird.f32 %v2674_v30  ;;  %v3943_v20 = vld [vmem:[%s4134_s6 + $0x38] sm:$0xff] }
 0x78f   :  { %v1796_v29 = vmul.f32 %v2676_v51, %v1794_v50  ;;  %vm1782_vm13 = vmor %vm1780_vm12, %vm1781_vm11  ;;  %vm1801_vm15 = vweird.f32 %v2676_v51  ;;  %v3959_v50 = vld [vmem:[%s4134_s6 + $0x28] sm:$0xff] }
 0x790   :  { %v1777_v21 = vsub.f32 1.0, %v1776_v13  ;;  %vm1802_vm1 = vmor %vm1800_vm0, %vm1801_vm15 }
 0x791   :  { %v1797_v61 = vsub.f32 1.0, %v1796_v29 }
 0x792   :  { %v1778_v46 = vmul.f32 %v2674_v30, %v1777_v21 }
 0x793   :  { %v1798_v63 = vmul.f32 %v2676_v51, %v1797_v61 }
 0x794   :  { %v1779_v59 = vadd.f32 %v2674_v30, %v1778_v46 }
 0x795   :  { %v1799_v56 = vadd.f32 %v2676_v51, %v1798_v63 }
 0x796   :  { %v1783_v58 = vsel %vm1782_vm13, %v2674_v30, %v1779_v59  ;;  %v3967_v30 = vld [vmem:[%s4134_s6 + $0x20] sm:$0xff] }
 0x797   :  { %v1788_v52 = vsel %vm1785_vm14, %v1787_v31, %v1783_v58  ;;  %v1803_v19 = vsel %vm1802_vm1, %v2676_v51, %v1799_v56 }
 0x798   :  { %v1810_v48 = vmul.f32 %v1788_v52, %v1768_v60  ;;  %v1808_v40 = vsel %vm1805_vm2, %v1807_v36, %v1803_v19 }
 0x79a   :  { %v1811_v45 = vadd.f32 %v1810_v48, %v3927_v4 }
 0x79c   :  { %2677 = vtanh.f32 %v1811_v45 }
 0x7a2   :  { %v2678_v5 = vpop.eup %2677 }
 0x7a3   :  { %v1813_v33 = vsub.f32 %v3882_v9, %v2678_v5  ;;  %v3951_v9 = vld [vmem:[%s4134_s6 + $0x30] sm:$0xff] }
 0x7a5   :  { %v1814_v17 = vmul.f32 %v1813_v33, %v1808_v40 }
 0x7a7   :  { %v3931_v6 = vadd.f32 %v2678_v5, %v1814_v17  ;;  %v1455_v5 = vrot.slane %v3927_v4, 4 }
 0x7a9   :  { %2531 = vmatmul.msk.f32.vlgmr.msrb.gmra.mxu1 %vm310_vm10, %v3931_v6  ;;  %2532 = vmatmul.msk.f32.vlgmr.msrb.gmra.mxu2 %vm310_vm10, %v3931_v6 }
 0x7aa   :  { %2533 = vmatmul.msk.f32.vlgmr.msra.gmra.mxu3 %vm310_vm10, %v3931_v6  ;;  %2085 = vmatpush.msrb.mxu1 %v3688_v14 }
 0x7ab   :  { %2154 = vmatpush.msrb.mxu2 %v3943_v20  ;;  %2174 = vmatpush.msra.mxu3 %v3589_v39 }
 0x7ac   :  { %2086 = vmatpush.msrb.mxu1 %v3693_v49 }
 0x7ad   :  { %2155 = vmatpush.msrb.mxu2 %v3951_v9  ;;  %2175 = vmatpush.msra.mxu3 %v3602_v47 }
 0x7ae   :  { %2087 = vmatpush.msrb.mxu1 %v3700_v11 }
 0x7af   :  { %2156 = vmatpush.msrb.mxu2 %v3959_v50  ;;  %2176 = vmatpush.msra.mxu3 %v3610_v41 }
 0x7b0   :  { %2088 = vmatpush.msrb.mxu1 %v3708_v44 }
 0x7b1   :  { %2157 = vmatpush.msrb.mxu2 %v3967_v30  ;;  %2177 = vmatpush.msra.mxu3 %v3618_v23 }
 0x7b2   :  { %2089 = vmatpush.msrb.mxu1 %v3718_v16 }
 0x7b3   :  { %2158 = vmatpush.msrb.mxu2 %v3500_v38  ;;  %2178 = vmatpush.msra.mxu3 %v3626_v42  ;;  %v1291_v38 = vrot.slane %v3916_v15, 4 }
 0x7b4   :  { %2090 = vmatpush.msrb.mxu1 %v3728_v0 }
 0x7b5   :  { %2159 = vmatpush.msrb.mxu2 %v3512_v62  ;;  %2179 = vmatpush.msra.mxu3 %v3640_v55  ;;  %v1373_v62 = vrot.slane %v3920_v27, 4 }
 0x7b6   :  { %2091 = vmatpush.msrb.mxu1 %v3743_v34 }
 0x7b7   :  { %2160 = vmatpush.msrb.mxu2 %v3523_v54  ;;  %2180 = vmatpush.msra.mxu3 %v3647_v57 }
 0x7b8   :  { %2092 = vmatpush.msrb.mxu1 %v3748_v18 }
 0x7b9   :  { %2161 = vmatpush.msrb.mxu2 %v3539_v22  ;;  %2181 = vmatpush.msra.mxu3 %v3655_v3 }
 0x826   :  { %v1836_v51 = vpop.f32.mrf.mxu1 }
 0x827   :  { %v1879_v13 = vadd.f32 %v1836_v51, %v1291_v38 }
 0x829   :  { %v2534_v21 = vmul.f32 -1.442695, %v1879_v13 }
 0x82b   :  { %2679 = vpow2.f32 %v2534_v21 }
 0x82c   :  { %v1856_v2 = vpop.f32.mrf.mxu2 }
 0x82d   :  { %v1899_v29 = vadd.f32 %v1856_v2, %v1373_v62  ;;  %v1876_v48 = vpop.f32.mrf.mxu3 }
 0x82e   :  { %v1877_v24 = vadd.f32 %v3821_v8, %v1876_v48 }
 0x82f   :  { %v2535_v46 = vmul.f32 -1.442695, %v1899_v29 }
 0x831   :  { %v2680_v54 = vpop.eup %2679  ;;  %2681 = vpow2.f32 %v2535_v46 }
 0x832   :  { %v1883_v1 = vadd.f32 1.0, %v2680_v54 }
 0x834   :  { %2683 = vrcp.f32 %v1883_v1  ;;  %v1895_v15 = vand.u32 2147483648, %v1883_v1  ;;  %v1893_v58 = vand.u32 2147483647, %v1883_v1  ;;  %vm1889_vm4 = vweird.f32 %v1883_v1 }
 0x836   :  { %v1896_v45 = vor.u32 1.1754944e-38, %v1895_v15  ;;  %vm1894_vm6 = vcmp.eq.f32.partialorder %v1893_v58, 8.507059e+37 }
 0x837   :  { %v2682_v35 = vpop.eup %2681 }
 0x838   :  { %v1903_v59 = vadd.f32 1.0, %v2682_v35 }
 0x83a   :  { %v2684_v22 = vpop.eup %2683  ;;  %2685 = vrcp.f32 %v1903_v59  ;;  %v1915_v38 = vand.u32 2147483648, %v1903_v59  ;;  %vm1909_vm8 = vweird.f32 %v1903_v59  ;;  %v1913_v51 = vand.u32 2147483647, %v1903_v59 }
 0x83b   :  { %v1885_v31 = vmul.f32 %v2684_v22, %v1883_v1  ;;  %vm1890_vm3 = vweird.f32 %v2684_v22 }
 0x83c   :  { %vm1891_vm5 = vmor %vm1889_vm4, %vm1890_vm3  ;;  %v1916_v62 = vor.u32 1.1754944e-38, %v1915_v38  ;;  %vm1914_vm11 = vcmp.eq.f32.partialorder %v1913_v51, 8.507059e+37 }
 0x83d   :  { %v1886_v61 = vsub.f32 1.0, %v1885_v31 }
 0x83f   :  { %v1887_v60 = vmul.f32 %v2684_v22, %v1886_v61 }
 0x840   :  { %v2686_v52 = vpop.eup %2685 }
 0x841   :  { %v1905_v27 = vmul.f32 %v2686_v52, %v1903_v59  ;;  %v1888_v63 = vadd.f32 %v2684_v22, %v1887_v60  ;;  %vm1910_vm7 = vweird.f32 %v2686_v52 }
 0x842   :  { %vm1911_vm9 = vmor %vm1909_vm8, %vm1910_vm7 }
 0x843   :  { %v1906_v56 = vsub.f32 1.0, %v1905_v27  ;;  %v1892_v28 = vsel %vm1891_vm5, %v2684_v22, %v1888_v63 }
 0x844   :  { %v1897_v19 = vsel %vm1894_vm6, %v1896_v45, %v1892_v28 }
 0x845   :  { %v1919_v36 = vmul.f32 %v1897_v19, %v1877_v24  ;;  %v1907_v33 = vmul.f32 %v2686_v52, %v1906_v56  ;;  %v4041_v24 = vadd.f32 %v3826_v43, %v3869_v37 }
 0x847   :  { %v1920_v40 = vadd.f32 %v1919_v36, %v1455_v5  ;;  %v1908_v17 = vadd.f32 %v2686_v52, %v1907_v33 }
 0x849   :  { %2687 = vtanh.f32 %v1920_v40  ;;  %v1912_v13 = vsel %vm1911_vm9, %v2686_v52, %v1908_v17 }
 0x84a   :  { %v1917_v29 = vsel %vm1914_vm11, %v1916_v62, %v1912_v13 }
 0x84f   :  { %v2688_v21 = vpop.eup %2687 }
 0x850   :  { %v1922_v2 = vsub.f32 %v3931_v6, %v2688_v21 }
 0x852   :  { %v1923_v46 = vmul.f32 %v1922_v2, %v1917_v29 }
 0x854   :  { %v3988_v54 = vadd.f32 %v2688_v21, %v1923_v46 }
 0x856   :  { %2536 = vmatmul.msk.f32.vlgmr.msra.gmra.mxu0 %vm310_vm10, %v3988_v54  ;;  %2537 = vmatmul.msk.f32.vlgmr.msra.gmra.mxu1 %vm310_vm10, %v3988_v54 }
 0x857   :  { %2538 = vmatmul.msk.f32.vlgmr.msra.gmra.mxu2 %vm310_vm10, %v3988_v54  ;;  %2194 = vmatpush.msra.mxu0 %v3688_v14 }
 0x858   :  { %2263 = vmatpush.msra.mxu1 %v3943_v20  ;;  %2283 = vmatpush.msra.mxu2 %v3589_v39  ;;  %v2751_v39 = vld [vmem:[%s4134_s6 + $0x18] sm:$0xff] }
 0x859   :  { %2195 = vmatpush.msra.mxu0 %v3693_v49 }
 0x85a   :  { %2264 = vmatpush.msra.mxu1 %v3951_v9  ;;  %2284 = vmatpush.msra.mxu2 %v3602_v47  ;;  %v2752_v47 = vld [vmem:[%s4134_s6 + $0x10] sm:$0xff] }
 0x85b   :  { %2196 = vmatpush.msra.mxu0 %v3700_v11 }
 0x85c   :  { %2265 = vmatpush.msra.mxu1 %v3959_v50  ;;  %2285 = vmatpush.msra.mxu2 %v3610_v41  ;;  %v2753_v41 = vld [vmem:[%s4134_s6 + $0x8] sm:$0xff] }
 0x85d   :  { %2197 = vmatpush.msra.mxu0 %v3708_v44 }
 0x85e   :  { %2266 = vmatpush.msra.mxu1 %v3967_v30  ;;  %2286 = vmatpush.msra.mxu2 %v3618_v23  ;;  %v2754_v23 = vld [vmem:[%s4134_s6] sm:$0xff] }
 0x85f   :  { %2198 = vmatpush.msra.mxu0 %v3718_v16 }
 0x860   :  { %2267 = vmatpush.msra.mxu1 %v2751_v39  ;;  %2287 = vmatpush.msra.mxu2 %v3626_v42  ;;  %v4030_v42 = vadd.f32 %v3797_v32, %v3814_v25 }
 0x861   :  { %2199 = vmatpush.msra.mxu0 %v3728_v0 }
 0x862   :  { %2268 = vmatpush.msra.mxu1 %v2752_v47  ;;  %2288 = vmatpush.msra.mxu2 %v3640_v55  ;;  %v4034_v55 = vadd.f32 %v3806_v10, %v3871_v7 }
 0x863   :  { %2200 = vmatpush.msra.mxu0 %v3743_v34 }
 0x864   :  { %2269 = vmatpush.msra.mxu1 %v2753_v41  ;;  %2289 = vmatpush.msra.mxu2 %v3647_v57  ;;  %v1374_v2 = vrot.slane %v4034_v55, 4 }
 0x865   :  { %2201 = vmatpush.msra.mxu0 %v3748_v18 }
 0x866   :  { %2270 = vmatpush.msra.mxu1 %v2754_v23  ;;  %2290 = vmatpush.msra.mxu2 %v3655_v3 }
 0x8d3   :  { %v1945_v4 = vpop.f32.mrf.mxu0  ;;  %v1965_v6 = vpop.f32.mrf.mxu1 }
 0x8d4   :  { %v1988_v57 = vadd.f32 %v1945_v4, %v4030_v42  ;;  %v2008_v20 = vadd.f32 %v1965_v6, %v4034_v55 }
 0x8d6   :  { %v2539_v9 = vmul.f32 -1.442695, %v1988_v57  ;;  %v2540_v50 = vmul.f32 -1.442695, %v2008_v20 }
 0x8d8   :  { %2689 = vpow2.f32 %v2539_v9 }
 0x8d9   :  { %2691 = vpow2.f32 %v2540_v50 }
 0x8da   :  { %v1985_v58 = vpop.f32.mrf.mxu2 }
 0x8db   :  { %v1986_v63 = vadd.f32 %v3821_v8, %v1985_v58 }
 0x8de   :  { %v2690_v30 = vpop.eup %2689 }
 0x8df   :  { %v2692_v3 = vpop.eup %2691  ;;  %v1992_v1 = vadd.f32 1.0, %v2690_v30 }
 0x8e0   :  { %v2012_v35 = vadd.f32 1.0, %v2692_v3 }
 0x8e1   :  { %2693 = vrcp.f32 %v1992_v1  ;;  %v2004_v61 = vand.u32 2147483648, %v1992_v1  ;;  %v2002_v60 = vand.u32 2147483647, %v1992_v1  ;;  %vm1998_vm13 = vweird.f32 %v1992_v1 }
 0x8e2   :  { %2695 = vrcp.f32 %v2012_v35  ;;  %v2024_v33 = vand.u32 2147483648, %v2012_v35  ;;  %vm2018_vm1 = vweird.f32 %v2012_v35  ;;  %v2022_v40 = vand.u32 2147483647, %v2012_v35 }
 0x8e3   :  { %v2005_v27 = vor.u32 1.1754944e-38, %v2004_v61  ;;  %vm2003_vm15 = vcmp.eq.f32.partialorder %v2002_v60, 8.507059e+37 }
 0x8e4   :  { %v2025_v51 = vor.u32 1.1754944e-38, %v2024_v33  ;;  %vm2023_vm3 = vcmp.eq.f32.partialorder %v2022_v40, 8.507059e+37 }
 0x8e7   :  { %v2694_v25 = vpop.eup %2693 }
 0x8e8   :  { %v2696_v59 = vpop.eup %2695  ;;  %v1994_v7 = vmul.f32 %v2694_v25, %v1992_v1  ;;  %vm1999_vm12 = vweird.f32 %v2694_v25 }
 0x8e9   :  { %v2014_v31 = vmul.f32 %v2696_v59, %v2012_v35  ;;  %vm2000_vm14 = vmor %vm1998_vm13, %vm1999_vm12  ;;  %vm2019_vm0 = vweird.f32 %v2696_v59  ;;  %v1456_v35 = vrot.slane %v4041_v24, 4 }
 0x8ea   :  { %v1995_v22 = vsub.f32 1.0, %v1994_v7  ;;  %vm2020_vm2 = vmor %vm2018_vm1, %vm2019_vm0 }
 0x8eb   :  { %v2015_v48 = vsub.f32 1.0, %v2014_v31 }
 0x8ec   :  { %v1996_v15 = vmul.f32 %v2694_v25, %v1995_v22 }
 0x8ed   :  { %v2016_v19 = vmul.f32 %v2696_v59, %v2015_v48 }
 0x8ee   :  { %v1997_v52 = vadd.f32 %v2694_v25, %v1996_v15 }
 0x8ef   :  { %v2017_v36 = vadd.f32 %v2696_v59, %v2016_v19 }
 0x8f0   :  { %v2001_v45 = vsel %vm2000_vm14, %v2694_v25, %v1997_v52 }
 0x8f1   :  { %v2006_v56 = vsel %vm2003_vm15, %v2005_v27, %v2001_v45  ;;  %v2021_v17 = vsel %vm2020_vm2, %v2696_v59, %v2017_v36  ;;  %v1284_v45 = vadd.f32 %v3797_v32, %v3816_v12 }
 0x8f2   :  { %v2028_v28 = vmul.f32 %v2006_v56, %v1986_v63  ;;  %v2026_v21 = vsel %vm2023_vm3, %v2025_v51, %v2021_v17  ;;  %v4073_v56 = vadd.f32 %v3806_v10, %v3875_v26 }
 0x8f4   :  { %v2029_v5 = vadd.f32 %v2028_v28, %v4041_v24 }
 0x8f6   :  { %2697 = vtanh.f32 %v2029_v5 }
 0x8fc   :  { %v2698_v38 = vpop.eup %2697 }
 0x8fd   :  { %v2031_v13 = vsub.f32 %v3988_v54, %v2698_v38 }
 0x8ff   :  { %v2032_v37 = vmul.f32 %v2031_v13, %v2026_v21 }
 0x901   :  { %v4045_v62 = vadd.f32 %v2698_v38, %v2032_v37 }
 0x903   :  { %2541 = vmatmul.msk.f32.vlgmr.msrb.gmra.mxu3 %vm310_vm10, %v4045_v62  ;;  %2542 = vmatmul.msk.f32.vlgmr.msrb.gmra.mxu0 %vm310_vm10, %v4045_v62 }
 0x904   :  { %2543 = vmatmul.msk.f32.vlgmr.msrb.gmra.mxu1 %vm310_vm10, %v4045_v62  ;;  %2303 = vmatpush.msrb.mxu3 %v3688_v14  ;;  %v1292_v14 = vrot.slane %v4030_v42, 4 }
 0x906   :  { %2304 = vmatpush.msrb.mxu3 %v3693_v49 }
 0x908   :  { %2305 = vmatpush.msrb.mxu3 %v3700_v11 }
 0x90a   :  { %2306 = vmatpush.msrb.mxu3 %v3708_v44 }
 0x90c   :  { %2307 = vmatpush.msrb.mxu3 %v3718_v16 }
 0x90e   :  { %2308 = vmatpush.msrb.mxu3 %v3728_v0 }
 0x910   :  { %2309 = vmatpush.msrb.mxu3 %v3743_v34 }
 0x912   :  { %2310 = vmatpush.msrb.mxu3 %v3748_v18 }
 0x980   :  { %v2074_v29 = vpop.f32.mrf.mxu0 }
 0x981   :  { %v2117_v46 = vadd.f32 %v2074_v29, %v1374_v2  ;;  %v2094_v57 = vpop.f32.mrf.mxu1 }
 0x982   :  { %v2095_v30 = vadd.f32 %v3821_v8, %v2094_v57 }
 0x983   :  { %v2545_v54 = vmul.f32 -1.442695, %v2117_v46 }
 0x985   :  { %2699 = vpow2.f32 %v2545_v54 }
 0x986   :  { %v2054_v49 = vpop.f32.mrf.mxu3 }
 0x987   :  { %v2097_v39 = vadd.f32 %v2054_v49, %v1292_v14 }
 0x989   :  { %v2544_v11 = vmul.f32 -1.442695, %v2097_v39 }
 0x98b   :  { %2701 = vpow2.f32 %v2544_v11  ;;  %v2700_v44 = vpop.eup %2699  ;;  %v4079_v11 = vadd.f32 %v3826_v43, %v3873_v53  ;;  %v1293_v53 = vrot.slane %v1284_v45, 4 }
 0x98c   :  { %v2121_v47 = vadd.f32 1.0, %v2700_v44 }
 0x98e   :  { %v2133_v31 = vand.u32 2147483648, %v2121_v47  ;;  %vm2127_vm9 = vweird.f32 %v2121_v47  ;;  %v2131_v61 = vand.u32 2147483647, %v2121_v47 }
 0x990   :  { %v2134_v58 = vor.u32 1.1754944e-38, %v2133_v31  ;;  %vm2132_vm12 = vcmp.eq.f32.partialorder %v2131_v61, 8.507059e+37 }
 0x991   :  { %v2702_v16 = vpop.eup %2701 }
 0x992   :  { %v2101_v0 = vadd.f32 1.0, %v2702_v16 }
 0x994   :  { %2703 = vrcp.f32 %v2101_v0  ;;  %v2113_v4 = vand.u32 2147483648, %v2101_v0  ;;  %v2111_v42 = vand.u32 2147483647, %v2101_v0  ;;  %vm2107_vm5 = vweird.f32 %v2101_v0 }
 0x995   :  { %2705 = vrcp.f32 %v2121_v47 }
 0x996   :  { %v2114_v50 = vor.u32 1.1754944e-38, %v2113_v4  ;;  %vm2112_vm7 = vcmp.eq.f32.partialorder %v2111_v42, 8.507059e+37 }
 0x99a   :  { %v2704_v34 = vpop.eup %2703 }
 0x99b   :  { %v2706_v18 = vpop.eup %2705  ;;  %v2103_v41 = vmul.f32 %v2704_v34, %v2101_v0  ;;  %vm2108_vm4 = vweird.f32 %v2704_v34 }
 0x99c   :  { %v2123_v55 = vmul.f32 %v2706_v18, %v2121_v47  ;;  %vm2109_vm6 = vmor %vm2107_vm5, %vm2108_vm4  ;;  %vm2128_vm8 = vweird.f32 %v2706_v18 }
 0x99d   :  { %v2104_v23 = vsub.f32 1.0, %v2103_v41  ;;  %vm2129_vm11 = vmor %vm2127_vm9, %vm2128_vm8 }
 0x99e   :  { %v2124_v9 = vsub.f32 1.0, %v2123_v55 }
 0x99f   :  { %v2105_v6 = vmul.f32 %v2704_v34, %v2104_v23 }
 0x9a0   :  { %v2125_v59 = vmul.f32 %v2706_v18, %v2124_v9 }
 0x9a1   :  { %v2106_v20 = vadd.f32 %v2704_v34, %v2105_v6 }
 0x9a2   :  { %v2126_v22 = vadd.f32 %v2706_v18, %v2125_v59 }
 0x9a3   :  { %v2110_v3 = vsel %vm2109_vm6, %v2704_v34, %v2106_v20  ;;  %v2368_v20 = vld [vmem:[%s4136_s9 + $0x38] sm:$0xff] }
 0x9a4   :  { %v2115_v1 = vsel %vm2112_vm7, %v2114_v50, %v2110_v3  ;;  %v2130_v15 = vsel %vm2129_vm11, %v2706_v18, %v2126_v22  ;;  %2384 = vmatpush.msrb.mxu0 %v2368_v20  ;;  %v2367_v50 = vld [vmem:[%s4136_s9 + $0x30] sm:$0xff] }
 0x9a5   :  { %v2137_v25 = vmul.f32 %v2115_v1, %v2095_v30  ;;  %v2135_v48 = vsel %vm2132_vm12, %v2134_v58, %v2130_v15  ;;  %v1375_v30 = vrot.slane %v4073_v56, 4  ;;  %v2366_v1 = vld [vmem:[%s4136_s9 + $0x28] sm:$0xff]  ;;  %v2363_v22 = vld [vmem:[%s4136_s9 + $0x10] sm:$0xff]  ;;  %v16_v58 = vstv %s4137_s10 }
 0x9a6   :  { %2385 = vmatpush.msrb.mxu0 %v2367_v50  ;;  %v2362_v15 = vld [vmem:[%s4136_s9 + $0x8] sm:$0xff]  ;;  %17 = vst [vmem:[#allocation3] sm:$0x1] %v16_v58 }
 0x9a7   :  { %v2138_v7 = vadd.f32 %v2137_v25, %v1456_v35  ;;  %v2365_v25 = vld [vmem:[%s4136_s9 + $0x20] sm:$0xff] }
 0x9a8   :  { %2386 = vmatpush.msrb.mxu0 %v2366_v1 }
 0x9a9   :  { %2707 = vtanh.f32 %v2138_v7  ;;  %v2364_v7 = vld [vmem:[%s4136_s9 + $0x18] sm:$0xff] }
 0x9aa   :  { %2387 = vmatpush.msrb.mxu0 %v2365_v25 }
 0x9ac   :  { %2388 = vmatpush.msrb.mxu0 %v2364_v7 }
 0x9ae   :  { %2389 = vmatpush.msrb.mxu0 %v2363_v22 }
 0x9af   :  { %v2708_v60 = vpop.eup %2707 }
 0x9b0   :  { %v2140_v52 = vsub.f32 %v4045_v62, %v2708_v60  ;;  %2390 = vmatpush.msrb.mxu0 %v2362_v15 }
 0x9b2   :  { %v2141_v27 = vmul.f32 %v2140_v52, %v2135_v48 }
 0x9b4   :  { %v2142_v63 = vadd.f32 %v2708_v60, %v2141_v27  ;;  %v2361_v60 = vld [vmem:[%s4136_s9] sm:$0xff] }
 0x9b5   :  { %2391 = vmatpush.msrb.mxu0 %v2361_v60 }
 0x9b6   :  { %2546 = vmatmul.msk.f32.vlgmr.msrb.gmra.mxu2 %vm310_vm10, %v2142_v63  ;;  %2547 = vmatmul.msk.f32.vlgmr.msra.gmra.mxu3 %vm310_vm10, %v2142_v63 }
 0x9b7   :  { %2548 = vmatmul.msk.f32.vlgmr.msra.gmra.mxu0 %vm310_vm10, %v2142_v63 }
 0xa34   :  { %v2203_v2 = vpop.f32.mrf.mxu0 }
 0xa35   :  { %v2204_v14 = vadd.f32 %v3821_v8, %v2203_v2 }
 0xa39   :  { %v2163_v24 = vpop.f32.mrf.mxu2  ;;  %v2183_v28 = vpop.f32.mrf.mxu3 }
 0xa3a   :  { %v2206_v19 = vadd.f32 %v2163_v24, %v1284_v45  ;;  %v2226_v5 = vadd.f32 %v2183_v28, %v4073_v56 }
 0xa3c   :  { %v2549_v36 = vmul.f32 -1.442695, %v2206_v19  ;;  %v2550_v33 = vmul.f32 -1.442695, %v2226_v5 }
 0xa3e   :  { %2709 = vpow2.f32 %v2549_v36 }
 0xa3f   :  { %2711 = vpow2.f32 %v2550_v33 }
 0xa44   :  { %v2710_v40 = vpop.eup %2709 }
 0xa45   :  { %v2712_v17 = vpop.eup %2711  ;;  %v2210_v38 = vadd.f32 1.0, %v2710_v40 }
 0xa46   :  { %v2230_v51 = vadd.f32 1.0, %v2712_v17 }
 0xa47   :  { %2713 = vrcp.f32 %v2210_v38  ;;  %v2222_v26 = vand.u32 2147483648, %v2210_v38  ;;  %v2220_v62 = vand.u32 2147483647, %v2210_v38  ;;  %vm2216_vm14 = vweird.f32 %v2210_v38 }
 0xa48   :  { %2715 = vrcp.f32 %v2230_v51  ;;  %v2242_v34 = vand.u32 2147483648, %v2230_v51  ;;  %vm2236_vm2 = vweird.f32 %v2230_v51  ;;  %v2240_v18 = vand.u32 2147483647, %v2230_v51 }
 0xa49   :  { %v2223_v46 = vor.u32 1.1754944e-38, %v2222_v26  ;;  %vm2221_vm0 = vcmp.eq.f32.partialorder %v2220_v62, 8.507059e+37 }
 0xa4a   :  { %v2243_v23 = vor.u32 1.1754944e-38, %v2242_v34  ;;  %vm2241_vm4 = vcmp.eq.f32.partialorder %v2240_v18, 8.507059e+37 }
 0xa4d   :  { %v2714_v32 = vpop.eup %2713 }
 0xa4e   :  { %v2716_v12 = vpop.eup %2715  ;;  %v2212_v13 = vmul.f32 %v2714_v32, %v2210_v38  ;;  %vm2217_vm13 = vweird.f32 %v2714_v32  ;;  %v2755_v38 = vld [vmem:[%s4135_s8] ss:$0 sm:$0xff] }
 0xa4f   :  { %v2232_v21 = vmul.f32 %v2716_v12, %v2230_v51  ;;  %vm2218_vm15 = vmor %vm2216_vm14, %vm2217_vm13  ;;  %vm2237_vm1 = vweird.f32 %v2716_v12  ;;  %vm2396_vm14 = vcmask 3072  }
 0xa50   :  { %v2213_v10 = vsub.f32 1.0, %v2212_v13  ;;  %vm2238_vm3 = vmor %vm2236_vm2, %vm2237_vm1  ;;  %v1457_v13 = vrot.slane %v4079_v11, 4 }
 0xa51   :  { %v2233_v54 = vsub.f32 1.0, %v2232_v21 }
 0xa52   :  { %v2214_v37 = vmul.f32 %v2714_v32, %v2213_v10 }
 0xa53   :  { %v2234_v16 = vmul.f32 %v2716_v12, %v2233_v54 }
 0xa54   :  { %v2215_v29 = vadd.f32 %v2714_v32, %v2214_v37 }
 0xa55   :  { %v2235_v0 = vadd.f32 %v2716_v12, %v2234_v16 }
 0xa56   :  { %v2219_v49 = vsel %vm2218_vm15, %v2714_v32, %v2215_v29 }
 0xa57   :  { %v2224_v39 = vsel %vm2221_vm0, %v2223_v46, %v2219_v49  ;;  %v2239_v41 = vsel %vm2238_vm3, %v2716_v12, %v2235_v0 }
 0xa58   :  { %v2246_v44 = vmul.f32 %v2224_v39, %v2204_v14  ;;  %v2244_v4 = vsel %vm2241_vm4, %v2243_v23, %v2239_v41 }
 0xa5a   :  { %v2247_v47 = vadd.f32 %v2246_v44, %v4079_v11  ;;  %v2568_v11 = vld [vmem:[#allocation3] ss:$0 sm:$0xff] }
 0xa5c   :  { %2717 = vtanh.f32 %v2247_v47 }
 0xa62   :  { %v2718_v8 = vpop.eup %2717 }
 0xa63   :  { %v2249_v55 = vsub.f32 %v2142_v63, %v2718_v8 }
 0xa65   :  { %v2250_v6 = vmul.f32 %v2249_v55, %v2244_v4 }
 0xa67   :  { %v4082_v43 = vadd.f32 %v2718_v8, %v2250_v6 }
 0xa69   :  { %2551 = vmatmul.msk.f32.vlgmr.msra.gmra.mxu1 %vm310_vm10, %v4082_v43  ;;  %2552 = vmatmul.msk.f32.vlgmr.msra.gmra.mxu2 %vm310_vm10, %v4082_v43 }
 0xa6a   :  { %2553 = vmatmul.msk.f32.vlgmr.msrb.gmra.mxu3 %vm310_vm10, %v4082_v43 }
 0xae6   :  { %v2272_v42 = vpop.f32.mrf.mxu1 }
 0xae7   :  { %v2315_v57 = vadd.f32 %v2272_v42, %v1293_v53 }
 0xae9   :  { %v2554_v9 = vmul.f32 -1.442695, %v2315_v57 }
 0xaeb   :  { %2719 = vpow2.f32 %v2554_v9 }
 0xaec   :  { %v2292_v3 = vpop.f32.mrf.mxu2 }
 0xaed   :  { %v2335_v35 = vadd.f32 %v2292_v3, %v1375_v30  ;;  %v2312_v5 = vpop.f32.mrf.mxu3 }
 0xaee   :  { %v2313_v51 = vadd.f32 %v2755_v38, %v2312_v5 }
 0xaef   :  { %v2555_v59 = vmul.f32 -1.442695, %v2335_v35 }
 0xaf1   :  { %v2720_v31 = vpop.eup %2719  ;;  %2721 = vpow2.f32 %v2555_v59 }
 0xaf2   :  { %v2319_v61 = vadd.f32 1.0, %v2720_v31 }
 0xaf4   :  { %2723 = vrcp.f32 %v2319_v61  ;;  %v2331_v56 = vand.u32 2147483648, %v2319_v61  ;;  %v2329_v28 = vand.u32 2147483647, %v2319_v61  ;;  %vm2325_vm6 = vweird.f32 %v2319_v61 }
 0xaf6   :  { %v2332_v40 = vor.u32 1.1754944e-38, %v2331_v56  ;;  %vm2330_vm8 = vcmp.eq.f32.partialorder %v2329_v28, 8.507059e+37 }
 0xaf7   :  { %v2722_v52 = vpop.eup %2721 }
 0xaf8   :  { %v2339_v48 = vadd.f32 1.0, %v2722_v52 }
 0xafa   :  { %v2724_v27 = vpop.eup %2723  ;;  %2725 = vrcp.f32 %v2339_v48  ;;  %v2351_v62 = vand.u32 2147483648, %v2339_v48  ;;  %vm2345_vm11 = vweird.f32 %v2339_v48  ;;  %v2349_v2 = vand.u32 2147483647, %v2339_v48 }
 0xafb   :  { %v2321_v63 = vmul.f32 %v2724_v27, %v2319_v61  ;;  %vm2326_vm5 = vweird.f32 %v2724_v27 }
 0xafc   :  { %vm2327_vm7 = vmor %vm2325_vm6, %vm2326_vm5  ;;  %v2352_v54 = vor.u32 1.1754944e-38, %v2351_v62  ;;  %vm2350_vm13 = vcmp.eq.f32.partialorder %v2349_v2, 8.507059e+37 }
 0xafd   :  { %v2322_v45 = vsub.f32 1.0, %v2321_v63 }
 0xaff   :  { %v2323_v24 = vmul.f32 %v2724_v27, %v2322_v45 }
 0xb00   :  { %v2726_v19 = vpop.eup %2725 }
 0xb01   :  { %v2341_v36 = vmul.f32 %v2726_v19, %v2339_v48  ;;  %v2324_v33 = vadd.f32 %v2724_v27, %v2323_v24  ;;  %vm2346_vm9 = vweird.f32 %v2726_v19 }
 0xb02   :  { %vm2347_vm12 = vmor %vm2345_vm11, %vm2346_vm9 }
 0xb03   :  { %v2342_v17 = vsub.f32 1.0, %v2341_v36  ;;  %v2328_v32 = vsel %vm2327_vm7, %v2724_v27, %v2324_v33 }
 0xb04   :  { %v2333_v12 = vsel %vm2330_vm8, %v2332_v40, %v2328_v32 }
 0xb05   :  { %v2355_v10 = vmul.f32 %v2333_v12, %v2313_v51  ;;  %v2343_v26 = vmul.f32 %v2726_v19, %v2342_v17 }
 0xb07   :  { %v2356_v21 = vadd.f32 %v2355_v10, %v1457_v13  ;;  %v2344_v37 = vadd.f32 %v2726_v19, %v2343_v26 }
 0xb09   :  { %2727 = vtanh.f32 %v2356_v21  ;;  %v2348_v29 = vsel %vm2347_vm12, %v2726_v19, %v2344_v37 }
 0xb0a   :  { %v2353_v49 = vsel %vm2350_vm13, %v2352_v54, %v2348_v29 }
 0xb0f   :  { %v2728_v46 = vpop.eup %2727 }
 0xb10   :  { %v2358_v14 = vsub.f32 %v4082_v43, %v2728_v46 }
 0xb12   :  { %v2359_v39 = vmul.f32 %v2358_v14, %v2353_v49 }
 0xb14   :  { %v2360_v44 = vadd.f32 %v2728_v46, %v2359_v39 }
 0xb16   :  { %2556 = vmatmul.msk.f32.vlgmr.msrb.gmra.mxu0 %vm310_vm10, %v2360_v44 }
 0xb93   :  { %v2393_v16 = vpop.f32.mrf.mxu0 }
 0xb94   :  { %v2394_v47 = vadd.f32 %v2568_v11, %v2393_v16 }
 0xb96   :  { %2397 = vst.msk [vmem:[%s4138_s11] sm:$0xf] %vm2396_vm14, %v2394_v47 }

</bundles_post_ra>
